<compile_context>
chip_gen: v5e
topology: v5e:2x2
jax: 0.10.0
libtpu: 0.0.40
codegen_flags: <defaults>
</compile_context>

<pallas_src>
import functools

import jax
import jax.numpy as jnp
from jax import lax
from jax.experimental import pallas as pl
from jax.experimental.pallas import tpu as pltpu


def _keep_mask(shape, seed_u32, row_offset, drop_threshold):
    """Stateless dropout keep-mask via a murmur3-style integer mixer.

    Indexed by *global* (row, col) so the mask is invariant to the row-block
    tiling and every position gets an independent-looking draw.
    keep probability = 1 - dropout_p  (P(hash < drop_threshold) = dropout_p).
    """
    r = (lax.broadcasted_iota(jnp.int32, shape, 0) + row_offset).astype(jnp.uint32)
    c = lax.broadcasted_iota(jnp.int32, shape, 1).astype(jnp.uint32)
    x = r * jnp.uint32(0x9E3779B1)
    x = x ^ (c * jnp.uint32(0x85EBCA77))
    x = x + seed_u32
    # fmix32 finalizer
    x = x ^ (x >> 16)
    x = x * jnp.uint32(0x7FEB352D)
    x = x ^ (x >> 15)
    x = x * jnp.uint32(0x846CA68B)
    x = x ^ (x >> 16)
    return x >= jnp.uint32(drop_threshold)


def _att_kernel(seed_ref,                       # scalar prefetch (SMEM), int32[1]
                hq_ref, hkv_ref, e_ref,         # bf16 activations
                wq_ref, bq_ref,                 # Q weights (1/sqrt(d_k) folded in)
                wkv_ref, bkv_ref,               # fused [K | V] weights
                weg_ref, beg_ref,               # fused [proj_e | gate] weights
                o_ref,                          # f32 [tq, out_dim]
                *, dropout_p):
    f32, bf16 = jnp.float32, jnp.bfloat16
    tq = hq_ref.shape[0]
    n = hkv_ref.shape[0]
    out_dim = o_ref.shape[1]

    # ---- projections: bf16 MXU feeds, f32 accumulation, f32 bias adds ----
    q = jnp.dot(hq_ref[...], wq_ref[...], preferred_element_type=f32) + bq_ref[...]
    kv = jnp.dot(hkv_ref[...], wkv_ref[...], preferred_element_type=f32) + bkv_ref[...]
    eg = jnp.dot(e_ref[...], weg_ref[...], preferred_element_type=f32) + beg_ref[...]

    k = kv[:, :out_dim]
    v = kv[:, out_dim:].astype(bf16)
    proj_e = eg[:, :n]
    gate = jax.nn.sigmoid(eg[:, n:])

    # ---- scores (scale already folded into wq/bq) + edge bias ----
    scores = lax.dot_general(q.astype(bf16), k.astype(bf16),
                             (((1,), (1,)), ((), ())),
                             preferred_element_type=f32)
    ue = scores + proj_e

    # ---- numerically stable softmax over the last axis ----
    m = jnp.max(ue, axis=-1, keepdims=True)
    p = jnp.exp(ue - m)
    denom = jnp.sum(p, axis=-1, keepdims=True)

    # ---- dropout(p) * gate collapsed into a single combined multiplier ----
    #   attm = p / denom;  attm = attm * keep / (1 - dp);  out_w = gate * attm
    inv = f32(1.0 / (1.0 - dropout_p)) / denom            # [tq, 1]
    drop_threshold = min(int(round(dropout_p * (1 << 32))), (1 << 32) - 1)
    keep = _keep_mask((tq, n),
                      seed_ref[0].astype(jnp.uint32),
                      pl.program_id(0) * tq,
                      drop_threshold)
    w = p * jnp.where(keep, gate * inv, f32(0.0))

    # ---- weighted values ----
    o_ref[...] = jnp.dot(w.astype(bf16), v, preferred_element_type=f32)


@functools.partial(jax.jit, static_argnames=("dropout_p", "block_q"))
def att_forward(h, e, params, seed, *, dropout_p=0.2, block_q=256):
    """Fused Att forward.  h: [N, in_dim] f32;  e: [N, e_dim] f32 with e_dim == N."""
    (wq, bq, wk, bk, wv, bv, wpe, bpe, wg, bg) = params   # torch layout [out, in], [out]
    n, in_dim = h.shape
    e_dim = e.shape[1]
    out_dim = wq.shape[0]
    if e_dim != n:
        raise ValueError("e_dim must equal N for `scores + proj_e` to broadcast.")

    tq = min(block_q, n)
    if n % tq != 0 or tq % 8 != 0:
        raise ValueError(f"N={n} must be a multiple of the row block tq={tq} (and tq % 8 == 0).")

    f32, bf16 = jnp.float32, jnp.bfloat16
    scale = 1.0 / (float(out_dim) ** 0.5)

    # Pack weights to [in, out] (bf16 MXU feeds); fold 1/sqrt(d_k) into Q; fuse K|V and proj_e|gate.
    wq_s = (wq.T * scale).astype(bf16)                                # [in, out]
    bq_s = (bq * scale).astype(f32).reshape(1, out_dim)
    w_kv = jnp.concatenate([wk.T, wv.T], axis=1).astype(bf16)         # [in, 2*out]
    b_kv = jnp.concatenate([bk, bv]).astype(f32).reshape(1, 2 * out_dim)
    w_eg = jnp.concatenate([wpe.T, wg.T], axis=1).astype(bf16)        # [e, 2*e]
    b_eg = jnp.concatenate([bpe, bg]).astype(f32).reshape(1, 2 * e_dim)

    h_bf = h.astype(bf16)
    e_bf = e.astype(bf16)
    seed_arr = jnp.reshape(jnp.asarray(seed, jnp.int32), (1,))

    grid = (n // tq,)
    kernel = functools.partial(_att_kernel, dropout_p=dropout_p)

    grid_spec = pltpu.PrefetchScalarGridSpec(
        num_scalar_prefetch=1,
        grid=grid,
        in_specs=[
            pl.BlockSpec((tq, in_dim), lambda i, s: (i, 0)),            # h row block (Q)
            pl.BlockSpec((n, in_dim), lambda i, s: (0, 0)),             # full h (K, V) - revisited, no re-DMA
            pl.BlockSpec((tq, e_dim), lambda i, s: (i, 0)),             # e row block
            pl.BlockSpec((in_dim, out_dim), lambda i, s: (0, 0)),       # wq (scaled)
            pl.BlockSpec((1, out_dim), lambda i, s: (0, 0)),            # bq (scaled)
            pl.BlockSpec((in_dim, 2 * out_dim), lambda i, s: (0, 0)),   # [wk | wv]
            pl.BlockSpec((1, 2 * out_dim), lambda i, s: (0, 0)),        # [bk | bv]
            pl.BlockSpec((e_dim, 2 * e_dim), lambda i, s: (0, 0)),      # [wpe | wg]
            pl.BlockSpec((1, 2 * e_dim), lambda i, s: (0, 0)),          # [bpe | bg]
        ],
        out_specs=pl.BlockSpec((tq, out_dim), lambda i, s: (i, 0)),
    )

    return pl.pallas_call(
        kernel,
        out_shape=jax.ShapeDtypeStruct((n, out_dim), f32),
        grid_spec=grid_spec,
        compiler_params=pltpu.CompilerParams(
            dimension_semantics=("parallel",),        # row blocks split across TensorCores
            vmem_limit_bytes=48 * 1024 * 1024,        # < v7x 64 MiB physical, > default scoped
        ),
    )(seed_arr, h_bf, h_bf, e_bf, wq_s, bq_s, w_kv, b_kv, w_eg, b_eg)


def init_params(key, in_dim, out_dim, e_dim):
    """Deterministic synthetic parameters in PyTorch nn.Linear layout: W [out, in], b [out]."""
    keys = jax.random.split(key, 10)

    def lin(kw, kb, fan_in, fan_out):
        bound = 1.0 / (fan_in ** 0.5)
        w = jax.random.uniform(kw, (fan_out, fan_in), jnp.float32, -bound, bound)
        b = jax.random.uniform(kb, (fan_out,), jnp.float32, -bound, bound)
        return w, b

    wq, bq = lin(keys[0], keys[1], in_dim, out_dim)
    wk, bk = lin(keys[2], keys[3], in_dim, out_dim)
    wv, bv = lin(keys[4], keys[5], in_dim, out_dim)
    wpe, bpe = lin(keys[6], keys[7], e_dim, e_dim)
    wg, bg = lin(keys[8], keys[9], e_dim, e_dim)
    return (wq, bq, wk, bk, wv, bv, wpe, bpe, wg, bg)


if __name__ == "__main__":
    # Small, TPU-tile-friendly shapes.  e_dim must equal N (graph-size edge bias);
    # out_dim = 128 keeps the output writeback lane-dense.
    N, IN_DIM, OUT_DIM = 256, 64, 128
    E_DIM = N

    key = jax.random.PRNGKey(0)
    kh, ke, kp = jax.random.split(key, 3)

    h = jax.random.normal(kh, (N, IN_DIM), jnp.float32)
    e = jax.random.normal(ke, (N, E_DIM), jnp.float32)
    params = init_params(kp, IN_DIM, OUT_DIM, E_DIM)

    out = att_forward(h, e, params, seed=1234, dropout_p=0.2, block_q=128)  # grid of 2 row blocks
    jax.block_until_ready(out)

    assert out.shape == (N, OUT_DIM), out.shape
    assert bool(jnp.isfinite(out).all())
    print("KERNEL_OK")
</pallas_src>

<mosaic_0001>
module attributes {stable_mosaic.version = 11 : i64} {
  func.func @_att_kernel(%arg0: i32, %arg1: memref<1xi32, #tpu.memory_space<smem>>, %arg2: memref<128x64xbf16, #tpu.memory_space<vmem>>, %arg3: memref<256x64xbf16, #tpu.memory_space<vmem>>, %arg4: memref<128x256xbf16, #tpu.memory_space<vmem>>, %arg5: memref<64x128xbf16, #tpu.memory_space<vmem>>, %arg6: memref<1x128xf32, #tpu.memory_space<vmem>>, %arg7: memref<64x256xbf16, #tpu.memory_space<vmem>>, %arg8: memref<1x256xf32, #tpu.memory_space<vmem>>, %arg9: memref<256x512xbf16, #tpu.memory_space<vmem>>, %arg10: memref<1x512xf32, #tpu.memory_space<vmem>>, %arg11: memref<128x128xf32, #tpu.memory_space<vmem>>) attributes {dimension_semantics = [#tpu.dimension_semantics<parallel>], iteration_bounds = array<i64: 2>, scalar_prefetch = 1 : i64, scratch_operands = 0 : i64, tpu.core_type = #tpu.core_type<tc>, window_params = [{transform_indices = @transform_0, window_bounds = array<i64: 128, 64>}, {pipeline_mode = #tpu.pipeline_mode<synchronous>, transform_indices = @transform_1, window_bounds = array<i64: 256, 64>}, {transform_indices = @transform_2, window_bounds = array<i64: 128, 256>}, {pipeline_mode = #tpu.pipeline_mode<synchronous>, transform_indices = @transform_3, window_bounds = array<i64: 64, 128>}, {pipeline_mode = #tpu.pipeline_mode<synchronous>, transform_indices = @transform_4, window_bounds = array<i64: 1, 128>}, {pipeline_mode = #tpu.pipeline_mode<synchronous>, transform_indices = @transform_5, window_bounds = array<i64: 64, 256>}, {pipeline_mode = #tpu.pipeline_mode<synchronous>, transform_indices = @transform_6, window_bounds = array<i64: 1, 256>}, {pipeline_mode = #tpu.pipeline_mode<synchronous>, transform_indices = @transform_7, window_bounds = array<i64: 256, 512>}, {pipeline_mode = #tpu.pipeline_mode<synchronous>, transform_indices = @transform_8, window_bounds = array<i64: 1, 512>}, {transform_indices = @transform_9, window_bounds = array<i64: 128, 128>}]} {
    %c0 = arith.constant 0 : index
    %c0_0 = arith.constant 0 : index
    %0 = vector.load %arg2[%c0, %c0_0] : memref<128x64xbf16, #tpu.memory_space<vmem>>, vector<128x64xbf16>
    %c0_1 = arith.constant 0 : index
    %c0_2 = arith.constant 0 : index
    %1 = vector.load %arg5[%c0_1, %c0_2] : memref<64x128xbf16, #tpu.memory_space<vmem>>, vector<64x128xbf16>
    %cst = arith.constant dense<0.000000e+00> : vector<128x128xf32>
    %2 = tpu.matmul %0, %1, %cst {dimension_numbers = #tpu.dot_dimension_numbers<[1], [0], [0], [1], [0, 0, 1, 1], [], []>} : vector<128x64xbf16>, vector<64x128xbf16>, vector<128x128xf32> -> vector<128x128xf32>
    %c0_3 = arith.constant 0 : index
    %c0_4 = arith.constant 0 : index
    %3 = vector.load %arg6[%c0_3, %c0_4] : memref<1x128xf32, #tpu.memory_space<vmem>>, vector<1x128xf32>
    %4 = vector.broadcast %3 : vector<1x128xf32> to vector<128x128xf32>
    %5 = arith.addf %2, %4 : vector<128x128xf32>
    %c0_5 = arith.constant 0 : index
    %c0_6 = arith.constant 0 : index
    %6 = vector.load %arg3[%c0_5, %c0_6] : memref<256x64xbf16, #tpu.memory_space<vmem>>, vector<256x64xbf16>
    %c0_7 = arith.constant 0 : index
    %c0_8 = arith.constant 0 : index
    %7 = vector.load %arg7[%c0_7, %c0_8] : memref<64x256xbf16, #tpu.memory_space<vmem>>, vector<64x256xbf16>
    %cst_9 = arith.constant dense<0.000000e+00> : vector<256x256xf32>
    %8 = tpu.matmul %6, %7, %cst_9 {dimension_numbers = #tpu.dot_dimension_numbers<[1], [0], [0], [1], [0, 0, 1, 1], [], []>} : vector<256x64xbf16>, vector<64x256xbf16>, vector<256x256xf32> -> vector<256x256xf32>
    %c0_10 = arith.constant 0 : index
    %c0_11 = arith.constant 0 : index
    %9 = vector.load %arg8[%c0_10, %c0_11] : memref<1x256xf32, #tpu.memory_space<vmem>>, vector<1x256xf32>
    %10 = vector.broadcast %9 : vector<1x256xf32> to vector<256x256xf32>
    %11 = arith.addf %8, %10 : vector<256x256xf32>
    %c0_12 = arith.constant 0 : index
    %c0_13 = arith.constant 0 : index
    %12 = vector.load %arg4[%c0_12, %c0_13] : memref<128x256xbf16, #tpu.memory_space<vmem>>, vector<128x256xbf16>
    %c0_14 = arith.constant 0 : index
    %c0_15 = arith.constant 0 : index
    %13 = vector.load %arg9[%c0_14, %c0_15] : memref<256x512xbf16, #tpu.memory_space<vmem>>, vector<256x512xbf16>
    %cst_16 = arith.constant dense<0.000000e+00> : vector<128x512xf32>
    %14 = tpu.matmul %12, %13, %cst_16 {dimension_numbers = #tpu.dot_dimension_numbers<[1], [0], [0], [1], [0, 0, 1, 1], [], []>} : vector<128x256xbf16>, vector<256x512xbf16>, vector<128x512xf32> -> vector<128x512xf32>
    %c0_17 = arith.constant 0 : index
    %c0_18 = arith.constant 0 : index
    %15 = vector.load %arg10[%c0_17, %c0_18] : memref<1x512xf32, #tpu.memory_space<vmem>>, vector<1x512xf32>
    %16 = vector.broadcast %15 : vector<1x512xf32> to vector<128x512xf32>
    %17 = arith.addf %14, %16 : vector<128x512xf32>
    %18 = vector.extract_strided_slice %11 {offsets = [0, 0], sizes = [256, 128], strides = [1, 1]} : vector<256x256xf32> to vector<256x128xf32>
    %19 = vector.extract_strided_slice %11 {offsets = [0, 128], sizes = [256, 128], strides = [1, 1]} : vector<256x256xf32> to vector<256x128xf32>
    %20 = arith.truncf %19 : vector<256x128xf32> to vector<256x128xbf16>
    %21 = vector.extract_strided_slice %17 {offsets = [0, 0], sizes = [128, 256], strides = [1, 1]} : vector<128x512xf32> to vector<128x256xf32>
    %22 = vector.extract_strided_slice %17 {offsets = [0, 256], sizes = [128, 256], strides = [1, 1]} : vector<128x512xf32> to vector<128x256xf32>
    %23 = arith.negf %22 : vector<128x256xf32>
    %24 = math.exp %23 : vector<128x256xf32>
    %cst_19 = arith.constant 1.000000e+00 : f32
    %25 = vector.broadcast %cst_19 : f32 to vector<128x256xf32>
    %26 = arith.addf %25, %24 : vector<128x256xf32>
    %27 = arith.divf %25, %26 : vector<128x256xf32>
    %28 = arith.truncf %5 : vector<128x128xf32> to vector<128x128xbf16>
    %29 = arith.truncf %18 : vector<256x128xf32> to vector<256x128xbf16>
    %cst_20 = arith.constant dense<0.000000e+00> : vector<128x256xf32>
    %30 = tpu.matmul %28, %29, %cst_20 {dimension_numbers = #tpu.dot_dimension_numbers<[1], [1], [0], [0], [0, 0, 1, 0], [], []>} : vector<128x128xbf16>, vector<256x128xbf16>, vector<128x256xf32> -> vector<128x256xf32>
    %31 = arith.addf %30, %21 : vector<128x256xf32>
    %cst_21 = arith.constant dense<0xFF800000> : vector<128xf32>
    %32 = vector.multi_reduction <maximumf>, %31, %cst_21 [1] : vector<128x256xf32> to vector<128xf32>
    %33 = vector.shape_cast %32 : vector<128xf32> to vector<128x1xf32>
    %34 = vector.broadcast %33 : vector<128x1xf32> to vector<128x256xf32>
    %35 = arith.subf %31, %34 : vector<128x256xf32>
    %36 = math.exp %35 : vector<128x256xf32>
    %cst_22 = arith.constant dense<0.000000e+00> : vector<128xf32>
    %37 = vector.multi_reduction <add>, %36, %cst_22 [1] : vector<128x256xf32> to vector<128xf32>
    %38 = vector.shape_cast %37 : vector<128xf32> to vector<128x1xf32>
    %cst_23 = arith.constant 1.250000e+00 : f32
    %39 = vector.broadcast %cst_23 : f32 to vector<128x1xf32>
    %40 = arith.divf %39, %38 : vector<128x1xf32>
    %c0_24 = arith.constant 0 : index
    %41 = memref.load %arg1[%c0_24] : memref<1xi32, #tpu.memory_space<smem>>
    %c128_i32 = arith.constant 128 : i32
    %42 = arith.muli %arg0, %c128_i32 : i32
    %43 = tpu.iota {dimensions = array<i32: 0>} : vector<128x256xi32>
    %44 = vector.broadcast %42 : i32 to vector<128x256xi32>
    %45 = arith.addi %43, %44 : vector<128x256xi32>
    %46 = tpu.iota {dimensions = array<i32: 1>} : vector<128x256xi32>
    %c-1640531535_i32 = arith.constant -1640531535 : i32
    %47 = vector.broadcast %c-1640531535_i32 : i32 to vector<128x256xi32>
    %48 = arith.muli %45, %47 : vector<128x256xi32>
    %c-2048144777_i32 = arith.constant -2048144777 : i32
    %49 = vector.broadcast %c-2048144777_i32 : i32 to vector<128x256xi32>
    %50 = arith.muli %46, %49 : vector<128x256xi32>
    %51 = arith.xori %48, %50 : vector<128x256xi32>
    %52 = vector.broadcast %41 : i32 to vector<128x256xi32>
    %53 = arith.addi %51, %52 : vector<128x256xi32>
    %c16_i32 = arith.constant 16 : i32
    %54 = vector.broadcast %c16_i32 : i32 to vector<128x256xi32>
    %55 = arith.shrui %53, %54 : vector<128x256xi32>
    %56 = arith.xori %53, %55 : vector<128x256xi32>
    %c2146121005_i32 = arith.constant 2146121005 : i32
    %57 = vector.broadcast %c2146121005_i32 : i32 to vector<128x256xi32>
    %58 = arith.muli %56, %57 : vector<128x256xi32>
    %c15_i32 = arith.constant 15 : i32
    %59 = vector.broadcast %c15_i32 : i32 to vector<128x256xi32>
    %60 = arith.shrui %58, %59 : vector<128x256xi32>
    %61 = arith.xori %58, %60 : vector<128x256xi32>
    %c-2073254261_i32 = arith.constant -2073254261 : i32
    %62 = vector.broadcast %c-2073254261_i32 : i32 to vector<128x256xi32>
    %63 = arith.muli %61, %62 : vector<128x256xi32>
    %c16_i32_25 = arith.constant 16 : i32
    %64 = vector.broadcast %c16_i32_25 : i32 to vector<128x256xi32>
    %65 = arith.shrui %63, %64 : vector<128x256xi32>
    %66 = arith.xori %63, %65 : vector<128x256xi32>
    %c858993459_i32 = arith.constant 858993459 : i32
    %67 = vector.broadcast %c858993459_i32 : i32 to vector<128x256xi32>
    %68 = arith.cmpi uge, %66, %67 : vector<128x256xi32>
    %69 = vector.broadcast %40 : vector<128x1xf32> to vector<128x256xf32>
    %70 = arith.mulf %27, %69 : vector<128x256xf32>
    %cst_26 = arith.constant 0.000000e+00 : f32
    %71 = vector.broadcast %cst_26 : f32 to vector<128x256xf32>
    %72 = arith.select %68, %70, %71 : vector<128x256xi1>, vector<128x256xf32>
    %73 = arith.mulf %36, %72 : vector<128x256xf32>
    %74 = arith.truncf %73 : vector<128x256xf32> to vector<128x256xbf16>
    %cst_27 = arith.constant dense<0.000000e+00> : vector<128x128xf32>
    %75 = tpu.matmul %74, %20, %cst_27 {dimension_numbers = #tpu.dot_dimension_numbers<[1], [0], [0], [1], [0, 0, 1, 1], [], []>} : vector<128x256xbf16>, vector<256x128xbf16>, vector<128x128xf32> -> vector<128x128xf32>
    %c0_28 = arith.constant 0 : index
    %c0_29 = arith.constant 0 : index
    %76 = vector.load %arg11[%c0_28, %c0_29] : memref<128x128xf32, #tpu.memory_space<vmem>>, vector<128x128xf32>
    tpu.vector_store %arg11[%c0_28, %c0_29], %75 {strides = array<i32>} : memref<128x128xf32, #tpu.memory_space<vmem>>, vector<128x128xf32>,
    return
  }
  func.func @transform_0(%arg0: i32, %arg1: memref<1xi32, #tpu.memory_space<smem>>) -> (i32, i32) {
    %c0_i32 = arith.constant 0 : i32
    %c0_i32_0 = arith.constant 0 : i32
    return %arg0, %c0_i32 : i32, i32
  }
  func.func @transform_1(%arg0: i32, %arg1: memref<1xi32, #tpu.memory_space<smem>>) -> (i32, i32) {
    %c0_i32 = arith.constant 0 : i32
    %c0_i32_0 = arith.constant 0 : i32
    %c0_i32_1 = arith.constant 0 : i32
    return %c0_i32, %c0_i32_0 : i32, i32
  }
  func.func @transform_2(%arg0: i32, %arg1: memref<1xi32, #tpu.memory_space<smem>>) -> (i32, i32) {
    %c0_i32 = arith.constant 0 : i32
    %c0_i32_0 = arith.constant 0 : i32
    return %arg0, %c0_i32 : i32, i32
  }
  func.func @transform_3(%arg0: i32, %arg1: memref<1xi32, #tpu.memory_space<smem>>) -> (i32, i32) {
    %c0_i32 = arith.constant 0 : i32
    %c0_i32_0 = arith.constant 0 : i32
    %c0_i32_1 = arith.constant 0 : i32
    return %c0_i32, %c0_i32_0 : i32, i32
  }
  func.func @transform_4(%arg0: i32, %arg1: memref<1xi32, #tpu.memory_space<smem>>) -> (i32, i32) {
    %c0_i32 = arith.constant 0 : i32
    %c0_i32_0 = arith.constant 0 : i32
    %c0_i32_1 = arith.constant 0 : i32
    return %c0_i32, %c0_i32_0 : i32, i32
  }
  func.func @transform_5(%arg0: i32, %arg1: memref<1xi32, #tpu.memory_space<smem>>) -> (i32, i32) {
    %c0_i32 = arith.constant 0 : i32
    %c0_i32_0 = arith.constant 0 : i32
    %c0_i32_1 = arith.constant 0 : i32
    return %c0_i32, %c0_i32_0 : i32, i32
  }
  func.func @transform_6(%arg0: i32, %arg1: memref<1xi32, #tpu.memory_space<smem>>) -> (i32, i32) {
    %c0_i32 = arith.constant 0 : i32
    %c0_i32_0 = arith.constant 0 : i32
    %c0_i32_1 = arith.constant 0 : i32
    return %c0_i32, %c0_i32_0 : i32, i32
  }
  func.func @transform_7(%arg0: i32, %arg1: memref<1xi32, #tpu.memory_space<smem>>) -> (i32, i32) {
    %c0_i32 = arith.constant 0 : i32
    %c0_i32_0 = arith.constant 0 : i32
    %c0_i32_1 = arith.constant 0 : i32
    return %c0_i32, %c0_i32_0 : i32, i32
  }
  func.func @transform_8(%arg0: i32, %arg1: memref<1xi32, #tpu.memory_space<smem>>) -> (i32, i32) {
    %c0_i32 = arith.constant 0 : i32
    %c0_i32_0 = arith.constant 0 : i32
    %c0_i32_1 = arith.constant 0 : i32
    return %c0_i32, %c0_i32_0 : i32, i32
  }
  func.func @transform_9(%arg0: i32, %arg1: memref<1xi32, #tpu.memory_space<smem>>) -> (i32, i32) {
    %c0_i32 = arith.constant 0 : i32
    %c0_i32_0 = arith.constant 0 : i32
    return %arg0, %c0_i32 : i32, i32
  }
}

</mosaic_0001>

<bundles_post_ra>
// kernel: att_forward.1
= control target key start
LH: loop header
LB: loop body
LE: loop exit
PB: predicated region body
PF: predicated region fallthrough
CT: control target
= control target key end

     0   :  { %s8304_s0 = inlined_call_operand.<no memory space> [shape: s32[1], index: 0, kind: input, shape index: {}]   ;;  %s8305_s1 = inlined_call_operand.vmem [shape: bf16[256,64], index: 1, kind: input, shape index: {}, may-alias: {1,2}]   ;;  %s8306_s2 = inlined_call_operand.vmem [shape: bf16[256,64], index: 2, kind: input, shape index: {}, may-alias: {1,2}]   ;;  %s8307_s3 = inlined_call_operand.vmem [shape: bf16[256,256], index: 3, kind: input, shape index: {}]   ;;  %s8308_s4 = inlined_call_operand.vmem [shape: bf16[64,128], index: 4, kind: input, shape index: {}]   ;;  %s8309_s5 = inlined_call_operand.vmem [shape: f32[1,128], index: 5, kind: input, shape index: {}]   ;;  %s8310_s6 = inlined_call_operand.vmem [shape: bf16[64,256], index: 6, kind: input, shape index: {}]   ;;  %s8311_s7 = inlined_call_operand.vmem [shape: f32[1,256], index: 7, kind: input, shape index: {}]   ;;  %s8312_s8 = inlined_call_operand.vmem [shape: bf16[256,512], index: 8, kind: input, shape index: {}]   ;;  %s8313_s9 = inlined_call_operand.vmem [shape: f32[1,512], index: 9, kind: input, shape index: {}]   ;;  %s8314_s10 = inlined_call_operand.hbm [shape: f32[256,128], index: 10, kind: output, shape index: {}]  }
   0x1   :  { %8381 = sst [smem:[#allocation58_spill]] %s8305_s1 }
   0x2   :  { %15 = sst [smem:[#allocation3]] %s8304_s0 }
   0x3   :  { %16 = vsyncpa [#allocation5], 0 }
   0x4   :  { %18 = vsyncpa [#allocation5 + $0x1], 0  ;;  %s4876_s15 = smov 0   ;;  %s4878_s16 = smov 0  }
   0x5   :  { %s4880_s17 = smov 0   ;;  %s4882_s18 = smov 0  }
   0x6 LB: > { %s4897_s0 = sadd.s32 4294967295, %s4814_s18   ;;  %s3770_s19 = sadd.s32 4294967294, %s4814_s18   ;;  %s4814_s18 = sphi %s4882_s18, %s8748_s18   ;;  %s4810_s17 = sphi %s4880_s17, %s8747_s17   ;;  %s4806_s16 = sphi %s4878_s16, %s8746_s16   ;;  %s4802_s15 = sphi %s4876_s15, %s8745_s15  }
   0x7   : > { %s4901_s20 = sadd.s32 1, %s4814_s18   ;;  %s230_s21 = sadd.s32 1, %s4810_s17 }
   0x8   : > { %s227_s22 = ssub.s32 %s4814_s18, %s4901_s20  ;;  %p240_p0 = scmp.ne.s32.totalorder %s4810_s17, %s4806_s16 }
   0x9   : > { %p228_p1 = scmp.eq.s32.totalorder %s227_s22, 0  ;;  %p241_p2 = scmp.eq.s32.totalorder %s4897_s0, 1 }
   0xa   : > { %p246_p3 = scmp.ne.s32.totalorder %s4806_s16, %s4802_s15  ;;  %p247_p4 = scmp.eq.s32.totalorder %s3770_s19, 1 }
   0xb   : > { %s4912_s23 = scalar_select %p228_p1, %s4810_s17, %s230_s21  }
   0xc   : > { %p4914_p5 = por %p241_p2, %p240_p0  ;;  %p4918_p6 = por %p247_p4, %p246_p3 }
   0xd   : > { %p3773_p7 = scmp.ge.s32.totalorder %s4814_s18, 1  ;;  %p305_p8 = scmp.lt.s32.totalorder %s4814_s18, 3 }
   0xf   : > { %p306_p9 = pnand %p3773_p7, %p305_p8 }
  0x11   : > { %309 = sbr.rel (%p306_p9) target bundleno = 1328 (0x530), region = 56 }
  0x16   : > { %v4366_v0 = vld [vmem:[%s8308_s4 + $0x18] sm:$0xff]  ;;  %s3775_s28 = sshll.u32 %s4897_s0, 4  ;;  %v4365_v1 = vld [vmem:[%s8308_s4 + $0x10] sm:$0xff]  ;;  %v4364_v2 = vld [vmem:[%s8308_s4 + $0x8] sm:$0xff]  ;;  %s8384_s1 = sld [smem:[#allocation58_spill]]  ;;  %vm454_vm0 = vcmask 523264  }
  0x17   : > { %p348_p10 = scmp.lt.s32.totalorder %s3775_s28, 31  ;;  %4472 = vmatpush.bf16.msra.mxu1 %v4366_v0  ;;  %4473 = vmatpush.bf16.msra.mxu2 %v4366_v0  ;;  %v4389_v3 = vld [vmem:[%s8310_s6 + $0x34] sm:$0xf]  ;;  %v3928_v4 = vld [vmem:[%s8310_s6 + $0x38] sm:$0xf0]  ;;  %v4363_v5 = vld [vmem:[%s8308_s4] sm:$0xff] }
  0x18   : > { %4474 = vmatpush.bf16.msra.mxu3 %v4366_v0  ;;  %483 = vmatpush.bf16.msra.mxu0 %v4366_v0  ;;  %v3931_v6 = vor.u32 %v4389_v3, %v3928_v4  ;;  %v4387_v7 = vld [vmem:[%s8310_s6 + $0x24] sm:$0xf]  ;;  %v3920_v8 = vld [vmem:[%s8310_s6 + $0x28] sm:$0xf0]  ;;  %v3926_v12 = vld [vmem:[%s8310_s6 + $0x30] sm:$0xf] }
  0x19   : > { %s8750_s28 = smov (!%p348_p10, %s3775_s28), 31  ;;  %v3923_v11 = vor.u32 %v4387_v7, %v3920_v8  ;;  %v4390_v13 = vld [vmem:[%s8310_s6 + $0x34] sm:$0xf0]  ;;  %v4385_v14 = vld [vmem:[%s8310_s6 + $0x14] sm:$0xf]  ;;  %v4367_v33 = vld [vmem:[%s8306_s2] sm:$0xff] }
  0x1a   : > { %s3776_s13 = sshll.u32 %s8750_s28, 2  ;;  %v3912_v15 = vld [vmem:[%s8310_s6 + $0x18] sm:$0xf0]  ;;  %v3927_v16 = vor.u32 %v4390_v13, %v3926_v12  ;;  %v3918_v17 = vld [vmem:[%s8310_s6 + $0x20] sm:$0xf]  ;;  %v4368_v34 = vld [vmem:[%s8306_s2 + $0x8] sm:$0xff] }
  0x1b   : > { %4475 = vmatpush.bf16.msra.mxu1 %v4365_v1  ;;  %4476 = vmatpush.bf16.msra.mxu2 %v4365_v1  ;;  %v4388_v18 = vld [vmem:[%s8310_s6 + $0x24] sm:$0xf0]  ;;  %v3915_v20 = vor.u32 %v4385_v14, %v3912_v15  ;;  %v3910_v21 = vld [vmem:[%s8310_s6 + $0x10] sm:$0xf]  ;;  %v4386_v22 = vld [vmem:[%s8310_s6 + $0x14] sm:$0xf0] }
  0x1c   : > { %4477 = vmatpush.bf16.msra.mxu3 %v4365_v1  ;;  %484 = vmatpush.bf16.msra.mxu0 %v4365_v1  ;;  %s4949_s11 = scalar_lea.vmem %s8384_s1, %s3776_s13  ;;  %v3919_v19 = vor.u32 %v4388_v18, %v3918_v17  ;;  %v4383_v23 = vld [vmem:[%s8310_s6 + $0x4] sm:$0xf]  ;;  %v3904_v24 = vld [vmem:[%s8310_s6 + $0x8] sm:$0xf0]  ;;  %v3911_v25 = vor.u32 %v4386_v22, %v3910_v21  ;;  %v3902_v27 = vld [vmem:[%s8310_s6] sm:$0xf] }
  0x1d   : > { %v4357_v9 = vld [vmem:[%s4949_s11 + $0x10] sm:$0xff]  ;;  %v4360_v10 = vld [vmem:[%s4949_s11 + $0x28] sm:$0xff]  ;;  %v3907_v26 = vor.u32 %v4383_v23, %v3904_v24  ;;  %v4358_v30 = vld [vmem:[%s4949_s11 + $0x18] sm:$0xff]  ;;  %s4354_s29 = sshll.u32 %s8750_s28, 3  ;;  %s4316_s21 = sshll.u32 %s4897_s0, 7 }
  0x1e   : > { %v4384_v28 = vld [vmem:[%s8310_s6 + $0x4] sm:$0xf0]  ;;  %v4361_v31 = vld [vmem:[%s4949_s11 + $0x30] sm:$0xff]  ;;  %v4359_v32 = vld [vmem:[%s4949_s11 + $0x20] sm:$0xff]  ;;  %s5080_s12 = scalar_lea.vmem %s8307_s3, %s4354_s29  ;;  %s6475_s13 = sld [smem:[#allocation3]] }
  0x1f   : > { %4478 = vmatpush.bf16.msra.mxu1 %v4364_v2  ;;  %4479 = vmatpush.bf16.msra.mxu2 %v4364_v2  ;;  %v3903_v29 = vor.u32 %v4384_v28, %v3902_v27  ;;  %v4369_v35 = vld [vmem:[%s8306_s2 + $0x10] sm:$0xff]  ;;  %v4370_v36 = vld [vmem:[%s8306_s2 + $0x18] sm:$0xff]  ;;  %v4371_v37 = vld [vmem:[%s8306_s2 + $0x20] sm:$0xff]  ;;  %s344_s22 = sand.u32 1, %s4806_s16   ;;  %s3692_s29 = scalar_lea.hbm %s8314_s10, %s4316_s21 }
  0x20   : > { %4480 = vmatpush.bf16.msra.mxu3 %v4364_v2  ;;  %485 = vmatpush.bf16.msra.mxu0 %v4364_v2  ;;  %v4142_v38 = vld [vmem:[%s8312_s8 + $0xe0] sm:$0xf]  ;;  %v4437_v39 = vld [vmem:[%s8312_s8 + $0xec] sm:$0xf0]  ;;  %v4372_v50 = vld [vmem:[%s8306_s2 + $0x28] sm:$0xff]  ;;  %s7693_s28 = sshll.u32 %s344_s22, 7 }
  0x21   : > { %v4143_v40 = vor.u32 %v4437_v39, %v4142_v38  ;;  %v4126_v41 = vld [vmem:[%s8312_s8 + $0xc0] sm:$0xf]  ;;  %v4433_v42 = vld [vmem:[%s8312_s8 + $0xcc] sm:$0xf0]  ;;  %v4362_v51 = vld [vmem:[%s4949_s11 + $0x38] sm:$0xff]  ;;  %s7727_s1 = scalar_lea.vmem [#allocation4], %s7693_s28 }
  0x22   : > { %v4127_v43 = vor.u32 %v4433_v42, %v4126_v41  ;;  %v4110_v44 = vld [vmem:[%s8312_s8 + $0xa0] sm:$0xf]  ;;  %v4429_v45 = vld [vmem:[%s8312_s8 + $0xac] sm:$0xf0]  ;;  %v4392_v3 = vld [vmem:[%s5080_s12 + $0x4] sm:$0xf0] }
  0x23   : > { %4481 = vmatpush.bf16.msra.mxu1 %v4363_v5  ;;  %4482 = vmatpush.bf16.msra.mxu2 %v4363_v5  ;;  %v4111_v46 = vor.u32 %v4429_v45, %v4110_v44  ;;  %v4094_v47 = vld [vmem:[%s8312_s8 + $0x80] sm:$0xf]  ;;  %v4425_v48 = vld [vmem:[%s8312_s8 + $0x8c] sm:$0xf0]  ;;  %v4470_v12 = vld [vmem:[%s8312_s8 + $0x1f4] sm:$0xf0] }
  0x24   : > { %4483 = vmatpush.bf16.msra.mxu3 %v4363_v5  ;;  %486 = vmatpush.bf16.msra.mxu0 %v4363_v5  ;;  %v4095_v49 = vor.u32 %v4425_v48, %v4094_v47  ;;  %v4078_v52 = vld [vmem:[%s8312_s8 + $0x60] sm:$0xf]  ;;  %v4421_v53 = vld [vmem:[%s8312_s8 + $0x6c] sm:$0xf0]  ;;  %v4374_v17 = vld [vmem:[%s8306_s2 + $0x38] sm:$0xff]  ;;  %s3695_s30 = sshll.u32 %s3692_s29, 4  ;;  %s3696_s30 = int_to_ptr.hbm [resolvable:$true] %s3695_s30 }
  0x25   : > { %v4079_v54 = vor.u32 %v4421_v53, %v4078_v52  ;;  %v4062_v55 = vld [vmem:[%s8312_s8 + $0x40] sm:$0xf]  ;;  %v4417_v56 = vld [vmem:[%s8312_s8 + $0x4c] sm:$0xf0]  ;;  %v4150_v23 = vld [vmem:[%s8312_s8 + $0xe8] sm:$0xf] }
  0x26   : > { %3830 = vmatmul.msk.bf16.vlgmr.msra.gmra.mxu1 %vm454_vm0, %v4357_v9  ;;  %3833 = vmatmul.msk.bf16.vlgmr.msra.gmra.mxu2 %vm454_vm0, %v4360_v10  ;;  %v4063_v57 = vor.u32 %v4417_v56, %v4062_v55  ;;  %v4046_v58 = vld [vmem:[%s8312_s8 + $0x20] sm:$0xf]  ;;  %v4413_v59 = vld [vmem:[%s8312_s8 + $0x2c] sm:$0xf0]  ;;  %v4438_v24 = vld [vmem:[%s8312_s8 + $0xf4] sm:$0xf0] }
  0x27   : > { %835 = vmatpush.bf16.msrb.mxu2 %v3931_v6  ;;  %746 = vmatpush.bf16.msrb.mxu1 %v3927_v16  ;;  %v4047_v60 = vor.u32 %v4413_v59, %v4046_v58  ;;  %v4030_v61 = vld [vmem:[%s8312_s8] sm:$0xf]  ;;  %v4409_v62 = vld [vmem:[%s8312_s8 + $0xc] sm:$0xf0]  ;;  %v4262_v47 = vld [vmem:[%s8312_s8 + $0x1c8] sm:$0xf] }
  0x28   : > { %1410 = vmatpush.bf16.msrb.mxu3 %v4143_v40  ;;  %v4031_v63 = vor.u32 %v4409_v62, %v4030_v61  ;;  %v4373_v0 = vld [vmem:[%s8306_s2 + $0x30] sm:$0xff]  ;;  %v3966_v2 = vld [vmem:[%s5080_s12] sm:$0xf]  ;;  %v4466_v48 = vld [vmem:[%s8312_s8 + $0x1d4] sm:$0xf0]  ;;  %s3681_s14 = scalar_lea.sflag [#allocation5], %s344_s22 }
  0x29   : > { %3835 = vmatmul.msk.bf16.vlgmr.msra.gmra.mxu3 %vm454_vm0, %v4362_v51  ;;  %v5093_v4 = vor.u32 %v4392_v3, %v3966_v2  ;;  %v4525_v5 = vld [vmem:[%s8309_s5] ss:$0 sm:$0xff]  ;;  %v4376_v53 = vld [vmem:[%s8306_s2 + $0x48] sm:$0xff]  ;;  %v3990_v55 = vld [vmem:[%s5080_s12 + $0x30] sm:$0xf] }
  0x2a   : > { %v568_v41 = vld [vmem:[%s8311_s7] sm:$0x3]  ;;  %v4398_v56 = vld [vmem:[%s5080_s12 + $0x34] sm:$0xf0]  ;;  %v4134_v59 = vld [vmem:[%s8312_s8 + $0xc8] sm:$0xf] }
  0x2b   : > { %836 = vmatpush.bf16.msrb.mxu2 %v3923_v11  ;;  %747 = vmatpush.bf16.msrb.mxu1 %v3919_v19  ;;  %v4278_v11 = vld [vmem:[%s8312_s8 + $0x1e8] sm:$0xf]  ;;  %v3974_v19 = vld [vmem:[%s5080_s12 + $0x10] sm:$0xf]  ;;  %v5144_v44 = vperm.slane %v568_v41, 1  ;;  %v5167_v58 = vor.u32 %v4398_v56, %v3990_v55  ;;  %v5178_v62 = vperm.slane %v568_v41, 0 }
  0x2c   : > { %1411 = vmatpush.bf16.msrb.mxu3 %v4127_v43  ;;  %v4279_v13 = vor.u32 %v4470_v12, %v4278_v11  ;;  %v3998_v11 = vld [vmem:[%s5080_s12 + $0x40] sm:$0xf]  ;;  %v4400_v12 = vld [vmem:[%s5080_s12 + $0x44] sm:$0xf0] }
  0x2f   : > { %837 = vmatpush.bf16.msrb.mxu2 %v3915_v20  ;;  %748 = vmatpush.bf16.msrb.mxu1 %v3911_v25  ;;  %v4394_v20 = vld [vmem:[%s5080_s12 + $0x14] sm:$0xf0]  ;;  %v4151_v25 = vor.u32 %v4438_v24, %v4150_v23  ;;  %v4431_v24 = vld [vmem:[%s8312_s8 + $0xc4] sm:$0xf] }
  0x30   : > { %1412 = vmatpush.bf16.msrb.mxu3 %v4111_v46  ;;  %v5116_v22 = vor.u32 %v4394_v20, %v3974_v19 }
  0x33   : > { %838 = vmatpush.bf16.msrb.mxu2 %v3907_v26  ;;  %749 = vmatpush.bf16.msrb.mxu1 %v3903_v29 }
  0x34   : > { %1413 = vmatpush.bf16.msrb.mxu3 %v4095_v49  ;;  %v4263_v49 = vor.u32 %v4466_v48, %v4262_v47  ;;  %v4423_v48 = vld [vmem:[%s8312_s8 + $0x84] sm:$0xf] }
  0x36   : > { %3831 = vmatmul.msk.bf16.gmra.mxu1 %vm454_vm0, %v4358_v30  ;;  %3834 = vmatmul.msk.bf16.gmra.mxu2 %vm454_vm0, %v4361_v31 }
  0x37   : > { %1655 = vmatpush.bf16.msra.mxu2 %v4279_v13  ;;  %1606 = vmatpush.bf16.msra.mxu1 %v4151_v25  ;;  %v4128_v25 = vld [vmem:[%s8312_s8 + $0xd0] sm:$0xf0] }
  0x38   : > { %1414 = vmatpush.bf16.msrb.mxu3 %v4079_v54 }
  0x3b   : > { %1656 = vmatpush.bf16.msra.mxu2 %v4263_v49  ;;  %v4096_v49 = vld [vmem:[%s8312_s8 + $0x90] sm:$0xf0] }
  0x3c   : > { %1415 = vmatpush.bf16.msrb.mxu3 %v4063_v57 }
  0x40   : > { %1416 = vmatpush.bf16.msrb.mxu3 %v4047_v60  ;;  %v4434_v60 = vld [vmem:[%s8312_s8 + $0xd4] sm:$0xf0] }
  0x41   : > { %v4135_v61 = vor.u32 %v4434_v60, %v4134_v59  ;;  %v4419_v59 = vld [vmem:[%s8312_s8 + $0x64] sm:$0xf]  ;;  %v4080_v60 = vld [vmem:[%s8312_s8 + $0x70] sm:$0xf0] }
  0x43   : > { %1607 = vmatpush.bf16.msra.mxu1 %v4135_v61  ;;  %v4083_v61 = vor.u32 %v4419_v59, %v4080_v60  ;;  %v4432_v59 = vld [vmem:[%s8312_s8 + $0xcc] sm:$0xf]  ;;  %v4136_v60 = vld [vmem:[%s8312_s8 + $0xd8] sm:$0xf0] }
  0x44   : > { %1417 = vmatpush.bf16.msrb.mxu3 %v4031_v63 }
  0x46   : > { %3832 = vmatmul.msk.bf16.gmra.mxu1 %vm454_vm0, %v4359_v32  ;;  %3948 = vmatmul.msk.bf16.vlgmr.msrb.gmra.mxu2 %vm454_vm0, %v4367_v33 }
  0x47   : > { %1418 = vmatmul.bf16.vlgmr.msrb.gmra.mxu3 %v5093_v4 }
  0x56   : > { %3932 = vmatmul.msk.bf16.vlgmr.msrb.gmra.mxu1 %vm454_vm0, %v4367_v33  ;;  %3949 = vmatmul.msk.bf16.gmra.mxu2 %vm454_vm0, %v4368_v34 }
  0x57   : > { %1423 = vmatmul.bf16.gmra.mxu3 %v5116_v22 }
  0x66   : > { %3933 = vmatmul.msk.bf16.gmra.mxu1 %vm454_vm0, %v4368_v34  ;;  %3950 = vmatmul.msk.bf16.gmra.mxu2 %vm454_vm0, %v4369_v35  ;;  %v4375_v34 = vld [vmem:[%s8306_s2 + $0x40] sm:$0xff] }
  0x76   : > { %3934 = vmatmul.msk.bf16.gmra.mxu1 %vm454_vm0, %v4369_v35  ;;  %3951 = vmatmul.msk.bf16.gmra.mxu2 %vm454_vm0, %v4370_v36 }
  0x86   : > { %3935 = vmatmul.msk.bf16.gmra.mxu1 %vm454_vm0, %v4370_v36  ;;  %3952 = vmatmul.msk.bf16.gmra.mxu2 %vm454_vm0, %v4371_v37  ;;  %v3982_v36 = vld [vmem:[%s5080_s12 + $0x20] sm:$0xf] }
  0x96   : > { %3936 = vmatmul.msk.bf16.gmra.mxu1 %vm454_vm0, %v4371_v37  ;;  %3953 = vmatmul.msk.bf16.gmra.mxu2 %vm454_vm0, %v4372_v50  ;;  %v4396_v37 = vld [vmem:[%s5080_s12 + $0x24] sm:$0xf0] }
  0x97   : > { %v5136_v39 = vor.u32 %v4396_v37, %v3982_v36  ;;  %v4378_v37 = vld [vmem:[%s8306_s2 + $0x58] sm:$0xff] }
  0x99   : > { %1428 = vmatmul.bf16.gmra.mxu3 %v5136_v39 }
  0xa3   : > { %v498_v1 = vpop.f32.mrf.mxu1 }
  0xa4   : > { %v499_v8 = vadd.f32 %v4525_v5, %v498_v1 }
  0xa6   : > { %3937 = vmatmul.msk.bf16.gmra.mxu1 %vm454_vm0, %v4372_v50  ;;  %3954 = vmatmul.msk.bf16.gmra.mxu2 %vm454_vm0, %v4373_v0 }
  0xa9   : > { %v513_v6 = vpop.f32.mrf.mxu2  ;;  %1433 = vmatmul.bf16.gmra.mxu3 %v5167_v58 }
  0xaa   : > { %v514_v14 = vadd.f32 %v4525_v5, %v513_v6 }
  0xab   : > { %v500_v7 = vpop.f32.mrf.mxu1 }
  0xac   : > { %v501_v9 = vadd.f32 %v4525_v5, %v500_v7 }
  0xae   : > { %v5101_v10 = vpack.c.bf16 %v501_v9, %v499_v8  ;;  %v4377_v8 = vld [vmem:[%s8306_s2 + $0x50] sm:$0xff] }
  0xb1   : > { %v515_v15 = vpop.f32.mrf.mxu2 }
  0xb2   : > { %v516_v16 = vadd.f32 %v4525_v5, %v515_v15 }
  0xb3   : > { %v503_v18 = vpop.f32.mrf.mxu1 }
  0xb4   : > { %v5114_v21 = vpack.c.bf16 %v516_v16, %v514_v14  ;;  %v504_v28 = vadd.f32 %v4525_v5, %v503_v18  ;;  %v5201_v14 = vor.u32 %v4400_v12, %v3998_v11  ;;  %v4435_v16 = vld [vmem:[%s8312_s8 + $0xe4] sm:$0xf] }
  0xb6   : > { %3938 = vmatmul.msk.bf16.gmra.mxu1 %vm454_vm0, %v4373_v0  ;;  %3955 = vmatmul.msk.bf16.gmra.mxu2 %vm454_vm0, %v4374_v17 }
  0xb9   : > { %v518_v26 = vpop.f32.mrf.mxu2  ;;  %1438 = vmatmul.bf16.gmra.mxu3 %v5201_v14 }
  0xba   : > { %v519_v31 = vadd.f32 %v4525_v5, %v518_v26 }
  0xbb   : > { %v505_v27 = vpop.f32.mrf.mxu1 }
  0xbc   : > { %v506_v29 = vadd.f32 %v4525_v5, %v505_v27  ;;  %v4131_v27 = vor.u32 %v4431_v24, %v4128_v25  ;;  %v5303_v24 = vld [vmem:[%s8306_s2 + $0x60] sm:$0xff] }
  0xbe   : > { %v5127_v30 = vpack.c.bf16 %v506_v29, %v504_v28  ;;  %v4246_v28 = vld [vmem:[%s8312_s8 + $0x1a8] sm:$0xf]  ;;  %v4462_v29 = vld [vmem:[%s8312_s8 + $0x1b4] sm:$0xf0] }
  0xc1   : > { %v520_v32 = vpop.f32.mrf.mxu2 }
  0xc2   : > { %v521_v33 = vadd.f32 %v4525_v5, %v520_v32 }
  0xc3   : > { %v508_v35 = vpop.f32.mrf.mxu1 }
  0xc4   : > { %v5134_v38 = vpack.c.bf16 %v521_v33, %v519_v31  ;;  %v509_v43 = vadd.f32 %v4525_v5, %v508_v35  ;;  %v4247_v31 = vor.u32 %v4462_v29, %v4246_v28  ;;  %v4112_v35 = vld [vmem:[%s8312_s8 + $0xb0] sm:$0xf0]  ;;  %v4014_v28 = vld [vmem:[%s5080_s12 + $0x60] sm:$0xf]  ;;  %v4404_v29 = vld [vmem:[%s5080_s12 + $0x64] sm:$0xf0] }
  0xc6   : > { %3939 = vmatmul.msk.bf16.gmra.mxu1 %vm454_vm0, %v4374_v17  ;;  %3956 = vmatmul.msk.bf16.gmra.mxu2 %vm454_vm0, %v4375_v34  ;;  %v4144_v17 = vld [vmem:[%s8312_s8 + $0xf0] sm:$0xf0] }
  0xc7   : > { %v4147_v18 = vor.u32 %v4435_v16, %v4144_v17  ;;  %1657 = vmatpush.bf16.msra.mxu2 %v4247_v31  ;;  %v4411_v17 = vld [vmem:[%s8312_s8 + $0x24] sm:$0xf] }
  0xc9   : > { %v840_v40 = vpop.f32.mrf.mxu2  ;;  %1508 = vmatpush.bf16.msra.mxu3 %v4147_v18  ;;  %v4048_v18 = vld [vmem:[%s8312_s8 + $0x30] sm:$0xf0] }
  0xca   : > { %v5155_v50 = vadd.f32 %v840_v40, %v5144_v44  ;;  %v4051_v25 = vor.u32 %v4411_v17, %v4048_v18 }
  0xcb   : > { %v510_v42 = vpop.f32.mrf.mxu1 }
  0xcc   : > { %v511_v45 = vadd.f32 %v4525_v5, %v510_v42  ;;  %v4006_v42 = vld [vmem:[%s5080_s12 + $0x50] sm:$0xf] }
  0xcd   : > { %1509 = vmatpush.bf16.msra.mxu3 %v4131_v27 }
  0xce   : > { %v5146_v46 = vpack.c.bf16 %v511_v45, %v509_v43  ;;  %v4402_v43 = vld [vmem:[%s5080_s12 + $0x54] sm:$0xf0] }
  0xcf   : > { %v5251_v47 = vor.u32 %v4402_v43, %v4006_v42  ;;  %v4032_v42 = vld [vmem:[%s8312_s8 + $0x10] sm:$0xf0] }
  0xd1   : > { %v842_v51 = vpop.f32.mrf.mxu2  ;;  %1443 = vmatmul.bf16.gmra.mxu3 %v5251_v47 }
  0xd2   : > { %v5158_v52 = vadd.f32 %v842_v51, %v5144_v44  ;;  %v4118_v51 = vld [vmem:[%s8312_s8 + $0xa8] sm:$0xf] }
  0xd3   : > { %v751_v54 = vpop.f32.mrf.mxu1 }
  0xd4   : > { %v1802_v57 = vpack.c.bf16 %v5158_v52, %v5155_v50  ;;  %v5181_v1 = vadd.f32 %v751_v54, %v5178_v62  ;;  %v4099_v54 = vor.u32 %v4423_v48, %v4096_v49  ;;  %v4436_v49 = vld [vmem:[%s8312_s8 + $0xec] sm:$0xf]  ;;  %v4467_v50 = vld [vmem:[%s8312_s8 + $0x1e4] sm:$0xf]  ;;  %v4272_v52 = vld [vmem:[%s8312_s8 + $0x1f0] sm:$0xf0] }
  0xd6   : > { %3940 = vmatmul.msk.bf16.gmra.mxu1 %vm454_vm0, %v4375_v34  ;;  %3957 = vmatmul.msk.bf16.gmra.mxu2 %vm454_vm0, %v4376_v53  ;;  %v4427_v34 = vld [vmem:[%s8312_s8 + $0xa4] sm:$0xf] }
  0xd7   : > { %v4115_v40 = vor.u32 %v4427_v34, %v4112_v35  ;;  %v5310_v34 = vor.u32 %v4404_v29, %v4014_v28  ;;  %v4270_v35 = vld [vmem:[%s8312_s8 + $0x1e0] sm:$0xf]  ;;  %v4428_v28 = vld [vmem:[%s8312_s8 + $0xac] sm:$0xf] }
  0xd9   : > { %v845_v63 = vpop.f32.mrf.mxu2  ;;  %1510 = vmatpush.bf16.msra.mxu3 %v4115_v40  ;;  %v4469_v40 = vld [vmem:[%s8312_s8 + $0x1ec] sm:$0xf0] }
  0xda   : > { %v5189_v5 = vadd.f32 %v845_v63, %v5144_v44  ;;  %v4271_v43 = vor.u32 %v4469_v40, %v4270_v35  ;;  %v4222_v40 = vld [vmem:[%s8312_s8 + $0x180] sm:$0xf] }
  0xdb   : > { %v753_v0 = vpop.f32.mrf.mxu1 }
  0xdc   : > { %v5184_v2 = vadd.f32 %v753_v0, %v5178_v62  ;;  %1459 = vmatpush.bf16.msrb.mxu0 %v4271_v43 }
  0xdd   : > { %1511 = vmatpush.bf16.msra.mxu3 %v4099_v54  ;;  %v4465_v54 = vld [vmem:[%s8312_s8 + $0x1cc] sm:$0xf0] }
  0xe1   : > { %v847_v6 = vpop.f32.mrf.mxu2  ;;  %1512 = vmatpush.bf16.msra.mxu3 %v4083_v61 }
  0xe2   : > { %v5192_v7 = vadd.f32 %v847_v6, %v5144_v44  ;;  %1448 = vmatmul.bf16.gmra.mxu3 %v5310_v34 }
  0xe3   : > { %v756_v9 = vpop.f32.mrf.mxu1 }
  0xe4   : > { %v1803_v13 = vpack.c.bf16 %v5192_v7, %v5189_v5  ;;  %v5213_v20 = vadd.f32 %v756_v9, %v5178_v62  ;;  %v4064_v9 = vld [vmem:[%s8312_s8 + $0x50] sm:$0xf0] }
  0xe6   : > { %3941 = vmatmul.msk.bf16.gmra.mxu1 %vm454_vm0, %v4376_v53  ;;  %3958 = vmatmul.msk.bf16.gmra.mxu2 %vm454_vm0, %v4377_v8  ;;  %v4430_v53 = vld [vmem:[%s8312_s8 + $0xb4] sm:$0xf0] }
  0xe7   : > { %v4119_v55 = vor.u32 %v4430_v53, %v4118_v51  ;;  %v4152_v51 = vld [vmem:[%s8312_s8 + $0xf8] sm:$0xf0] }
  0xe8   : > { %v4155_v53 = vor.u32 %v4436_v49, %v4152_v51  ;;  %v4424_v49 = vld [vmem:[%s8312_s8 + $0x8c] sm:$0xf]  ;;  %v4104_v51 = vld [vmem:[%s8312_s8 + $0x98] sm:$0xf0] }
  0xe9   : > { %v850_v15 = vpop.f32.mrf.mxu2  ;;  %1608 = vmatpush.bf16.msra.mxu1 %v4119_v55 }
  0xea   : > { %v5233_v32 = vadd.f32 %v850_v15, %v5144_v44 }
  0xeb   : > { %v758_v19 = vpop.f32.mrf.mxu1 }
  0xec   : > { %v5216_v23 = vadd.f32 %v758_v19, %v5178_v62 }
  0xf1   : > { %v852_v33 = vpop.f32.mrf.mxu2 }
  0xf2   : > { %v5242_v36 = vadd.f32 %v852_v33, %v5144_v44  ;;  %v4355_v33 = vld [vmem:[%s4949_s11] sm:$0xff] }
  0xf3   : > { %v761_v41 = vpop.f32.mrf.mxu1  ;;  %3828 = vmatmul.msk.bf16.vlgmr.msra.gmra.mxu0 %vm454_vm0, %v4355_v33  ;;  %v4120_v33 = vld [vmem:[%s8312_s8 + $0xb8] sm:$0xf0] }
  0xf4   : > { %v1804_v45 = vpack.c.bf16 %v5242_v36, %v5233_v32  ;;  %v5275_v0 = vadd.f32 %v761_v41, %v5178_v62  ;;  %v4407_v41 = vld [vmem:[%s8312_s8 + $0x4] sm:$0xf]  ;;  %v4123_v35 = vor.u32 %v4428_v28, %v4120_v33  ;;  %v4449_v33 = vld [vmem:[%s8312_s8 + $0x14c] sm:$0xf0] }
  0xf5   : > { %v4035_v48 = vor.u32 %v4407_v41, %v4032_v42  ;;  %v4457_v41 = vld [vmem:[%s8312_s8 + $0x18c] sm:$0xf0] }
  0xf6   : > { %3942 = vmatmul.msk.bf16.gmra.mxu1 %vm454_vm0, %v4377_v8  ;;  %3959 = vmatmul.msk.bf16.gmra.mxu2 %vm454_vm0, %v4378_v37  ;;  %v4415_v8 = vld [vmem:[%s8312_s8 + $0x44] sm:$0xf]  ;;  %v4223_v43 = vor.u32 %v4457_v41, %v4222_v40  ;;  %v4416_v41 = vld [vmem:[%s8312_s8 + $0x4c] sm:$0xf] }
  0xf7   : > { %v4067_v12 = vor.u32 %v4415_v8, %v4064_v9 }
  0xf9   : > { %v855_v56 = vpop.f32.mrf.mxu2  ;;  %1513 = vmatpush.bf16.msra.mxu3 %v4067_v12  ;;  %v4238_v12 = vld [vmem:[%s8312_s8 + $0x1a0] sm:$0xf] }
  0xfa   : > { %v5289_v15 = vadd.f32 %v855_v56, %v5144_v44 }
  0xfb   : > { %v763_v63 = vpop.f32.mrf.mxu1 }
  0xfc   : > { %v5278_v6 = vadd.f32 %v763_v63, %v5178_v62  ;;  %v4139_v63 = vor.u32 %v4432_v59, %v4136_v60  ;;  %v4356_v59 = vld [vmem:[%s4949_s11 + $0x8] sm:$0xff]  ;;  %s4766_s11 = sshra.s32 %s3696_s30, 4  ;;  %s4767_s11 = int_to_ptr.hbm [resolvable:$true] %s4766_s11 }
  0xfd   : > { %1514 = vmatpush.bf16.msra.mxu3 %v4051_v25  ;;  %v4230_v25 = vld [vmem:[%s8312_s8 + $0x188] sm:$0xf]  ;;  %s4768_s0 = scalar_lea.hbm %s4767_s11, 128  ;;  %p4773_p0 = scmp.lt.s32.totalorder %s4767_s11, %s8314_s10 }
  0xfe   : > { %p4769_p11 = scmp.ne.s32.totalorder %s4767_s11, %s4768_s0 }
 0x100   : > { %p4770_p12 = pnand %p4769_p11, %p4914_p5 }
 0x101   : > { %v857_v16 = vpop.f32.mrf.mxu2  ;;  %1515 = vmatpush.bf16.msra.mxu3 %v4035_v48  ;;  %v5386_v48 = vld [vmem:[%s8306_s2 + $0x68] sm:$0xff] }
 0x102   : > { %v5298_v19 = vadd.f32 %v857_v16, %v5144_v44  ;;  %v4461_v16 = vld [vmem:[%s8312_s8 + $0x1ac] sm:$0xf0]  ;;  %p4771_p13 = pneg %p4770_p12 }
 0x103   : > { %v766_v27 = vpop.f32.mrf.mxu1  ;;  %v4239_v17 = vor.u32 %v4461_v16, %v4238_v12  ;;  %v4102_v12 = vld [vmem:[%s8312_s8 + $0x88] sm:$0xf]  ;;  %v4426_v16 = vld [vmem:[%s8312_s8 + $0x94] sm:$0xf0]  ;;  %3829 = vmatmul.msk.bf16.gmra.mxu0 %vm454_vm0, %v4356_v59  ;;  %v4445_v59 = vld [vmem:[%s8312_s8 + $0x12c] sm:$0xf0] }
 0x104   : > { %v1805_v31 = vpack.c.bf16 %v5298_v19, %v5289_v15  ;;  %v5350_v8 = vadd.f32 %v766_v27, %v5178_v62  ;;  %v4458_v27 = vld [vmem:[%s8312_s8 + $0x194] sm:$0xf0] }
 0x105   : > { %1704 = vmatpush.bf16.msrb.mxu3 %v4155_v53  ;;  %v4231_v29 = vor.u32 %v4458_v27, %v4230_v25  ;;  %v4420_v25 = vld [vmem:[%s8312_s8 + $0x6c] sm:$0xf]  ;;  %v4088_v27 = vld [vmem:[%s8312_s8 + $0x78] sm:$0xf0] }
 0x106   : > { %3943 = vmatmul.msk.bf16.gmra.mxu1 %vm454_vm0, %v4378_v37  ;;  %3960 = vmatmul.msk.bf16.gmra.mxu2 %vm454_vm0, %v5303_v24  ;;  %v4254_v37 = vld [vmem:[%s8312_s8 + $0x1c0] sm:$0xf]  ;;  %v4091_v28 = vor.u32 %v4420_v25, %v4088_v27  ;;  %v4441_v25 = vld [vmem:[%s8312_s8 + $0x10c] sm:$0xf0] }
 0x107   : > { %v4255_v56 = vor.u32 %v4465_v54, %v4254_v37  ;;  %1658 = vmatpush.bf16.msra.mxu2 %v4231_v29  ;;  %v4107_v37 = vor.u32 %v4424_v49, %v4104_v51  ;;  %v4022_v54 = vld [vmem:[%s5080_s12 + $0x70] sm:$0xf]  ;;  %v4190_v29 = vld [vmem:[%s8312_s8 + $0x140] sm:$0xf] }
 0x108   : > { %v4191_v40 = vor.u32 %v4449_v33, %v4190_v29  ;;  %v4422_v29 = vld [vmem:[%s8312_s8 + $0x74] sm:$0xf0]  ;;  %v4381_v33 = vld [vmem:[%s8306_s2 + $0x70] sm:$0xff] }
 0x109   : > { %v5341_v55 = vpop.f32.mrf.mxu2  ;;  %1460 = vmatpush.bf16.msrb.mxu0 %v4255_v56  ;;  %1705 = vmatpush.bf16.msrb.mxu3 %v4139_v63  ;;  %v4406_v56 = vld [vmem:[%s5080_s12 + $0x74] sm:$0xf0]  ;;  %v4453_v63 = vld [vmem:[%s8312_s8 + $0x16c] sm:$0xf0] }
 0x10a   : > { %v5397_v60 = vor.u32 %v4406_v56, %v4022_v54  ;;  %v4174_v56 = vld [vmem:[%s8312_s8 + $0x120] sm:$0xf] }
 0x10b   : > { %v768_v61 = vpop.f32.mrf.mxu1 }
 0x10c   : > { %v5353_v9 = vadd.f32 %v768_v61, %v5178_v62  ;;  %v4206_v61 = vld [vmem:[%s8312_s8 + $0x160] sm:$0xf]  ;;  %1453 = vmatmul.bf16.gmra.mxu3 %v5397_v60 }
 0x10d   : > { %1461 = vmatpush.bf16.msrb.mxu0 %v4239_v17  ;;  %1706 = vmatpush.bf16.msrb.mxu3 %v4123_v35  ;;  %v4207_v17 = vor.u32 %v4453_v63, %v4206_v61  ;;  %v4175_v61 = vor.u32 %v4445_v59, %v4174_v56  ;;  %v4391_v56 = vld [vmem:[%s5080_s12 + $0x4] sm:$0xf]  ;;  %v3968_v59 = vld [vmem:[%s5080_s12 + $0x8] sm:$0xf0] }
 0x111   : > { %v5381_v42 = vpop.f32.mrf.mxu2  ;;  %1462 = vmatpush.bf16.msrb.mxu0 %v4223_v43  ;;  %1707 = vmatpush.bf16.msrb.mxu3 %v4107_v37  ;;  %v4072_v43 = vld [vmem:[%s8312_s8 + $0x58] sm:$0xf0] }
 0x112   : > { %v4075_v51 = vor.u32 %v4416_v41, %v4072_v43  ;;  %v4408_v41 = vld [vmem:[%s8312_s8 + $0xc] sm:$0xf]  ;;  %v4040_v43 = vld [vmem:[%s8312_s8 + $0x18] sm:$0xf0] }
 0x113   : > { %v771_v53 = vpop.f32.mrf.mxu1 }
 0x114   : > { %v5438_v37 = vadd.f32 %v771_v53, %v5178_v62  ;;  %v4412_v53 = vld [vmem:[%s8312_s8 + $0x2c] sm:$0xf] }
 0x115   : > { %1463 = vmatpush.bf16.msrb.mxu0 %v4207_v17  ;;  %1708 = vmatpush.bf16.msrb.mxu3 %v4091_v28  ;;  %v4158_v17 = vld [vmem:[%s8312_s8 + $0x100] sm:$0xf] }
 0x116   : > { %3944 = vmatmul.msk.bf16.gmra.mxu1 %vm454_vm0, %v5303_v24  ;;  %3961 = vmatmul.msk.bf16.gmra.mxu2 %vm454_vm0, %v5386_v48  ;;  %v4103_v24 = vor.u32 %v4426_v16, %v4102_v12  ;;  %v4056_v12 = vld [vmem:[%s8312_s8 + $0x38] sm:$0xf0]  ;;  %v4159_v28 = vor.u32 %v4441_v25, %v4158_v17  ;;  %v4414_v25 = vld [vmem:[%s8312_s8 + $0x34] sm:$0xf0] }
 0x117   : > { %v4059_v16 = vor.u32 %v4412_v53, %v4056_v12  ;;  %v4070_v53 = vld [vmem:[%s8312_s8 + $0x48] sm:$0xf]  ;;  %v4418_v12 = vld [vmem:[%s8312_s8 + $0x54] sm:$0xf0] }
 0x118   : > { %1609 = vmatpush.bf16.msra.mxu1 %v4103_v24  ;;  %v4086_v24 = vld [vmem:[%s8312_s8 + $0x68] sm:$0xf]  ;;  %v4071_v17 = vor.u32 %v4418_v12, %v4070_v53  ;;  %v4382_v53 = vld [vmem:[%s8306_s2 + $0x78] sm:$0xff] }
 0x119   : > { %v5429_v35 = vpop.f32.mrf.mxu2  ;;  %1464 = vmatpush.bf16.msrb.mxu0 %v4191_v40  ;;  %1709 = vmatpush.bf16.msrb.mxu3 %v4075_v51  ;;  %v4087_v40 = vor.u32 %v4422_v29, %v4086_v24  ;;  %v4043_v51 = vor.u32 %v4408_v41, %v4040_v43  ;;  %v4038_v29 = vld [vmem:[%s8312_s8 + $0x8] sm:$0xf] }
 0x11a   : > { %v4214_v43 = vld [vmem:[%s8312_s8 + $0x168] sm:$0xf]  ;;  %v866_v11 = vadd.f32 %v5429_v35, %v5144_v44 }
 0x11b   : > { %v773_v49 = vpop.f32.mrf.mxu1 }
 0x11c   : > { %v5441_v54 = vadd.f32 %v773_v49, %v5178_v62  ;;  %1610 = vmatpush.bf16.msra.mxu1 %v4087_v40  ;;  %1516 = vmatmul.bf16.vlgmr.msra.gmra.mxu3 %v5093_v4  ;;  %v4410_v40 = vld [vmem:[%s8312_s8 + $0x14] sm:$0xf0] }
 0x11d   : > { %1465 = vmatpush.bf16.msrb.mxu0 %v4175_v61  ;;  %1710 = vmatpush.bf16.msrb.mxu3 %v4059_v16  ;;  %v5482_v61 = vor.u32 %v4391_v56, %v3968_v59  ;;  %v4054_v16 = vld [vmem:[%s8312_s8 + $0x28] sm:$0xf]  ;;  %v4039_v41 = vor.u32 %v4410_v40, %v4038_v29 }
 0x11e   : > { %v8385_v5 = vpack.c.bf16 %v5441_v54, %v5438_v37  ;;  %v4463_v54 = vld [vmem:[%s8312_s8 + $0x1c4] sm:$0xf] }
 0x120   : > { %1611 = vmatpush.bf16.msra.mxu1 %v4071_v17  ;;  %v4393_v17 = vld [vmem:[%s5080_s12 + $0x14] sm:$0xf] }
 0x121   : > { %v867_v27 = vpop.f32.mrf.mxu2  ;;  %1466 = vmatpush.bf16.msrb.mxu0 %v4159_v28  ;;  %1711 = vmatpush.bf16.msrb.mxu3 %v4043_v51  ;;  %v4454_v51 = vld [vmem:[%s8312_s8 + $0x174] sm:$0xf0] }
 0x122   : > { %v4215_v56 = vor.u32 %v4454_v51, %v4214_v43  ;;  %v868_v18 = vadd.f32 %v867_v27, %v5144_v44 }
 0x123   : > { %v5478_v49 = vpop.f32.mrf.mxu1 }
 0x124   : > { %1467 = vmatmul.bf16.vlgmr.msrb.gmra.mxu0 %v5482_v61  ;;  %1659 = vmatpush.bf16.msra.mxu2 %v4215_v56  ;;  %v777_v15 = vadd.f32 %v5478_v49, %v5178_v62  ;;  %v4000_v49 = vld [vmem:[%s5080_s12 + $0x48] sm:$0xf0] }
 0x126   : > { %3945 = vmatmul.msk.bf16.gmra.mxu1 %vm454_vm0, %v5386_v48  ;;  %3962 = vmatmul.msk.bf16.gmra.mxu2 %vm454_vm0, %v4381_v33  ;;  %v4055_v48 = vor.u32 %v4414_v25, %v4054_v16  ;;  %v3976_v16 = vld [vmem:[%s5080_s12 + $0x18] sm:$0xf0] }
 0x127   : > { %v5520_v25 = vor.u32 %v4393_v17, %v3976_v16  ;;  %v4395_v16 = vld [vmem:[%s5080_s12 + $0x24] sm:$0xf] }
 0x128   : > { %1612 = vmatpush.bf16.msra.mxu1 %v4055_v48 }
 0x129   : > { %v870_v24 = vpop.f32.mrf.mxu2 }
 0x12a   : > { %v871_v43 = vadd.f32 %v870_v24, %v5144_v44 }
 0x12b   : > { %v5501_v28 = vpop.f32.mrf.mxu1 }
 0x12c   : > { %1613 = vmatpush.bf16.msra.mxu1 %v4039_v41  ;;  %1521 = vmatmul.bf16.gmra.mxu3 %v5116_v22 }
 0x131   : > { %v872_v59 = vpop.f32.mrf.mxu2 }
 0x132   : > { %v873_v51 = vadd.f32 %v872_v59, %v5144_v44  ;;  %v861_v59 = vadd.f32 %v5341_v55, %v5144_v44  ;;  %v4450_v55 = vld [vmem:[%s8312_s8 + $0x154] sm:$0xf0] }
 0x133   : > { %v781_v12 = vpop.f32.mrf.mxu1 }
 0x134   : > { %1472 = vmatmul.bf16.gmra.mxu0 %v5520_v25  ;;  %v1808_v63 = vpack.c.bf16 %v873_v51, %v871_v43 }
 0x136   : > { %3946 = vmatmul.msk.bf16.gmra.mxu1 %vm454_vm0, %v4381_v33  ;;  %3963 = vmatmul.msk.bf16.gmra.mxu2 %vm454_vm0, %v4382_v53  ;;  %v3984_v33 = vld [vmem:[%s5080_s12 + $0x28] sm:$0xf0] }
 0x137   : > { %v5532_v26 = vor.u32 %v4395_v16, %v3984_v33  ;;  %v4397_v16 = vld [vmem:[%s5080_s12 + $0x34] sm:$0xf]  ;;  %v3992_v33 = vld [vmem:[%s5080_s12 + $0x38] sm:$0xf0] }
 0x139   : > { %v875_v48 = vpop.f32.mrf.mxu2 }
 0x13a   : > { %v876_v40 = vadd.f32 %v875_v48, %v5144_v44  ;;  %v863_v48 = vadd.f32 %v5381_v42, %v5144_v44 }
 0x13b   : > { %v783_v29 = vpop.f32.mrf.mxu1 }
 0x13c   : > { %1526 = vmatmul.bf16.gmra.mxu3 %v5136_v39  ;;  %v1806_v43 = vpack.c.bf16 %v863_v48, %v861_v59  ;;  %v782_v59 = vadd.f32 %v781_v12, %v5178_v62  ;;  %v5566_v48 = vor.u32 %v4397_v16, %v3992_v33  ;;  %v4240_v16 = vld [vmem:[%s8312_s8 + $0x1b0] sm:$0xf0] }
 0x141   : > { %v877_v41 = vpop.f32.mrf.mxu2 }
 0x142   : > { %v878_v56 = vadd.f32 %v877_v41, %v5144_v44 }
 0x143   : > { %v786_v17 = vpop.f32.mrf.mxu1 }
 0x144   : > { %v1809_v3 = vpack.c.bf16 %v878_v56, %v876_v40  ;;  %1477 = vmatmul.bf16.gmra.mxu0 %v5532_v26  ;;  %v1807_v40 = vpack.c.bf16 %v868_v18, %v866_v11  ;;  %v787_v27 = vadd.f32 %v786_v17, %v5178_v62  ;;  %v4182_v11 = vld [vmem:[%s8312_s8 + $0x128] sm:$0xf]  ;;  %v4446_v18 = vld [vmem:[%s8312_s8 + $0x134] sm:$0xf0]  ;;  %v784_v56 = vadd.f32 %v783_v29, %v5178_v62 }
 0x145   : > { %v4183_v51 = vor.u32 %v4446_v18, %v4182_v11  ;;  %v779_v29 = vadd.f32 %v5501_v28, %v5178_v62 }
 0x146   : > { %3947 = vmatmul.msk.bf16.gmra.mxu1 %vm454_vm0, %v4382_v53  ;;  %3566 = vmatpush.bf16.msra.mxu3 %v1809_v3  ;;  %v4198_v3 = vld [vmem:[%s8312_s8 + $0x148] sm:$0xf] }
 0x147   : > { %v4199_v41 = vor.u32 %v4450_v55, %v4198_v3  ;;  %v2439_v55 = vpack.c.bf16 %v779_v29, %v777_v15  ;;  %v8387_v29 = vpack.c.bf16 %v5278_v6, %v5275_v0  ;;  %v4451_v15 = vld [vmem:[%s8312_s8 + $0x164] sm:$0xf] }
 0x149   : > { %v5540_v24 = vpop.f32.mrf.mxu2  ;;  %1660 = vmatpush.bf16.msra.mxu2 %v4199_v41 }
 0x14a   : > { %3567 = vmatpush.bf16.msra.mxu3 %v1808_v63 }
 0x14b   : > { %v788_v35 = vpop.f32.mrf.mxu1 }
 0x14c   : > { %v789_v53 = vadd.f32 %v788_v35, %v5178_v62  ;;  %v4442_v35 = vld [vmem:[%s8312_s8 + $0x114] sm:$0xf0] }
 0x14d   : > { %1661 = vmatpush.bf16.msra.mxu2 %v4183_v51  ;;  %v8386_v51 = vpack.c.bf16 %v5353_v9, %v5350_v8  ;;  %v4455_v8 = vld [vmem:[%s8312_s8 + $0x184] sm:$0xf]  ;;  %v4224_v9 = vld [vmem:[%s8312_s8 + $0x190] sm:$0xf0] }
 0x14e   : > { %v2441_v42 = vpack.c.bf16 %v789_v53, %v787_v27  ;;  %3568 = vmatpush.bf16.msra.mxu3 %v1807_v40  ;;  %v4166_v40 = vld [vmem:[%s8312_s8 + $0x108] sm:$0xf]  ;;  %v2440_v53 = vpack.c.bf16 %v784_v56, %v782_v59 }
 0x14f   : > { %v4167_v27 = vor.u32 %v4442_v35, %v4166_v40  ;;  %v4401_v40 = vld [vmem:[%s5080_s12 + $0x54] sm:$0xf]  ;;  %v4008_v35 = vld [vmem:[%s5080_s12 + $0x58] sm:$0xf0] }
 0x150   : > { %2450 = vmatpush.bf16.xpose.msrb.mxu1 %v2441_v42  ;;  %v4256_v42 = vld [vmem:[%s8312_s8 + $0x1d0] sm:$0xf0] }
 0x151   : > { %v5560_v63 = vpop.f32.mrf.mxu2  ;;  %1662 = vmatpush.bf16.msra.mxu2 %v4167_v27  ;;  %v4259_v18 = vor.u32 %v4463_v54, %v4256_v42  ;;  %v5650_v27 = vor.u32 %v4401_v40, %v4008_v35  ;;  %v4443_v54 = vld [vmem:[%s8312_s8 + $0x124] sm:$0xf]  ;;  %v4176_v42 = vld [vmem:[%s8312_s8 + $0x130] sm:$0xf0]  ;;  %v4468_v40 = vld [vmem:[%s8312_s8 + $0x1ec] sm:$0xf] }
 0x152   : > { %3569 = vmatpush.bf16.msra.mxu3 %v1806_v43  ;;  %v4280_v35 = vld [vmem:[%s8312_s8 + $0x1f8] sm:$0xf0] }
 0x153   : > { %v791_v17 = vpop.f32.mrf.mxu1 }
 0x154   : > { %1482 = vmatmul.bf16.gmra.mxu0 %v5566_v48  ;;  %1663 = vmatmul.bf16.vlgmr.msra.gmra.mxu2 %v5482_v61  ;;  %v5590_v19 = vadd.f32 %v791_v17, %v5178_v62  ;;  %v4459_v17 = vld [vmem:[%s8312_s8 + $0x1a4] sm:$0xf] }
 0x155   : > { %v4243_v33 = vor.u32 %v4459_v17, %v4240_v16  ;;  %v4403_v17 = vld [vmem:[%s5080_s12 + $0x64] sm:$0xf]  ;;  %v4016_v16 = vld [vmem:[%s5080_s12 + $0x68] sm:$0xf0] }
 0x156   : > { %1614 = vmatmul.bf16.vlgmr.msra.gmra.mxu1 %v5093_v4  ;;  %3570 = vmatpush.bf16.msra.mxu3 %v1805_v31 }
 0x158   : > { %2451 = vmatpush.bf16.xpose.msrb.mxu1 %v2440_v53  ;;  %v4227_v53 = vor.u32 %v4455_v8, %v4224_v9  ;;  %v4283_v8 = vor.u32 %v4468_v40, %v4280_v35  ;;  %v8389_v9 = vpack.c.bf16 %v5184_v2, %v5181_v1 }
 0x159   : > { %v5579_v12 = vpop.f32.mrf.mxu2 }
 0x15a   : > { %3571 = vmatpush.bf16.msra.mxu3 %v1804_v45  ;;  %v4399_v45 = vld [vmem:[%s5080_s12 + $0x44] sm:$0xf] }
 0x15b   : > { %v793_v3 = vpop.f32.mrf.mxu1  ;;  %v5607_v41 = vor.u32 %v4399_v45, %v4000_v49  ;;  %v4447_v49 = vld [vmem:[%s8312_s8 + $0x144] sm:$0xf] }
 0x15c   : > { %v5593_v31 = vadd.f32 %v793_v3, %v5178_v62 }
 0x15e   : > { %3572 = vmatpush.bf16.msra.mxu3 %v1803_v13 }
 0x160   : > { %2452 = vmatpush.bf16.xpose.msrb.mxu1 %v2439_v55  ;;  %v4208_v55 = vld [vmem:[%s8312_s8 + $0x170] sm:$0xf0] }
 0x161   : > { %v5600_v32 = vpop.f32.mrf.mxu2 }
 0x162   : > { %3573 = vmatpush.bf16.msra.mxu3 %v1802_v57  ;;  %v4275_v57 = vor.u32 %v4467_v50, %v4272_v52 }
 0x163   : > { %v796_v36 = vpop.f32.mrf.mxu1 }
 0x164   : > { %1487 = vmatmul.bf16.gmra.mxu0 %v5607_v41  ;;  %1668 = vmatmul.bf16.gmra.mxu2 %v5520_v25  ;;  %v5624_v43 = vadd.f32 %v796_v36, %v5178_v62  ;;  %v4211_v36 = vor.u32 %v4451_v15, %v4208_v55  ;;  %v4264_v15 = vld [vmem:[%s8312_s8 + $0x1d8] sm:$0xf0] }
 0x165   : > { %1557 = vmatpush.bf16.msra.mxu0 %v4275_v57  ;;  %v8388_v57 = vpack.c.bf16 %v5216_v23, %v5213_v20  ;;  %v4439_v20 = vld [vmem:[%s8312_s8 + $0x104] sm:$0xf]  ;;  %v4160_v23 = vld [vmem:[%s8312_s8 + $0x110] sm:$0xf0] }
 0x166   : > { %1619 = vmatmul.bf16.gmra.mxu1 %v5116_v22 }
 0x168   : > { %2453 = vmatpush.bf16.xpose.msrb.mxu1 %v8385_v5  ;;  %v4192_v5 = vld [vmem:[%s8312_s8 + $0x150] sm:$0xf0] }
 0x169   : > { %v5614_v7 = vpop.f32.mrf.mxu2  ;;  %1558 = vmatpush.bf16.msra.mxu0 %v4259_v18  ;;  %v4195_v52 = vor.u32 %v4447_v49, %v4192_v5  ;;  %v4179_v18 = vor.u32 %v4443_v54, %v4176_v42  ;;  %v4460_v49 = vld [vmem:[%s8312_s8 + $0x1ac] sm:$0xf]  ;;  %v4248_v5 = vld [vmem:[%s8312_s8 + $0x1b8] sm:$0xf0] }
 0x16a   : > { %v4456_v54 = vld [vmem:[%s8312_s8 + $0x18c] sm:$0xf]  ;;  %v4232_v42 = vld [vmem:[%s8312_s8 + $0x198] sm:$0xf0] }
 0x16b   : > { %v798_v13 = vpop.f32.mrf.mxu1 }
 0x16c   : > { %v5627_v37 = vadd.f32 %v798_v13, %v5178_v62 }
 0x16d   : > { %1559 = vmatpush.bf16.msra.mxu0 %v4243_v33  ;;  %v5699_v33 = vor.u32 %v4403_v17, %v4016_v16  ;;  %v4405_v17 = vld [vmem:[%s5080_s12 + $0x74] sm:$0xf]  ;;  %v4024_v16 = vld [vmem:[%s5080_s12 + $0x78] sm:$0xf0]  ;;  %s3693_s12 = sshll.u32 %s7727_s1, 4  ;;  %s3694_s12 = int_to_ptr.vmem [resolvable:$true] %s3693_s12 }
 0x170   : > { %2454 = vmatpush.bf16.xpose.msrb.mxu1 %v8386_v51 }
 0x171   : > { %v5640_v56 = vpop.f32.mrf.mxu2  ;;  %1560 = vmatpush.bf16.msra.mxu0 %v4227_v53 }
 0x173   : > { %v801_v59 = vpop.f32.mrf.mxu1 }
 0x174   : > { %1492 = vmatmul.bf16.gmra.mxu0 %v5650_v27  ;;  %1673 = vmatmul.bf16.gmra.mxu2 %v5532_v26  ;;  %v5673_v0 = vadd.f32 %v801_v59, %v5178_v62  ;;  %v4163_v59 = vor.u32 %v4439_v20, %v4160_v23  ;;  %v5751_v20 = vor.u32 %v4405_v17, %v4024_v16  ;;  %v4452_v23 = vld [vmem:[%s8312_s8 + $0x16c] sm:$0xf] }
 0x175   : > { %1561 = vmatpush.bf16.msra.mxu0 %v4211_v36 }
 0x176   : > { %1624 = vmatmul.bf16.gmra.mxu1 %v5136_v39 }
 0x178   : > { %2455 = vmatpush.bf16.xpose.msrb.mxu1 %v8387_v29  ;;  %v4464_v29 = vld [vmem:[%s8312_s8 + $0x1cc] sm:$0xf] }
 0x179   : > { %v5663_v3 = vpop.f32.mrf.mxu2  ;;  %1562 = vmatpush.bf16.msra.mxu0 %v4195_v52  ;;  %v4267_v36 = vor.u32 %v4464_v29, %v4264_v15  ;;  %v4251_v52 = vor.u32 %v4460_v49, %v4248_v5  ;;  %v4444_v5 = vld [vmem:[%s8312_s8 + $0x12c] sm:$0xf] }
 0x17b   : > { %v803_v45 = vpop.f32.mrf.mxu1 }
 0x17c   : > { %v5676_v6 = vadd.f32 %v803_v45, %v5178_v62 }
 0x17d   : > { %1563 = vmatpush.bf16.msra.mxu0 %v4179_v18 }
 0x180   : > { %2456 = vmatpush.bf16.xpose.msrb.mxu1 %v8388_v57 }
 0x181   : > { %v5689_v13 = vpop.f32.mrf.mxu2  ;;  %1564 = vmatpush.bf16.msra.mxu0 %v4163_v59  ;;  %v4216_v59 = vld [vmem:[%s8312_s8 + $0x178] sm:$0xf0] }
 0x182   : > { %v4219_v40 = vor.u32 %v4452_v23, %v4216_v59 }
 0x183   : > { %v806_v51 = vpop.f32.mrf.mxu1 }
 0x184   : > { %1497 = vmatmul.bf16.gmra.mxu0 %v5699_v33  ;;  %1678 = vmatmul.bf16.gmra.mxu2 %v5566_v48  ;;  %v5728_v1 = vadd.f32 %v806_v51, %v5178_v62  ;;  %v4235_v51 = vor.u32 %v4456_v54, %v4232_v42 }
 0x185   : > { %1753 = vmatpush.bf16.msrb.mxu0 %v4283_v8  ;;  %v4448_v8 = vld [vmem:[%s8312_s8 + $0x14c] sm:$0xf] }
 0x186   : > { %1629 = vmatmul.bf16.gmra.mxu1 %v5167_v58 }
 0x188   : > { %2457 = vmatpush.bf16.xpose.msrb.mxu1 %v8389_v9  ;;  %v4200_v9 = vld [vmem:[%s8312_s8 + $0x158] sm:$0xf0] }
 0x189   : > { %v5718_v53 = vpop.f32.mrf.mxu2  ;;  %1754 = vmatpush.bf16.msrb.mxu0 %v4267_v36  ;;  %v4203_v15 = vor.u32 %v4448_v8, %v4200_v9 }
 0x18b   : > { %v808_v55 = vpop.f32.mrf.mxu1 }
 0x18c   : > { %v5731_v2 = vadd.f32 %v808_v55, %v5178_v62 }
 0x18d   : > { %1755 = vmatpush.bf16.msrb.mxu0 %v4251_v52  ;;  %v4184_v52 = vld [vmem:[%s8312_s8 + $0x138] sm:$0xf0] }
 0x18e   : > { %v4187_v54 = vor.u32 %v4444_v5, %v4184_v52 }
 0x191   : > { %v5741_v57 = vpop.f32.mrf.mxu2  ;;  %1756 = vmatpush.bf16.msrb.mxu0 %v4235_v51  ;;  %v4168_v51 = vld [vmem:[%s8312_s8 + $0x118] sm:$0xf0] }
 0x193   : > { %v811_v18 = vpop.f32.mrf.mxu1 }
 0x194   : > { %1502 = vmatmul.bf16.gmra.mxu0 %v5751_v20  ;;  %1683 = vmatmul.bf16.gmra.mxu2 %v5607_v41  ;;  %v5769_v55 = vadd.f32 %v811_v18, %v5178_v62  ;;  %v4440_v18 = vld [vmem:[%s8312_s8 + $0x10c] sm:$0xf] }
 0x195   : > { %1757 = vmatpush.bf16.msrb.mxu0 %v4219_v40  ;;  %v4171_v16 = vor.u32 %v4440_v18, %v4168_v51 }
 0x196   : > { %1634 = vmatmul.bf16.gmra.mxu1 %v5201_v14 }
 0x199   : > { %v905_v35 = vpop.f32.mrf.mxu2  ;;  %1758 = vmatpush.bf16.msrb.mxu0 %v4203_v15 }
 0x19a   : > { %v906_v50 = vadd.f32 %v905_v35, %v5144_v44 }
 0x19b   : > { %v813_v29 = vpop.f32.mrf.mxu1 }
 0x19c   : > { %v5772_v36 = vadd.f32 %v813_v29, %v5178_v62  ;;  %v488_v29 = vpop.f32.mrf.mxu0 }
 0x19d   : > { %1759 = vmatpush.bf16.msrb.mxu0 %v4187_v54 }
 0x1a1   : > { %v907_v42 = vpop.f32.mrf.mxu2  ;;  %1760 = vmatpush.bf16.msrb.mxu0 %v4171_v16 }
 0x1a2   : > { %v908_v45 = vadd.f32 %v907_v42, %v5144_v44 }
 0x1a3   : > { %v5788_v17 = vpop.f32.mrf.mxu1 }
 0x1a4   : > { %1565 = vmatmul.bf16.vlgmr.msra.gmra.mxu0 %v5482_v61  ;;  %1688 = vmatmul.bf16.gmra.mxu2 %v5650_v27  ;;  %v490_v28 = vpop.f32.mrf.mxu0 }
 0x1a6   : > { %1639 = vmatmul.bf16.gmra.mxu1 %v5251_v47 }
 0x1a9   : > { %v910_v23 = vpop.f32.mrf.mxu2 }
 0x1aa   : > { %v911_v54 = vadd.f32 %v910_v23, %v5144_v44  ;;  %v901_v23 = vadd.f32 %v5718_v53, %v5144_v44 }
 0x1ab   : > { %v818_v59 = vpop.f32.mrf.mxu1 }
 0x1b1   : > { %v912_v40 = vpop.f32.mrf.mxu2 }
 0x1b2   : > { %v913_v18 = vadd.f32 %v912_v40, %v5144_v44  ;;  %v903_v40 = vadd.f32 %v5741_v57, %v5144_v44 }
 0x1b3   : > { %v821_v8 = vpop.f32.mrf.mxu1 }
 0x1b4   : > { %1570 = vmatmul.bf16.gmra.mxu0 %v5520_v25  ;;  %1693 = vmatmul.bf16.gmra.mxu2 %v5699_v33  ;;  %v1816_v49 = vpack.c.bf16 %v913_v18, %v911_v54  ;;  %v1814_v54 = vpack.c.bf16 %v903_v40, %v901_v23  ;;  %v891_v23 = vadd.f32 %v5614_v7, %v5144_v44 }
 0x1b5   : > { %v822_v40 = vadd.f32 %v821_v8, %v5178_v62  ;;  %v888_v7 = vadd.f32 %v5600_v32, %v5144_v44  ;;  %v5836_v8 = vld [vmem:[%s8313_s9] sm:$0xf]  ;;  %v817_v32 = vadd.f32 %v5788_v17, %v5178_v62 }
 0x1b6   : > { %1644 = vmatmul.bf16.gmra.mxu1 %v5310_v34 }
 0x1b9   : > { %v915_v9 = vpop.f32.mrf.mxu2 }
 0x1ba   : > { %v916_v5 = vadd.f32 %v915_v9, %v5144_v44  ;;  %v1815_v9 = vpack.c.bf16 %v908_v45, %v906_v50  ;;  %v896_v50 = vadd.f32 %v5663_v3, %v5144_v44  ;;  %v898_v45 = vadd.f32 %v5689_v13, %v5144_v44  ;;  %v523_v13 = vpop.f32.mrf.mxu3 }
 0x1bb   : > { %v823_v15 = vpop.f32.mrf.mxu1 }
 0x1bc   : > { %v824_v57 = vadd.f32 %v823_v15, %v5178_v62  ;;  %v886_v15 = vadd.f32 %v5579_v12, %v5144_v44  ;;  %v883_v12 = vadd.f32 %v5560_v63, %v5144_v44 }
 0x1be   : > { %v2448_v3 = vpack.c.bf16 %v824_v57, %v822_v40 }
 0x1c1   : > { %v917_v52 = vpop.f32.mrf.mxu2 }
 0x1c2   : > { %v918_v51 = vadd.f32 %v917_v52, %v5144_v44  ;;  %v493_v52 = vpop.f32.mrf.mxu0  ;;  %v525_v57 = vpop.f32.mrf.mxu3  ;;  %1531 = vmatmul.bf16.gmra.mxu3 %v5167_v58 }
 0x1c3   : > { %v826_v16 = vpop.f32.mrf.mxu1 }
 0x1c4   : > { %v1817_v11 = vpack.c.bf16 %v918_v51, %v916_v5  ;;  %1575 = vmatmul.bf16.gmra.mxu0 %v5532_v26  ;;  %1698 = vmatmul.bf16.gmra.mxu2 %v5751_v20  ;;  %v827_v35 = vadd.f32 %v826_v16, %v5178_v62 }
 0x1c6   : > { %1649 = vmatmul.bf16.gmra.mxu1 %v5397_v60  ;;  %3615 = vmatpush.bf16.msra.mxu0 %v1817_v11  ;;  %v4750_v11 = vld [vmem:[%s8309_s5] ss:$0 sm:$0xff] }
 0x1c7   : > { %v489_v18 = vadd.f32 %v4750_v11, %v488_v29  ;;  %v491_v51 = vadd.f32 %v4750_v11, %v490_v28  ;;  %v893_v29 = vadd.f32 %v5640_v56, %v5144_v44  ;;  %v1813_v28 = vpack.c.bf16 %v898_v45, %v896_v50 }
 0x1c8   : > { %v819_v56 = vadd.f32 %v818_v59, %v5178_v62  ;;  %v494_v50 = vadd.f32 %v4750_v11, %v493_v52 }
 0x1ca   : > { %3616 = vmatpush.bf16.msra.mxu0 %v1816_v49  ;;  %v5819_v49 = vpack.c.bf16 %v491_v51, %v489_v18  ;;  %v524_v18 = vadd.f32 %v4750_v11, %v523_v13  ;;  %v5847_v51 = vperm.slane %v5836_v8, 2  ;;  %v1419_v52 = vpop.f32.mrf.mxu3 }
 0x1cb   : > { %v828_v5 = vpop.f32.mrf.mxu1 }
 0x1cc   : > { %v829_v42 = vadd.f32 %v828_v5, %v5178_v62  ;;  %v1812_v5 = vpack.c.bf16 %v893_v29, %v891_v23 }
 0x1ce   : > { %v2449_v53 = vpack.c.bf16 %v829_v42, %v827_v35  ;;  %3617 = vmatpush.bf16.msra.mxu0 %v1815_v9  ;;  %v495_v9 = vpop.f32.mrf.mxu0  ;;  %v881_v42 = vadd.f32 %v5540_v24, %v5144_v44  ;;  %v526_v24 = vadd.f32 %v4750_v11, %v525_v57 }
 0x1cf   : > { %v496_v45 = vadd.f32 %v4750_v11, %v495_v9  ;;  %v8390_v11 = vpack.c.bf16 %v5772_v36, %v5769_v55 }
 0x1d0   : > { %2499 = vmatpush.bf16.xpose.msrb.mxu2 %v2449_v53  ;;  %v2447_v53 = vpack.c.bf16 %v819_v56, %v817_v32  ;;  %v1810_v23 = vpack.c.bf16 %v883_v12, %v881_v42  ;;  %v5850_v44 = vpack.c.bf16 %v526_v24, %v524_v18 }
 0x1d1   : > { %v5853_v62 = vpack.c.bf16 %v496_v45, %v494_v50 }
 0x1d2   : > { %3618 = vmatpush.bf16.msra.mxu0 %v1814_v54  ;;  %v1811_v54 = vpack.c.bf16 %v888_v7, %v886_v15  ;;  %v1421_v15 = vpop.f32.mrf.mxu3  ;;  %1536 = vmatmul.bf16.gmra.mxu3 %v5201_v14 }
 0x1d3   : > { %v1615_v16 = vpop.f32.mrf.mxu1 }
 0x1d4   : > { %1580 = vmatmul.bf16.gmra.mxu0 %v5566_v48  ;;  %v1616_v63 = vadd.f32 %v1615_v16, %v5847_v51  ;;  %v5866_v16 = vperm.slane %v5836_v8, 0 }
 0x1d6   : > { %2458 = vmatmul.bf16.vlgmr.msrb.gmra.mxu1 %v5819_v49  ;;  %3619 = vmatpush.bf16.msra.mxu0 %v1813_v28  ;;  %v1468_v40 = vpop.f32.mrf.mxu0  ;;  %v1420_v9 = vadd.f32 %v1419_v52, %v5866_v16  ;;  %v1422_v7 = vadd.f32 %v1421_v15, %v5866_v16 }
 0x1d7   : > { %v1664_v59 = vpop.f32.mrf.mxu2 }
 0x1d8   : > { %2500 = vmatpush.bf16.xpose.msrb.mxu2 %v2448_v3  ;;  %v5858_v28 = vadd.f32 %v1664_v59, %v1616_v63  ;;  %v5874_v55 = vadd.f32 %v1468_v40, %v1420_v9 }
 0x1da   : > { %3620 = vmatpush.bf16.msra.mxu0 %v1812_v5  ;;  %v8391_v5 = vpack.c.bf16 %v5731_v2, %v5728_v1  ;;  %v1424_v32 = vpop.f32.mrf.mxu3  ;;  %v8392_v1 = vpack.c.bf16 %v5676_v6, %v5673_v0 }
 0x1db   : > { %v5838_v35 = vpop.f32.mrf.mxu1 }
 0x1de   : > { %3621 = vmatpush.bf16.msra.mxu0 %v1811_v54  ;;  %v1470_v36 = vpop.f32.mrf.mxu0 }
 0x1df   : > { %v5855_v29 = vpop.f32.mrf.mxu2  ;;  %v5877_v56 = vadd.f32 %v1470_v36, %v1422_v7 }
 0x1e0   : > { %2501 = vmatpush.bf16.xpose.msrb.mxu2 %v2447_v53  ;;  %v1425_v53 = vadd.f32 %v1424_v32, %v5866_v16 }
 0x1e2   : > { %3622 = vmatpush.bf16.msra.mxu0 %v1810_v23  ;;  %v1426_v45 = vpop.f32.mrf.mxu3  ;;  %1541 = vmatmul.bf16.gmra.mxu3 %v5251_v47  ;;  %v8393_v23 = vpack.c.bf16 %v5627_v37, %v5624_v43 }
 0x1e3   : > { %v1620_v17 = vpop.f32.mrf.mxu1  ;;  %v1427_v24 = vadd.f32 %v1426_v45, %v5866_v16 }
 0x1e4   : > { %1585 = vmatmul.bf16.gmra.mxu0 %v5607_v41  ;;  %v1621_v42 = vadd.f32 %v1620_v17, %v5847_v51 }
 0x1e6   : > { %2463 = vmatmul.bf16.gmra.mxu1 %v5853_v62  ;;  %v1473_v2 = vpop.f32.mrf.mxu0 }
 0x1e7   : > { %v1669_v13 = vpop.f32.mrf.mxu2  ;;  %v5892_v57 = vadd.f32 %v1473_v2, %v1425_v53 }
 0x1e8   : > { %2502 = vmatpush.bf16.xpose.msrb.mxu2 %v8390_v11  ;;  %v5883_v18 = vadd.f32 %v1669_v13, %v1621_v42  ;;  %v8394_v13 = vpack.c.bf16 %v5593_v31, %v5590_v19 }
 0x1ea   : > { %v1429_v11 = vpop.f32.mrf.mxu3 }
 0x1eb   : > { %v5863_v3 = vpop.f32.mrf.mxu1  ;;  %v1430_v9 = vadd.f32 %v1429_v11, %v5866_v16 }
 0x1ee   : > { %v1475_v63 = vpop.f32.mrf.mxu0 }
 0x1ef   : > { %v5880_v54 = vpop.f32.mrf.mxu2  ;;  %v5899_v0 = vadd.f32 %v1475_v63, %v1427_v24 }
 0x1f0   : > { %2503 = vmatpush.bf16.xpose.msrb.mxu2 %v8391_v5 }
 0x1f2   : > { %v1431_v7 = vpop.f32.mrf.mxu3  ;;  %1546 = vmatmul.bf16.gmra.mxu3 %v5310_v34 }
 0x1f3   : > { %v1625_v12 = vpop.f32.mrf.mxu1  ;;  %v1432_v36 = vadd.f32 %v1431_v7, %v5866_v16 }
 0x1f4   : > { %1590 = vmatmul.bf16.gmra.mxu0 %v5650_v27  ;;  %v1626_v6 = vadd.f32 %v1625_v12, %v5847_v51 }
 0x1f6   : > { %2468 = vmatmul.bf16.gmra.mxu1 %v5101_v10  ;;  %v1478_v43 = vpop.f32.mrf.mxu0 }
 0x1f7   : > { %v1674_v50 = vpop.f32.mrf.mxu2  ;;  %v5915_v5 = vadd.f32 %v1478_v43, %v1430_v9 }
 0x1f8   : > { %2504 = vmatpush.bf16.xpose.msrb.mxu2 %v8392_v1  ;;  %v5905_v40 = vadd.f32 %v1674_v50, %v1626_v6 }
 0x1fa   : > { %v1434_v1 = vpop.f32.mrf.mxu3 }
 0x1fb   : > { %v5888_v59 = vpop.f32.mrf.mxu1  ;;  %v1435_v50 = vadd.f32 %v1434_v1, %v5866_v16 }
 0x1fe   : > { %v1480_v42 = vpop.f32.mrf.mxu0 }
 0x1ff   : > { %v5902_v52 = vpop.f32.mrf.mxu2  ;;  %v5919_v19 = vadd.f32 %v1480_v42, %v1432_v36 }
 0x200   : > { %2505 = vmatpush.bf16.xpose.msrb.mxu2 %v8393_v23 }
 0x202   : > { %v1436_v24 = vpop.f32.mrf.mxu3  ;;  %1551 = vmatmul.bf16.gmra.mxu3 %v5397_v60 }
 0x203   : > { %v1630_v17 = vpop.f32.mrf.mxu1  ;;  %v1437_v63 = vadd.f32 %v1436_v24, %v5866_v16 }
 0x204   : > { %1595 = vmatmul.bf16.gmra.mxu0 %v5699_v33  ;;  %v1631_v31 = vadd.f32 %v1630_v17, %v5847_v51 }
 0x206   : > { %2473 = vmatmul.bf16.gmra.mxu1 %v5127_v30 }
 0x207   : > { %v1679_v15 = vpop.f32.mrf.mxu2 }
 0x208   : > { %2506 = vmatpush.bf16.xpose.msrb.mxu2 %v8394_v13  ;;  %v5925_v2 = vadd.f32 %v1679_v15, %v1631_v31 }
 0x20a   : > { %v1439_v15 = vpop.f32.mrf.mxu3 }
 0x20b   : > { %v5910_v37 = vpop.f32.mrf.mxu1  ;;  %v1440_v31 = vadd.f32 %v1439_v15, %v5866_v16 }
 0x20f   : > { %2507 = vmatmul.bf16.vlgmr.msrb.gmra.mxu2 %v5819_v49  ;;  %v5922_v32 = vpop.f32.mrf.mxu2  ;;  %v1483_v49 = vpop.f32.mrf.mxu0 }
 0x210   : > { %v5930_v23 = vadd.f32 %v1483_v49, %v1435_v50 }
 0x212   : > { %v1441_v49 = vpop.f32.mrf.mxu3  ;;  %1712 = vmatmul.bf16.vlgmr.msrb.gmra.mxu3 %v5093_v4 }
 0x213   : > { %v1635_v12 = vpop.f32.mrf.mxu1 }
 0x214   : > { %v1636_v11 = vadd.f32 %v1635_v12, %v5847_v51 }
 0x216   : > { %2478 = vmatmul.bf16.gmra.mxu1 %v5146_v46 }
 0x217   : > { %v1684_v45 = vpop.f32.mrf.mxu2  ;;  %v1485_v6 = vpop.f32.mrf.mxu0  ;;  %1600 = vmatmul.bf16.gmra.mxu0 %v5751_v20 }
 0x218   : > { %v5934_v17 = vadd.f32 %v1485_v6, %v1437_v63  ;;  %v5939_v7 = vadd.f32 %v1684_v45, %v1636_v11 }
 0x21a   : > { %v1444_v4 = vpop.f32.mrf.mxu3 }
 0x21b   : > { %v1637_v53 = vpop.f32.mrf.mxu1  ;;  %v1445_v15 = vadd.f32 %v1444_v4, %v5866_v16 }
 0x21c   : > { %v1638_v13 = vadd.f32 %v1637_v53, %v5847_v51  ;;  %v1442_v53 = vadd.f32 %v1441_v49, %v5866_v16 }
 0x21f   : > { %2512 = vmatmul.bf16.gmra.mxu2 %v5853_v62  ;;  %v1686_v9 = vpop.f32.mrf.mxu2  ;;  %v1488_v36 = vpop.f32.mrf.mxu0 }
 0x220   : > { %v5941_v62 = vadd.f32 %v1686_v9, %v1638_v13  ;;  %v5946_v12 = vadd.f32 %v1488_v36, %v1440_v31 }
 0x222   : > { %v1446_v31 = vpop.f32.mrf.mxu3  ;;  %1717 = vmatmul.bf16.gmra.mxu3 %v5116_v22 }
 0x223   : > { %v1640_v43 = vpop.f32.mrf.mxu1 }
 0x224   : > { %v1641_v24 = vadd.f32 %v1640_v43, %v5847_v51 }
 0x226   : > { %2483 = vmatmul.bf16.gmra.mxu1 %v5114_v21 }
 0x227   : > { %v1689_v1 = vpop.f32.mrf.mxu2  ;;  %v1490_v50 = vpop.f32.mrf.mxu0  ;;  %1761 = vmatmul.bf16.vlgmr.msrb.gmra.mxu0 %v5482_v61 }
 0x228   : > { %v5950_v45 = vadd.f32 %v1490_v50, %v1442_v53  ;;  %v5955_v13 = vadd.f32 %v1689_v1, %v1641_v24 }
 0x22b   : > { %v1642_v42 = vpop.f32.mrf.mxu1 }
 0x22c   : > { %v1643_v63 = vadd.f32 %v1642_v42, %v5847_v51  ;;  %v1447_v42 = vadd.f32 %v1446_v31, %v5866_v16 }
 0x22f   : > { %2517 = vmatmul.bf16.gmra.mxu2 %v5101_v10  ;;  %v1691_v11 = vpop.f32.mrf.mxu2  ;;  %v1493_v9 = vpop.f32.mrf.mxu0 }
 0x230   : > { %v5957_v10 = vadd.f32 %v1691_v11, %v1643_v63  ;;  %v5962_v43 = vadd.f32 %v1493_v9, %v1445_v15  ;;  %v1449_v63 = vpop.f32.mrf.mxu3 }
 0x231   : > { %v1450_v9 = vadd.f32 %v1449_v63, %v5866_v16 }
 0x233   : > { %v1645_v6 = vpop.f32.mrf.mxu1 }
 0x234   : > { %v1646_v53 = vadd.f32 %v1645_v6, %v5847_v51 }
 0x236   : > { %2488 = vmatmul.bf16.gmra.mxu1 %v5134_v38 }
 0x237   : > { %v1694_v61 = vpop.f32.mrf.mxu2  ;;  %v1495_v49 = vpop.f32.mrf.mxu0  ;;  %1766 = vmatmul.bf16.gmra.mxu0 %v5520_v25 }
 0x238   : > { %v5966_v1 = vadd.f32 %v1495_v49, %v1447_v42  ;;  %v5971_v22 = vadd.f32 %v1694_v61, %v1646_v53  ;;  %v1451_v25 = vpop.f32.mrf.mxu3  ;;  %1722 = vmatmul.bf16.gmra.mxu3 %v5136_v39 }
 0x23b   : > { %v1647_v36 = vpop.f32.mrf.mxu1 }
 0x23c   : > { %v1648_v50 = vadd.f32 %v1647_v36, %v5847_v51  ;;  %v1452_v36 = vadd.f32 %v1451_v25, %v5866_v16 }
 0x23f   : > { %2522 = vmatmul.bf16.gmra.mxu2 %v5127_v30  ;;  %v1696_v24 = vpop.f32.mrf.mxu2  ;;  %v1498_v4 = vpop.f32.mrf.mxu0 }
 0x240   : > { %v5973_v30 = vadd.f32 %v1696_v24, %v1648_v50  ;;  %v5978_v6 = vadd.f32 %v1498_v4, %v1450_v9  ;;  %v1454_v24 = vpop.f32.mrf.mxu3 }
 0x241   : > { %v1455_v4 = vadd.f32 %v1454_v24, %v5866_v16  ;;  %v6006_v24 = vperm.slane %v5836_v8, 1 }
 0x243   : > { %v1650_v11 = vpop.f32.mrf.mxu1 }
 0x244   : > { %v1651_v49 = vadd.f32 %v1650_v11, %v5847_v51 }
 0x246   : > { %2493 = vmatmul.bf16.gmra.mxu1 %v5850_v44 }
 0x247   : > { %v1699_v15 = vpop.f32.mrf.mxu2  ;;  %v1500_v31 = vpop.f32.mrf.mxu0  ;;  %1771 = vmatmul.bf16.gmra.mxu0 %v5532_v26 }
 0x248   : > { %v5982_v42 = vadd.f32 %v1500_v31, %v1452_v36  ;;  %v5986_v63 = vadd.f32 %v1699_v15, %v1651_v49  ;;  %v1456_v9 = vpop.f32.mrf.mxu3  ;;  %1727 = vmatmul.bf16.gmra.mxu3 %v5167_v58 }
 0x249   : > { %v1457_v11 = vadd.f32 %v1456_v9, %v5866_v16 }
 0x24b   : > { %v1652_v61 = vpop.f32.mrf.mxu1 }
 0x24c   : > { %v1653_v53 = vadd.f32 %v1652_v61, %v5847_v51 }
 0x24f   : > { %2527 = vmatmul.bf16.gmra.mxu2 %v5146_v46  ;;  %v1701_v50 = vpop.f32.mrf.mxu2  ;;  %v1503_v46 = vpop.f32.mrf.mxu0 }
 0x250   : > { %v5988_v39 = vadd.f32 %v1701_v50, %v1653_v53  ;;  %v5993_v26 = vadd.f32 %v1503_v46, %v1455_v4  ;;  %v1517_v15 = vpop.f32.mrf.mxu3 }
 0x251   : > { %v1518_v46 = vadd.f32 %v1517_v15, %v6006_v24 }
 0x252   : > { %8395 = vst [vmem:[#allocation7_spill] sm:$0xff] %v5988_v39 }
 0x257   : > { %v1505_v25 = vpop.f32.mrf.mxu0  ;;  %1776 = vmatmul.bf16.gmra.mxu0 %v5566_v48  ;;  %v2459_v48 = vpop.f32.mrf.mxu1 }
 0x258   : > { %v5997_v36 = vadd.f32 %v1505_v25, %v1457_v11  ;;  %v1519_v61 = vpop.f32.mrf.mxu3  ;;  %1732 = vmatmul.bf16.gmra.mxu3 %v5201_v14 }
 0x259   : > { %v1520_v8 = vadd.f32 %v1519_v61, %v6006_v24 }
 0x25f   : > { %2532 = vmatmul.bf16.gmra.mxu2 %v5114_v21  ;;  %v1566_v31 = vpop.f32.mrf.mxu0 }
 0x260   : > { %v1522_v21 = vpop.f32.mrf.mxu3  ;;  %v1567_v4 = vadd.f32 %v1566_v31, %v1518_v46 }
 0x267   : > { %v1568_v49 = vpop.f32.mrf.mxu0  ;;  %1781 = vmatmul.bf16.gmra.mxu0 %v5607_v41 }
 0x268   : > { %v1524_v53 = vpop.f32.mrf.mxu3  ;;  %1737 = vmatmul.bf16.gmra.mxu3 %v5251_v47 }
 0x26f   : > { %2537 = vmatmul.bf16.gmra.mxu2 %v5134_v38  ;;  %v1571_v58 = vpop.f32.mrf.mxu0  ;;  %v2461_v38 = vpop.f32.mrf.mxu1 }
 0x270   : > { %v1527_v50 = vpop.f32.mrf.mxu3  ;;  %v6020_v46 = vadd.f32 %v2461_v38, %v5877_v56 }
 0x277   : > { %v1573_v16 = vpop.f32.mrf.mxu0  ;;  %1786 = vmatmul.bf16.gmra.mxu0 %v5650_v27  ;;  %v2464_v11 = vpop.f32.mrf.mxu1 }
 0x278   : > { %v1529_v41 = vpop.f32.mrf.mxu3  ;;  %1742 = vmatmul.bf16.gmra.mxu3 %v5310_v34  ;;  %v1569_v34 = vadd.f32 %v1568_v49, %v1520_v8  ;;  %v6030_v56 = vadd.f32 %v2464_v11, %v5892_v57 }
 0x27f   : > { %2542 = vmatmul.bf16.gmra.mxu2 %v5850_v44  ;;  %v1576_v14 = vpop.f32.mrf.mxu0  ;;  %v6012_v44 = vadd.f32 %v2459_v48, %v5874_v55  ;;  %v1523_v55 = vadd.f32 %v1522_v21, %v6006_v24  ;;  %v1525_v21 = vadd.f32 %v1524_v53, %v6006_v24 }
 0x280   : > { %v1532_v15 = vpop.f32.mrf.mxu3 }
 0x287   : > { %v1578_v9 = vpop.f32.mrf.mxu0  ;;  %1791 = vmatmul.bf16.gmra.mxu0 %v5699_v33 }
 0x288   : > { %v1534_v61 = vpop.f32.mrf.mxu3  ;;  %1747 = vmatmul.bf16.gmra.mxu3 %v5397_v60 }
 0x28f   : > { %v1581_v39 = vpop.f32.mrf.mxu0 }
 0x292   : > { %v2508_v47 = vpop.f32.mrf.mxu2 }
 0x293   : > { %v6014_v27 = vadd.f32 %v2508_v47, %v1567_v4  ;;  %v2466_v4 = vpop.f32.mrf.mxu1  ;;  %v1572_v47 = vadd.f32 %v1571_v58, %v1523_v55 }
 0x294   : > { %v6038_v58 = vadd.f32 %v2466_v4, %v5899_v0 }
 0x295   : > { %v2548_v25 = vmax.f32 %v6012_v44, %v6014_v27 }
 0x297   : > { %2549 = vmax.xlane.f32.xlu0 %v2548_v25  ;;  %v1583_v25 = vpop.f32.mrf.mxu0  ;;  %1796 = vmatmul.bf16.gmra.mxu0 %v5751_v20  ;;  %v1528_v20 = vadd.f32 %v1527_v50, %v6006_v24 }
 0x299   : > { %v1577_v11 = vadd.f32 %v1576_v14, %v1528_v20  ;;  %v1533_v14 = vadd.f32 %v1532_v15, %v6006_v24  ;;  %v1537_v15 = vpop.f32.mrf.mxu3 }
 0x29a   : > { %v2510_v31 = vpop.f32.mrf.mxu2 }
 0x29b   : > { %v6022_v33 = vadd.f32 %v2510_v31, %v1569_v34  ;;  %v2469_v34 = vpop.f32.mrf.mxu1  ;;  %v1574_v31 = vadd.f32 %v1573_v16, %v1525_v21  ;;  %v1530_v16 = vadd.f32 %v1529_v41, %v6006_v24 }
 0x29d   : > { %v2551_v48 = vmax.f32 %v6020_v46, %v6022_v33  ;;  %v1579_v4 = vadd.f32 %v1578_v9, %v1530_v16  ;;  %v1535_v9 = vadd.f32 %v1534_v61, %v6006_v24 }
 0x29f   : > { %2552 = vmax.xlane.f32.xlu0 %v2551_v48  ;;  %v1586_v16 = vpop.f32.mrf.mxu0 }
 0x2a2   : > { %v2513_v49 = vpop.f32.mrf.mxu2 }
 0x2a3   : > { %v6032_v38 = vadd.f32 %v2513_v49, %v1572_v47  ;;  %v2471_v53 = vpop.f32.mrf.mxu1  ;;  %v6046_v47 = vadd.f32 %v2469_v34, %v5915_v5  ;;  %v1582_v34 = vadd.f32 %v1581_v39, %v1533_v14 }
 0x2a4   : > { %v6054_v21 = vadd.f32 %v2471_v53, %v5919_v19 }
 0x2a5   : > { %v2554_v8 = vmax.f32 %v6030_v56, %v6032_v38 }
 0x2a7   : > { %2555 = vmax.xlane.f32.xlu1 %v2554_v8 }
 0x2aa   : > { %v2515_v60 = vpop.f32.mrf.mxu2 }
 0x2ab   : > { %v6040_v55 = vadd.f32 %v2515_v60, %v1574_v31  ;;  %v2474_v31 = vpop.f32.mrf.mxu1 }
 0x2ac   : > { %v6062_v60 = vadd.f32 %v2474_v31, %v5930_v23  ;;  %v1538_v23 = vadd.f32 %v1537_v15, %v6006_v24  ;;  %v1539_v31 = vpop.f32.mrf.mxu3 }
 0x2ad   : > { %v2557_v57 = vmax.f32 %v6038_v58, %v6040_v55 }
 0x2ae   : > { %v1587_v61 = vadd.f32 %v1586_v16, %v1538_v23  ;;  %v1540_v16 = vadd.f32 %v1539_v31, %v6006_v24 }
 0x2af   : > { %2558 = vmax.xlane.f32.xlu1 %v2557_v57 }
 0x2b2   : > { %v2518_v48 = vpop.f32.mrf.mxu2 }
 0x2b3   : > { %v6048_v49 = vadd.f32 %v2518_v48, %v1577_v11  ;;  %v2476_v57 = vpop.f32.mrf.mxu1  ;;  %v1584_v11 = vadd.f32 %v1583_v25, %v1535_v9 }
 0x2b4   : > { %v6070_v48 = vadd.f32 %v2476_v57, %v5934_v17 }
 0x2b5   : > { %v2560_v0 = vmax.f32 %v6046_v47, %v6048_v49 }
 0x2b7   : > { %2561 = vmax.xlane.f32.xlu2 %v2560_v0 }
 0x2ba   : > { %v2520_v50 = vpop.f32.mrf.mxu2 }
 0x2bb   : > { %v6056_v8 = vadd.f32 %v2520_v50, %v1579_v4  ;;  %v2479_v4 = vpop.f32.mrf.mxu1 }
 0x2bc   : > { %v6078_v14 = vadd.f32 %v2479_v4, %v5946_v12 }
 0x2bd   : > { %v2563_v5 = vmax.f32 %v6054_v21, %v6056_v8 }
 0x2bf   : > { %2564 = vmax.xlane.f32.xlu2 %v2563_v5  ;;  %v1588_v5 = vpop.f32.mrf.mxu0 }
 0x2c2   : > { %v2523_v41 = vpop.f32.mrf.mxu2 }
 0x2c3   : > { %v6064_v20 = vadd.f32 %v2523_v41, %v1582_v34  ;;  %v2481_v57 = vpop.f32.mrf.mxu1 }
 0x2c5   : > { %v2566_v19 = vmax.f32 %v6062_v60, %v6064_v20 }
 0x2c7   : > { %2567 = vmax.xlane.f32.xlu0 %v2566_v19  ;;  %v1591_v12 = vpop.f32.mrf.mxu0 }
 0x2ca   : > { %v2525_v53 = vpop.f32.mrf.mxu2 }
 0x2cb   : > { %v6072_v39 = vadd.f32 %v2525_v53, %v1584_v11  ;;  %v1542_v53 = vpop.f32.mrf.mxu3 }
 0x2cd   : > { %v2569_v0 = vmax.f32 %v6070_v48, %v6072_v39 }
 0x2cf   : > { %2570 = vmax.xlane.f32.xlu1 %v2569_v0 }
 0x2d2   : > { %v2528_v50 = vpop.f32.mrf.mxu2 }
 0x2d3   : > { %v6080_v25 = vadd.f32 %v2528_v50, %v1587_v61 }
 0x2d5   : > { %v2572_v17 = vmax.f32 %v6078_v14, %v6080_v25 }
 0x2d7   : > { %2573 = vmax.xlane.f32.xlu1 %v2572_v17 }
 0x2da   : > { %v2530_v19 = vpop.f32.mrf.mxu2 }
 0x2e2   : > { %v2533_v17 = vpop.f32.mrf.mxu2 }
 0x30a   : > { %v2550_v34 = vpop.xlane.xlu0 %2549 }
 0x30b   : > { %v2596_v41 = vsub.f32 %v6012_v44, %v2550_v34  ;;  %v2597_v9 = vsub.f32 %v6014_v27, %v2550_v34  ;;  %v2484_v34 = vpop.f32.mrf.mxu1 }
 0x30d   : > { %v2628_v15 = vmul.f32 1.442695, %v2596_v41  ;;  %v2630_v11 = vmul.f32 1.442695, %v2597_v9  ;;  %v1589_v41 = vadd.f32 %v1588_v5, %v1540_v16  ;;  %v6103_v5 = vadd.f32 %v2481_v57, %v5950_v45 }
 0x30f   : > { %4526 = vpow2.f32 %v2628_v15  ;;  %v1544_v15 = vpop.f32.mrf.mxu3 }
 0x310   : > { %4528 = vpow2.f32 %v2630_v11 }
 0x312   : > { %v2553_v23 = vpop.xlane.xlu0 %2552 }
 0x313   : > { %v2598_v0 = vsub.f32 %v6020_v46, %v2553_v23  ;;  %v2599_v61 = vsub.f32 %v6022_v33, %v2553_v23  ;;  %v6095_v46 = vadd.f32 %v2530_v19, %v1589_v41  ;;  %v1543_v33 = vadd.f32 %v1542_v53, %v6006_v24  ;;  %v2535_v53 = vpop.f32.mrf.mxu2  ;;  %v2486_v41 = vpop.f32.mrf.mxu1 }
 0x315   : > { %v6089_v4 = vpop.eup %4526  ;;  %v2632_v44 = vmul.f32 1.442695, %v2598_v0  ;;  %v2634_v50 = vmul.f32 1.442695, %v2599_v61  ;;  %v1593_v0 = vpop.f32.mrf.mxu0  ;;  %v2575_v19 = vmax.f32 %v6103_v5, %v6095_v46 }
 0x316   : > { %v6091_v27 = vpop.eup %4528 }
 0x317   : > { %8396 = vst [vmem:[#allocation8_spill] sm:$0xff] %v6091_v27  ;;  %4530 = vpow2.f32 %v2632_v44  ;;  %v2692_v9 = vadd.f32 %v6091_v27, %v6089_v4  ;;  %v1547_v45 = vpop.f32.mrf.mxu3 }
 0x318   : > { %4532 = vpow2.f32 %v2634_v50  ;;  %v1592_v50 = vadd.f32 %v1591_v12, %v1543_v33  ;;  %v1545_v12 = vadd.f32 %v1544_v15, %v6006_v24 }
 0x319   : > { %2693 = vadd.xlane.f32.xlu2 %v2692_v9 }
 0x31a   : > { %v2556_v31 = vpop.xlane.xlu1 %2555  ;;  %v6113_v9 = vadd.f32 %v2533_v17, %v1592_v50  ;;  %v4284_v17 = vmul.f32 -1.442695, %v5858_v28 }
 0x31b   : > { %v2600_v11 = vsub.f32 %v6030_v56, %v2556_v31  ;;  %v2601_v23 = vsub.f32 %v6032_v38, %v2556_v31  ;;  %v1618_v38 = vadd.f32 %v5838_v35, %v5847_v51 }
 0x31d   : > { %v6100_v61 = vpop.eup %4530  ;;  %v2636_v16 = vmul.f32 1.442695, %v2600_v11  ;;  %v2638_v44 = vmul.f32 1.442695, %v2601_v23  ;;  %v1667_v23 = vadd.f32 %v5855_v29, %v1618_v38  ;;  %v1596_v50 = vpop.f32.mrf.mxu0  ;;  %v1623_v29 = vadd.f32 %v5863_v3, %v5847_v51 }
 0x31e   : > { %v6105_v27 = vpop.eup %4532 }
 0x31f   : > { %4534 = vpow2.f32 %v2636_v16  ;;  %v2695_v56 = vadd.f32 %v6105_v27, %v6100_v61  ;;  %v6122_v16 = vadd.f32 %v2484_v34, %v5962_v43  ;;  %v4286_v43 = vmul.f32 -1.442695, %v1667_v23  ;;  %v2538_v34 = vpop.f32.mrf.mxu2 }
 0x320   : > { %4536 = vpow2.f32 %v2638_v44  ;;  %v6142_v23 = vadd.f32 %v2486_v41, %v5966_v1  ;;  %v1628_v1 = vadd.f32 %v5888_v59, %v5847_v51 }
 0x321   : > { %2576 = vmax.xlane.f32.xlu2 %v2575_v19  ;;  %2696 = vadd.xlane.f32.xlu0 %v2695_v56  ;;  %v1594_v56 = vadd.f32 %v1593_v0, %v1545_v12  ;;  %v1548_v0 = vadd.f32 %v1547_v45, %v6006_v24  ;;  %v1672_v12 = vadd.f32 %v5880_v54, %v1623_v29  ;;  %v4288_v45 = vmul.f32 -1.442695, %v5883_v18 }
 0x322   : > { %v2559_v57 = vpop.xlane.xlu1 %2558  ;;  %v1677_v59 = vadd.f32 %v5902_v52, %v1628_v1 }
 0x323   : > { %v2602_v31 = vsub.f32 %v6038_v58, %v2559_v57  ;;  %v2603_v33 = vsub.f32 %v6040_v55, %v2559_v57  ;;  %v2578_v58 = vmax.f32 %v6122_v16, %v6113_v9  ;;  %v6133_v28 = vadd.f32 %v2535_v53, %v1594_v56 }
 0x324   : > { %v4290_v56 = vmul.f32 -1.442695, %v1672_v12 }
 0x325   : > { %v6118_v11 = vpop.eup %4534  ;;  %v2640_v35 = vmul.f32 1.442695, %v2602_v31  ;;  %v2642_v44 = vmul.f32 1.442695, %v2603_v33  ;;  %v2489_v31 = vpop.f32.mrf.mxu1  ;;  %v2581_v54 = vmax.f32 %v6142_v23, %v6133_v28 }
 0x326   : > { %8397 = vst [vmem:[#allocation9_spill] sm:$0xff] %v6118_v11  ;;  %v6124_v19 = vpop.eup %4536  ;;  %v1549_v33 = vpop.f32.mrf.mxu3 }
 0x327   : > { %8398 = vst [vmem:[#allocation10_spill] sm:$0xff] %v6124_v19  ;;  %4538 = vpow2.f32 %v2640_v35  ;;  %v2698_v55 = vadd.f32 %v6124_v19, %v6118_v11 }
 0x328   : > { %4540 = vpow2.f32 %v2642_v44 }
 0x329   : > { %2579 = vmax.xlane.f32.xlu2 %v2578_v58  ;;  %2699 = vadd.xlane.f32.xlu0 %v2698_v55  ;;  %4542 = vpow2.f32 %v4284_v17  ;;  %v1597_v17 = vadd.f32 %v1596_v50, %v1548_v0  ;;  %v1598_v58 = vpop.f32.mrf.mxu0  ;;  %v1550_v55 = vadd.f32 %v1549_v33, %v6006_v24  ;;  %v2540_v0 = vpop.f32.mrf.mxu2 }
 0x32a   : > { %v2562_v15 = vpop.xlane.xlu2 %2561  ;;  %4544 = vpow2.f32 %v4286_v43 }
 0x32b   : > { %v2604_v38 = vsub.f32 %v6046_v47, %v2562_v15  ;;  %v2605_v57 = vsub.f32 %v6048_v49, %v2562_v15  ;;  %v6153_v50 = vadd.f32 %v2538_v34, %v1597_v17 }
 0x32d   : > { %v6139_v3 = vpop.eup %4538  ;;  %v2644_v35 = vmul.f32 1.442695, %v2604_v38  ;;  %v2646_v44 = vmul.f32 1.442695, %v2605_v57  ;;  %v6164_v57 = vadd.f32 %v2489_v31, %v5978_v6  ;;  %v1633_v6 = vadd.f32 %v5910_v37, %v5847_v51 }
 0x32e   : > { %8399 = vst [vmem:[#allocation11_spill] sm:$0xff] %v6139_v3  ;;  %v6144_v53 = vpop.eup %4540  ;;  %v4292_v31 = vmul.f32 -1.442695, %v5905_v40 }
 0x32f   : > { %8400 = vst [vmem:[#allocation12_spill] sm:$0xff] %v6144_v53  ;;  %4546 = vpow2.f32 %v2644_v35  ;;  %v2701_v47 = vadd.f32 %v6144_v53, %v6139_v3  ;;  %v4543_v49 = vpop.eup %4542  ;;  %v2584_v17 = vmax.f32 %v6164_v57, %v6153_v50 }
 0x330   : > { %4548 = vpow2.f32 %v2646_v44  ;;  %v4545_v18 = vpop.eup %4544  ;;  %v6158_v15 = vadd.f32 1.0, %v4543_v49  ;;  %v1552_v44 = vpop.f32.mrf.mxu3  ;;  %v4296_v49 = vmul.f32 -1.442695, %v5925_v2 }
 0x331   : > { %2702 = vadd.xlane.f32.xlu1 %v2701_v47  ;;  %2582 = vmax.xlane.f32.xlu0 %v2581_v54  ;;  %4550 = vpow2.f32 %v4288_v45  ;;  %v6168_v33 = vadd.f32 1.0, %v4545_v18  ;;  %v4294_v47 = vmul.f32 -1.442695, %v1677_v59  ;;  %v1682_v18 = vadd.f32 %v5922_v32, %v1633_v6 }
 0x332   : > { %v2565_v41 = vpop.xlane.xlu2 %2564  ;;  %4552 = vpow2.f32 %v4290_v56  ;;  %v1601_v56 = vpop.f32.mrf.mxu0  ;;  %vm1951_vm1 = vweird.f32 %v6158_v15 }
 0x333   : > { %v2606_v29 = vsub.f32 %v6054_v21, %v2565_v41  ;;  %v2607_v43 = vsub.f32 %v6056_v8, %v2565_v41  ;;  %v2491_v21 = vpop.f32.mrf.mxu1  ;;  %v1599_v8 = vadd.f32 %v1598_v58, %v1550_v55  ;;  %v1553_v41 = vadd.f32 %v1552_v44, %v6006_v24 }
 0x334   : > { %v6191_v2 = vadd.f32 %v2491_v21, %v5982_v42  ;;  %v4298_v21 = vmul.f32 -1.442695, %v1682_v18  ;;  %vm1981_vm5 = vweird.f32 %v6168_v33 }
 0x335   : > { %v6160_v38 = vpop.eup %4546  ;;  %v2648_v12 = vmul.f32 1.442695, %v2606_v29  ;;  %v2650_v34 = vmul.f32 1.442695, %v2607_v43  ;;  %v6180_v1 = vadd.f32 %v2540_v0, %v1599_v8 }
 0x336   : > { %8401 = vst [vmem:[#allocation13_spill] sm:$0xff] %v6160_v38  ;;  %v6166_v35 = vpop.eup %4548 }
 0x337   : > { %8402 = vst [vmem:[#allocation14_spill] sm:$0xff] %v6166_v35  ;;  %4554 = vpow2.f32 %v2648_v12  ;;  %v2704_v45 = vadd.f32 %v6166_v35, %v6160_v38  ;;  %v4551_v52 = vpop.eup %4550  ;;  %v1602_v12 = vadd.f32 %v1601_v56, %v1553_v41  ;;  %v2587_v32 = vmax.f32 %v6191_v2, %v6180_v1 }
 0x338   : > { %4556 = vpow2.f32 %v2650_v34  ;;  %v4553_v54 = vpop.eup %4552  ;;  %8403 = vst [vmem:[#allocation15_spill] sm:$0xff] %v6180_v1  ;;  %v6185_v37 = vadd.f32 1.0, %v4551_v52  ;;  %v1554_v8 = vpop.f32.mrf.mxu3 }
 0x339   : > { %4558 = vrcp.f32 %v6158_v15  ;;  %2705 = vadd.xlane.f32.xlu1 %v2704_v45  ;;  %2585 = vmax.xlane.f32.xlu0 %v2584_v17  ;;  %8405 = vst [vmem:[#allocation17_spill] sm:$0xff] %v6191_v2  ;;  %v6195_v59 = vadd.f32 1.0, %v4553_v54  ;;  %v4300_v17 = vmul.f32 -1.442695, %v5939_v7  ;;  %v4302_v7 = vmul.f32 -1.442695, %v5941_v62 }
 0x33a   : > { %4560 = vrcp.f32 %v6168_v33  ;;  %v2568_v58 = vpop.xlane.xlu0 %2567  ;;  %v1603_v41 = vpop.f32.mrf.mxu0  ;;  %vm2011_vm7 = vweird.f32 %v6185_v37 }
 0x33b   : > { %v2608_v51 = vsub.f32 %v6062_v60, %v2568_v58  ;;  %v2609_v40 = vsub.f32 %v6064_v20, %v2568_v58  ;;  %4562 = vpow2.f32 %v4292_v31  ;;  %v2543_v60 = vpop.f32.mrf.mxu2  ;;  %v2494_v44 = vpop.f32.mrf.mxu1  ;;  %vm2041_vm10 = vweird.f32 %v6195_v59 }
 0x33c   : > { %4564 = vpow2.f32 %v4294_v47  ;;  %v6208_v31 = vadd.f32 %v2543_v60, %v1602_v12  ;;  %v1555_v47 = vadd.f32 %v1554_v8, %v6006_v24  ;;  %v1955_v8 = vand.u32 2147483647, %v6158_v15 }
 0x33d   : > { %v6188_v55 = vpop.eup %4554  ;;  %v2652_v29 = vmul.f32 1.442695, %v2608_v51  ;;  %v2654_v43 = vmul.f32 1.442695, %v2609_v40  ;;  %4566 = vpow2.f32 %v4296_v49  ;;  %v6219_v40 = vadd.f32 %v2494_v44, %v5993_v26 }
 0x33e   : > { %8404 = vst [vmem:[#allocation16_spill] sm:$0xff] %v6188_v55  ;;  %v6193_v0 = vpop.eup %4556  ;;  %v1604_v12 = vadd.f32 %v1603_v41, %v1555_v47  ;;  %v4304_v47 = vmul.f32 -1.442695, %v5955_v13  ;;  %vm6258_vm2 = vcmp.eq.f32.partialorder %v1955_v8, 8.507059e+37  ;;  %v2047_v35 = vand.u32 2147483648, %v6195_v59 }
 0x33f   : > { %8406 = vst [vmem:[#allocation18_spill] sm:$0xff] %v6193_v0  ;;  %v6197_v20 = vpop.eup %4558  ;;  %4568 = vpow2.f32 %v2652_v29  ;;  %v2707_v34 = vadd.f32 %v6193_v0, %v6188_v55  ;;  %v2590_v62 = vmax.f32 %v6219_v40, %v6208_v31 }
 0x340   : > { %v6203_v42 = vpop.eup %4560  ;;  %4570 = vpow2.f32 %v2654_v43  ;;  %8407 = vst [vmem:[#allocation19_spill] sm:$0xff] %v6208_v31  ;;  %v1947_v58 = vmul.f32 %v6197_v20, %v6158_v15  ;;  %vm1952_vm3 = vweird.f32 %v6197_v20 }
 0x341   : > { %4572 = vrcp.f32 %v6185_v37  ;;  %2588 = vmax.xlane.f32.xlu1 %v2587_v32  ;;  %2708 = vadd.xlane.f32.xlu2 %v2707_v34  ;;  %v4563_v45 = vpop.eup %4562  ;;  %8409 = vst [vmem:[#allocation21_spill] sm:$0xff] %v6219_v40  ;;  %vm6286_vm4 = vmor %vm1951_vm1, %vm1952_vm3  ;;  %vm1982_vm6 = vweird.f32 %v6203_v42 }
 0x342   : > { %4574 = vrcp.f32 %v6195_v59  ;;  %v2571_v52 = vpop.xlane.xlu1 %2570  ;;  %v4565_v6 = vpop.eup %4564  ;;  %v1948_v34 = vsub.f32 1.0, %v1947_v58  ;;  %vm6327_vm9 = vmor %vm1981_vm5, %vm1982_vm6 }
 0x343   : > { %v2610_v54 = vsub.f32 %v6070_v48, %v2571_v52  ;;  %v2611_v49 = vsub.f32 %v6072_v39, %v2571_v52  ;;  %v4567_v56 = vpop.eup %4566  ;;  %4576 = vpow2.f32 %v4298_v21  ;;  %v1977_v48 = vmul.f32 %v6203_v42, %v6168_v33  ;;  %v2545_v44 = vpop.f32.mrf.mxu2 }
 0x344   : > { %v6225_v39 = vadd.f32 1.0, %v4563_v45  ;;  %v6227_v43 = vadd.f32 1.0, %v4565_v6  ;;  %4578 = vpow2.f32 %v4300_v17  ;;  %v6237_v21 = vadd.f32 1.0, %v4567_v56 }
 0x345   : > { %v6215_v51 = vpop.eup %4568  ;;  %v2656_v18 = vmul.f32 1.442695, %v2610_v54  ;;  %v2658_v29 = vmul.f32 1.442695, %v2611_v49  ;;  %v1957_v45 = vand.u32 2147483648, %v6158_v15  ;;  %v1978_v52 = vsub.f32 1.0, %v1977_v48  ;;  %v2496_v54 = vpop.f32.mrf.mxu1 }
 0x346   : > { %8408 = vst [vmem:[#allocation20_spill] sm:$0xff] %v6215_v51  ;;  %v6221_v24 = vpop.eup %4570  ;;  %v6247_v56 = vadd.f32 %v2545_v44, %v1604_v12  ;;  %vm2071_vm1 = vweird.f32 %v6225_v39  ;;  %vm2101_vm3 = vweird.f32 %v6227_v43 }
 0x347   : > { %8410 = vst [vmem:[#allocation22_spill] sm:$0xff] %v6221_v24  ;;  %v6229_v60 = vpop.eup %4572  ;;  %4580 = vpow2.f32 %v2656_v18  ;;  %v2710_v26 = vadd.f32 %v6221_v24, %v6215_v51  ;;  %v1949_v18 = vmul.f32 %v6197_v20, %v1948_v34  ;;  %v1979_v8 = vmul.f32 %v6203_v42, %v1978_v52 }
 0x348   : > { %v6235_v32 = vpop.eup %4574  ;;  %4582 = vpow2.f32 %v2658_v29  ;;  %v2007_v6 = vmul.f32 %v6229_v60, %v6185_v37  ;;  %8411 = vst [vmem:[#allocation23_spill] sm:$0xff] %v6247_v56  ;;  %v1987_v29 = vand.u32 2147483648, %v6168_v33  ;;  %v1958_v52 = vor.u32 1.1754944e-38, %v1957_v45 }
 0x349   : > { %4584 = vpow2.f32 %v4302_v7  ;;  %2591 = vmax.xlane.f32.xlu1 %v2590_v62  ;;  %2711 = vadd.xlane.f32.xlu2 %v2710_v26  ;;  %v4577_v17 = vpop.eup %4576  ;;  %v2037_v48 = vmul.f32 %v6235_v32, %v6195_v59  ;;  %vm2012_vm8 = vweird.f32 %v6229_v60  ;;  %vm2042_vm11 = vweird.f32 %v6235_v32  ;;  %v4751_v62 = vld [vmem:[%s8313_s9] sm:$0xf] }
 0x34a   : > { %4586 = vrcp.f32 %v6225_v39  ;;  %v2574_v49 = vpop.xlane.xlu1 %2573  ;;  %v4579_v7 = vpop.eup %4578  ;;  %v2008_v44 = vsub.f32 1.0, %v2007_v6  ;;  %v6278_v51 = vadd.f32 1.0, %v4577_v17  ;;  %v6302_v45 = vor.u32 1.1754944e-38, %v1987_v29  ;;  %vm6348_vm12 = vmor %vm2011_vm7, %vm2012_vm8 }
 0x34b   : > { %4588 = vrcp.f32 %v6227_v43  ;;  %v2612_v58 = vsub.f32 %v6078_v14, %v2574_v49  ;;  %v2613_v41 = vsub.f32 %v6080_v25, %v2574_v49  ;;  %v4306_v14 = vmul.f32 -1.442695, %v5957_v10  ;;  %v6293_v17 = vpop.f32.mrf.mxu3  ;;  %vm6370_vm13 = vmor %vm2041_vm10, %vm2042_vm11 }
 0x34c   : > { %4590 = vrcp.f32 %v6237_v21  ;;  %v6264_v25 = vadd.f32 %v2496_v54, %v5997_v36  ;;  %v4308_v49 = vmul.f32 -1.442695, %v5971_v22  ;;  %v2009_v15 = vmul.f32 %v6229_v60, %v2008_v44 }
 0x34d   : > { %v6256_v13 = vpop.eup %4580  ;;  %v2660_v12 = vmul.f32 1.442695, %v2612_v58  ;;  %v2662_v26 = vmul.f32 1.442695, %v2613_v41  ;;  %4592 = vpow2.f32 %v4304_v47  ;;  %v1950_v58 = vadd.f32 %v6197_v20, %v1949_v18 }
 0x34e   : > { %8412 = vst [vmem:[#allocation24_spill] sm:$0xff] %v6256_v13  ;;  %v6266_v34 = vpop.eup %4582  ;;  %v2593_v36 = vmax.f32 %v6264_v25, %v6247_v56  ;;  %v2038_v41 = vsub.f32 1.0, %v2037_v48  ;;  %v6291_v47 = vadd.f32 1.0, %v4579_v7  ;;  %v1985_v48 = vand.u32 2147483647, %v6168_v33 }
 0x34f   : > { %8415 = vst [vmem:[#allocation25_spill] sm:$0xff] %v6264_v25  ;;  %v4585_v24 = vpop.eup %4584  ;;  %4594 = vpow2.f32 %v2660_v12  ;;  %v2713_v10 = vadd.f32 %v6266_v34, %v6256_v13  ;;  %v4310_v7 = vmul.f32 -1.442695, %v5973_v30  ;;  %v1762_v30 = vpop.f32.mrf.mxu0  ;;  %v2015_v22 = vand.u32 2147483647, %v6185_v37 }
 0x350   : > { %8416 = vst [vmem:[#allocation26_spill] sm:$0xff] %v6266_v34  ;;  %v6275_v54 = vpop.eup %4586  ;;  %4596 = vpow2.f32 %v2662_v26  ;;  %v6299_v12 = vadd.f32 1.0, %v4585_v24  ;;  %v2017_v24 = vand.u32 2147483648, %v6185_v37  ;;  %v2039_v44 = vmul.f32 %v6235_v32, %v2038_v41 }
 0x351   : > { %v6280_v6 = vpop.eup %4588  ;;  %4598 = vpow2.f32 %v4306_v14  ;;  %2714 = vadd.xlane.f32.xlu0 %v2713_v10  ;;  %2594 = vmax.xlane.f32.xlu2 %v2593_v36  ;;  %v6306_v14 = vadd.f32 %v6203_v42, %v1979_v8  ;;  %v1954_v10 = vsel %vm6286_vm4, %v6197_v20, %v1950_v58  ;;  %v2067_v29 = vmul.f32 %v6275_v54, %v6225_v39 }
 0x352   : > { %v6295_v18 = vpop.eup %4590  ;;  %4600 = vpow2.f32 %v4308_v49  ;;  %v6333_v36 = vadd.f32 %v6229_v60, %v2009_v15  ;;  %v2097_v41 = vmul.f32 %v6280_v6, %v6227_v43  ;;  %v6344_v13 = vsel %vm6258_vm2, %v1958_v52, %v1954_v10 }
 0x353   : > { %v4593_v26 = vpop.eup %4592  ;;  %4602 = vrcp.f32 %v6278_v51  ;;  %v2040_v0 = vadd.f32 %v6235_v32, %v2039_v44  ;;  %v6360_v52 = vperm.slane %v4751_v62, 3  ;;  %v1984_v37 = vsel %vm6327_vm9, %v6203_v42, %v6306_v14  ;;  %v1715_v62 = vpop.f32.mrf.mxu3 }
 0x354   : > { %4604 = vrcp.f32 %v6291_v47  ;;  %v2127_v44 = vmul.f32 %v6295_v18, %v6237_v21  ;;  %vm6380_vm14 = vcmp.eq.f32.partialorder %v1985_v48, 8.507059e+37  ;;  %v2018_v42 = vor.u32 1.1754944e-38, %v2017_v24 }
 0x355   : > { %v6314_v49 = vpop.eup %4594  ;;  %4606 = vrcp.f32 %v6299_v12  ;;  %v2098_v20 = vsub.f32 1.0, %v2097_v41  ;;  %v2014_v55 = vsel %vm6348_vm12, %v6229_v60, %v6333_v36  ;;  %vm6392_vm15 = vcmp.eq.f32.partialorder %v2015_v22, 8.507059e+37  ;;  %v8435_v36 = vld [vmem:[#allocation7_spill] sm:$0xff] }
 0x356   : > { %8419 = vst [vmem:[#allocation27_spill] sm:$0xff] %v6314_v49  ;;  %v6321_v8 = vpop.eup %4596  ;;  %4608 = vpow2.f32 %v4310_v7  ;;  %v2045_v7 = vand.u32 2147483647, %v6195_v59  ;;  %v2044_v24 = vsel %vm6370_vm13, %v6235_v32, %v2040_v0  ;;  %v2048_v41 = vor.u32 1.1754944e-38, %v2047_v35 }
 0x357   : > { %8420 = vst [vmem:[#allocation28_spill] sm:$0xff] %v6321_v8  ;;  %v4599_v58 = vpop.eup %4598  ;;  %v2716_v33 = vadd.f32 %v6321_v8, %v6314_v49  ;;  %v2068_v8 = vsub.f32 1.0, %v2067_v29  ;;  %v6355_v49 = vadd.f32 1.0, %v4593_v26  ;;  %v4314_v22 = vmul.f32 -1.442695, %v8435_v36 }
 0x358   : > { %v4601_v34 = vpop.eup %4600  ;;  %v6378_v29 = vadd.f32 1.0, %v4599_v58  ;;  %v4312_v58 = vmul.f32 -1.442695, %v5986_v63  ;;  %vm6402_vm0 = vcmp.eq.f32.partialorder %v2045_v7, 8.507059e+37  ;;  %v1714_v15 = vadd.f32 %v6293_v17, %v6360_v52 }
 0x359   : > { %2717 = vadd.xlane.f32.xlu0 %v2716_v33  ;;  %v6374_v26 = vpop.eup %4602  ;;  %v6386_v59 = vadd.f32 1.0, %v4601_v34  ;;  %v2069_v60 = vmul.f32 %v6275_v54, %v2068_v8  ;;  %4610 = vrcp.f32 %v6355_v49  ;;  %v2128_v63 = vsub.f32 1.0, %v2127_v44  ;;  %v1764_v8 = vpop.f32.mrf.mxu0 }
 0x35a   : > { %v6384_v14 = vpop.eup %4604  ;;  %v6413_v10 = vmul.f32 %v6374_v26, %v6278_v51  ;;  %4612 = vrcp.f32 %v6378_v29  ;;  %v1716_v0 = vadd.f32 %v1715_v62, %v6360_v52  ;;  %v2099_v17 = vmul.f32 %v6280_v6, %v2098_v20 }
 0x35b   : > { %8429 = vst [vmem:[#allocation29_spill] sm:$0xff] %v6386_v59  ;;  %v6396_v48 = vpop.eup %4606  ;;  %v2187_v35 = vmul.f32 %v6384_v14, %v6291_v47  ;;  %4614 = vrcp.f32 %v6386_v59  ;;  %vm2072_vm2 = vweird.f32 %v6275_v54  ;;  %v1763_v44 = vadd.f32 %v1762_v30, %v1714_v15 }
 0x35c   : > { %8432 = vst [vmem:[#allocation30_spill] sm:$0xff] %v6396_v48  ;;  %v4609_v53 = vpop.eup %4608  ;;  %v2217_v32 = vmul.f32 %v6396_v48, %v6299_v12  ;;  %4616 = vpow2.f32 %v4312_v58  ;;  %vm2102_vm4 = vweird.f32 %v6280_v6  ;;  %v1765_v62 = vadd.f32 %v1764_v8, %v1716_v0  ;;  %vm6446_vm5 = vmor %vm2071_vm1, %vm2072_vm2 }
 0x35d   : > { %v6423_v7 = vadd.f32 1.0, %v4609_v53  ;;  %4618 = vpow2.f32 %v4314_v22  ;;  %v6432_v36 = vsel %vm6380_vm14, %v6302_v45, %v1984_v37  ;;  %v2070_v53 = vadd.f32 %v6275_v54, %v2069_v60  ;;  %vm6458_vm6 = vmor %vm2101_vm3, %vm2102_vm4 }
 0x35e   : > { %v2077_v20 = vand.u32 2147483648, %v6225_v39  ;;  %v6440_v22 = vsel %vm6392_vm15, %v2018_v42, %v2014_v55  ;;  %v6444_v30 = vsel %vm6402_vm0, %v2048_v41, %v2044_v24  ;;  %v2075_v45 = vand.u32 2147483647, %v6225_v39 }
 0x35f   : > { %8436 = vst [vmem:[#allocation7_spill] sm:$0xff] %v6423_v7  ;;  %v6436_v58 = vpop.eup %4610  ;;  %v2100_v37 = vadd.f32 %v6280_v6, %v2099_v17  ;;  %v2158_v60 = vsub.f32 1.0, %v6413_v10  ;;  %4620 = vrcp.f32 %v6423_v7  ;;  %v2105_v55 = vand.u32 2147483647, %v6227_v43 }
 0x360   : > { %8437 = vst [vmem:[#allocation31_spill] sm:$0xff] %v6440_v22  ;;  %v6452_v33 = vpop.eup %4612  ;;  %v2107_v42 = vand.u32 2147483648, %v6227_v43  ;;  %v2129_v39 = vmul.f32 %v6295_v18, %v2128_v63  ;;  %v2188_v34 = vsub.f32 1.0, %v2187_v35  ;;  %v2218_v41 = vsub.f32 1.0, %v2217_v32 }
 0x361   : > { %8438 = vst [vmem:[#allocation32_spill] sm:$0xff] %v6444_v30  ;;  %v6464_v24 = vpop.eup %4614  ;;  %v4285_v0 = vmul.f32 -1.442695, %v1763_v44  ;;  %v4287_v8 = vmul.f32 -1.442695, %v1765_v62  ;;  %v2982_v17 = vlaneseq  ;;  %v2074_v19 = vsel %vm6446_vm5, %v6275_v54, %v2070_v53 }
 0x362   : > { %8443 = vst [vmem:[#allocation33_spill] sm:$0xff] %v6464_v24  ;;  %v4617_v10 = vpop.eup %4616  ;;  %v2078_v56 = vor.u32 1.1754944e-38, %v2077_v20  ;;  %v2247_v43 = vmul.f32 %v6436_v58, %v6355_v49  ;;  %v2277_v63 = vmul.f32 %v6452_v33, %v6378_v29  ;;  %vm6477_vm7 = vcmp.eq.f32.partialorder %v2075_v45, 8.507059e+37 }
 0x363   : > { %v4619_v25 = vpop.eup %4618  ;;  %v2104_v32 = vsel %vm6458_vm6, %v6280_v6, %v2100_v37  ;;  %v6484_v44 = vshrl.u32 %v2982_v17, 7  ;;  %v3017_v54 = vand.u32 127, %v2982_v17  ;;  %vm6486_vm8 = vcmp.eq.f32.partialorder %v2105_v55, 8.507059e+37 }
 0x364   : > { %v2108_v53 = vor.u32 1.1754944e-38, %v2107_v42  ;;  %v2307_v20 = vmul.f32 %v6464_v24, %v6386_v59  ;;  %v6492_v15 = vadd.f32 1.0, %v4617_v10  ;;  %4622 = vpow2.f32 %v4285_v0 }
 0x365   : > { %v6496_v45 = vstv %s4316_s21  ;;  %v6498_v3 = vpop.eup %4620  ;;  %v6500_v6 = vadd.f32 1.0, %v4619_v25  ;;  %4624 = vpow2.f32 %v4287_v8  ;;  %v3018_v38 = vadd.s32 128, %v3017_v54 }
 0x366   : > { %8448 = vst [vmem:[#allocation34_spill] sm:$0xff] %v6492_v15  ;;  %v3000_v37 = vadd.s32 %v6496_v45, %v6484_v44  ;;  %v6505_v55 = vmul.f32 %v6384_v14, %v2188_v34  ;;  %v6508_v42 = vmul.f32 %v6396_v48, %v2218_v41  ;;  %v2248_v10 = vsub.f32 1.0, %v2247_v43 }
 0x367   : > { %8449 = vst [vmem:[#allocation35_spill] sm:$0xff] %v6498_v3  ;;  %v2278_v0 = vsub.f32 1.0, %v2277_v63  ;;  %v6510_v59 = vmul.u32 2246822519, %v3017_v54  ;;  %v6512_v11 = vmul.u32 2246822519, %v3018_v38  ;;  %v6516_v25 = vsel %vm6477_vm7, %v2078_v56, %v2074_v19  ;;  %v1718_v56 = vpop.f32.mrf.mxu3 }
 0x368   : > { %8450 = vst [vmem:[#allocation36_spill] sm:$0xff] %v6500_v6  ;;  %v3019_v17 = vmul.u32 2654435761, %v3000_v37  ;;  %v2308_v8 = vsub.f32 1.0, %v2307_v20  ;;  %v2337_v34 = vmul.f32 %v6498_v3, %v6423_v7  ;;  %4626 = vrcp.f32 %v6492_v15 }
 0x369   : > { %8451 = vst [vmem:[#allocation37_spill] sm:$0xff] %v6516_v25  ;;  %v6523_v41 = vsel %vm6486_vm8, %v2108_v53, %v2104_v32  ;;  %4628 = vrcp.f32 %v6500_v6  ;;  %v2159_v35 = vmul.f32 %v6374_v26, %v2158_v60  ;;  %v6530_v54 = vstv %s6475_s13  ;;  %s4772_s13 = scalar_lea.hbm %s8314_s10, 256 }
 0x36a   : > { %8452 = vst [vmem:[#allocation38_spill] sm:$0xff] %v6523_v41  ;;  %v3037_v43 = vxor.u32 %v6510_v59, %v3019_v17  ;;  %v3038_v63 = vxor.u32 %v6512_v11, %v3019_v17  ;;  %v4623_v19 = vpop.eup %4622  ;;  %vm2131_vm9 = vweird.f32 %v6237_v21  ;;  %vm2132_vm10 = vweird.f32 %v6295_v18  ;;  %p4774_p1 = scmp.lt.s32.totalorder %s4772_s13, %s4768_s0 }
 0x36b   : > { %v2137_v62 = vand.u32 2147483648, %v6237_v21  ;;  %v4625_v32 = vpop.eup %4624  ;;  %v2984_v53 = vadd.s32 8, %v6484_v44  ;;  %v2167_v38 = vand.u32 2147483648, %v6278_v51  ;;  %v2130_v60 = vadd.f32 %v6295_v18, %v2129_v39  ;;  %vm6556_vm13 = vmor %vm2131_vm9, %vm2132_vm10 }
 0x36c   : > { %v3070_v20 = vadd.s32 %v6530_v54, %v3037_v43  ;;  %v3071_v37 = vadd.s32 %v6530_v54, %v3038_v63  ;;  %v2135_v17 = vand.u32 2147483647, %v6237_v21  ;;  %vm2161_vm11 = vweird.f32 %v6278_v51  ;;  %v1767_v43 = vpop.f32.mrf.mxu0  ;;  %p4775_p2 = por %p4774_p1, %p4773_p0 }
 0x36d   : > { %vm2162_vm12 = vweird.f32 %v6374_v26  ;;  %v6544_v7 = vmul.f32 %v6436_v58, %v2248_v10  ;;  %v6547_v41 = vmul.f32 %v6452_v33, %v2278_v0  ;;  %v6549_v25 = vadd.f32 1.0, %v4623_v19 }
 0x36e   : > { %v3001_v63 = vadd.s32 %v6496_v45, %v2984_v53  ;;  %v6560_v31 = vpop.eup %4626  ;;  %v6562_v10 = vadd.f32 1.0, %v4625_v32  ;;  %v3102_v40 = vshrl.u32 %v3070_v20, 16  ;;  %v2160_v0 = vadd.f32 %v6374_v26, %v2159_v35  ;;  %vm6575_vm14 = vmor %vm2161_vm11, %vm2162_vm12  ;;  %p4776_p3 = pnand %p4775_p2, %p4771_p13 }
 0x36f   : > { %8455 = vst [vmem:[#allocation39_spill] sm:$0xff] %v6560_v31  ;;  %v2165_v19 = vand.u32 2147483647, %v6278_v51  ;;  %v6566_v30 = vpop.eup %4628  ;;  %v6569_v53 = vmul.f32 %v6464_v24, %v2308_v8  ;;  %v2338_v22 = vsub.f32 1.0, %v2337_v34  ;;  %v3103_v1 = vshrl.u32 %v3071_v37, 16 }
 0x370   : > { %8456 = vst [vmem:[#allocation40_spill] sm:$0xff] %v6566_v30  ;;  %v3020_v21 = vmul.u32 2654435761, %v3001_v63  ;;  %v2134_v35 = vsel %vm6556_vm13, %v6295_v18, %v2130_v60  ;;  %vm6582_vm15 = vcmp.eq.f32.partialorder %v2135_v17, 8.507059e+37  ;;  %v2138_v8 = vor.u32 1.1754944e-38, %v2137_v62 }
 0x371   : > { %8457 = vst [vmem:[#allocation41_spill] sm:$0xff] %v6569_v53  ;;  %v2168_v34 = vor.u32 1.1754944e-38, %v2167_v38  ;;  %4630 = vrcp.f32 %v6549_v25  ;;  %v1719_v63 = vadd.f32 %v1718_v56, %v6360_v52  ;;  %v3134_v53 = vxor.u32 %v3102_v40, %v3070_v20  ;;  %v1720_v38 = vpop.f32.mrf.mxu3 }
 0x372   : > { %v3039_v51 = vxor.u32 %v6510_v59, %v3020_v21  ;;  %v3040_v24 = vxor.u32 %v6512_v11, %v3020_v21  ;;  %4632 = vrcp.f32 %v6562_v10  ;;  %v2164_v18 = vsel %vm6575_vm14, %v6374_v26, %v2160_v0 }
 0x373   : > { %vm6594_vm0 = vcmp.eq.f32.partialorder %v2165_v19, 8.507059e+37  ;;  %v2367_v62 = vmul.f32 %v6560_v31, %v6492_v15  ;;  %v2397_v56 = vmul.f32 %v6566_v30, %v6500_v6  ;;  %v3135_v39 = vxor.u32 %v3103_v1, %v3071_v37 }
 0x374   : > { %v3072_v17 = vadd.s32 %v6530_v54, %v3039_v51  ;;  %v3073_v40 = vadd.s32 %v6530_v54, %v3040_v24  ;;  %v2985_v20 = vadd.s32 16, %v6484_v44  ;;  %vm2191_vm1 = vweird.f32 %v6291_v47  ;;  %v1769_v6 = vpop.f32.mrf.mxu0 }
 0x375   : > { %vm2192_vm2 = vweird.f32 %v6384_v14  ;;  %v6608_v26 = vmul.f32 %v6498_v3, %v2338_v22  ;;  %v1768_v0 = vadd.f32 %v1767_v43, %v1719_v63  ;;  %v2197_v21 = vand.u32 2147483648, %v6291_v47 }
 0x376   : > { %v3104_v19 = vshrl.u32 %v3072_v17, 16  ;;  %v3166_v32 = vmul.u32 2146121005, %v3134_v53  ;;  %v6613_v51 = vsel %vm6582_vm15, %v2138_v8, %v2134_v35  ;;  %v6617_v1 = vsel %vm6594_vm0, %v2168_v34, %v2164_v18  ;;  %vm6628_vm3 = vmor %vm2191_vm1, %vm2192_vm2 }
 0x377   : > { %8464 = vst [vmem:[#allocation42_spill] sm:$0xff] %v6608_v26  ;;  %v2190_v24 = vadd.f32 %v6384_v14, %v6505_v55  ;;  %v6621_v37 = vpop.eup %4630  ;;  %v2368_v22 = vsub.f32 1.0, %v2367_v62  ;;  %v3167_v43 = vmul.u32 2146121005, %v3135_v39  ;;  %v6624_v63 = vadd.s32 %v6496_v45, %v2985_v20 }
 0x378   : > { %8465 = vst [vmem:[#allocation43_spill] sm:$0xff] %v6617_v1  ;;  %v2195_v53 = vand.u32 2147483647, %v6291_v47  ;;  %v6633_v35 = vpop.eup %4632  ;;  %v2398_v8 = vsub.f32 1.0, %v2397_v56  ;;  %v3105_v55 = vshrl.u32 %v3073_v40, 16  ;;  %vm2221_vm4 = vweird.f32 %v6299_v12 }
 0x379   : > { %vm2222_vm5 = vweird.f32 %v6396_v48  ;;  %v4289_v34 = vmul.f32 -1.442695, %v1768_v0  ;;  %v1721_v18 = vadd.f32 %v1720_v38, %v6360_v52  ;;  %v3136_v60 = vxor.u32 %v3104_v19, %v3072_v17  ;;  %v1723_v26 = vpop.f32.mrf.mxu3 }
 0x37a   : > { %v2198_v62 = vor.u32 1.1754944e-38, %v2197_v21  ;;  %v1962_v39 = vmul.f32 %v6621_v37, %v6549_v25  ;;  %v3198_v20 = vshrl.u32 %v3166_v32, 15  ;;  %v2194_v47 = vsel %vm6628_vm3, %v6384_v14, %v2190_v24  ;;  %vm6650_vm7 = vmor %vm2221_vm4, %vm2222_vm5 }
 0x37b   : > { %v6645_v56 = vadd.f32 %v6396_v48, %v6508_v42  ;;  %v1992_v15 = vmul.f32 %v6633_v35, %v6562_v10  ;;  %v3199_v0 = vshrl.u32 %v3167_v43, 15  ;;  %vm2196_vm6 = vcmp.eq.f32.partialorder %v2195_v53, 8.507059e+37 }
 0x37c   : > { %v8469_v17 = vmov 0  ;;  %v6655_v19 = vmul.f32 %v6560_v31, %v2368_v22  ;;  %v3137_v21 = vxor.u32 %v3105_v55, %v3073_v40  ;;  %v2986_v14 = vadd.s32 24, %v6484_v44 }
 0x37d   : > { %8468 = vst [vmem:[#allocation44_spill] sm:$0xff] %v6645_v56  ;;  %v8470_v17 = vsel %vm6650_vm7, 4294967295, %v8469_v17  ;;  %v2227_v42 = vand.u32 2147483648, %v6299_v12  ;;  %v6660_v24 = vmul.f32 %v6566_v30, %v2398_v8  ;;  %4634 = vpow2.f32 %v4289_v34 }
 0x37e   : > { %8471 = vst [vmem:[#allocation45_spill] sm:$0xff] %v8470_v17  ;;  %v1770_v2 = vadd.f32 %v1769_v6, %v1721_v18  ;;  %v3168_v38 = vmul.u32 2146121005, %v3136_v60  ;;  %v1963_v53 = vsub.f32 1.0, %v1962_v39  ;;  %v3230_v3 = vxor.u32 %v3198_v20, %v3166_v32  ;;  %v1772_v39 = vpop.f32.mrf.mxu0 }
 0x37f   : > { %8472 = vst [vmem:[#allocation46_spill] sm:$0xff] %v6655_v19  ;;  %v6662_v1 = vsel %vm2196_vm6, %v2198_v62, %v2194_v47  ;;  %v1993_v22 = vsub.f32 1.0, %v1992_v15  ;;  %v3231_v55 = vxor.u32 %v3199_v0, %v3167_v43  ;;  %v6669_v31 = vadd.s32 %v6496_v45, %v2986_v14 }
 0x380   : > { %8473 = vst [vmem:[#allocation47_spill] sm:$0xff] %v6660_v24  ;;  %v8475_v8 = vmul.u32 2654435761, %v6624_v63  ;;  %v1724_v34 = vadd.f32 %v1723_v26, %v6360_v52  ;;  %v3169_v18 = vmul.u32 2146121005, %v3137_v21  ;;  %v6676_v60 = vor.u32 1.1754944e-38, %v2227_v42 }
 0x381   : > { %8474 = vst [vmem:[#allocation48_spill] sm:$0xff] %v6662_v1  ;;  %vm1966_vm8 = vweird.f32 %v6549_v25  ;;  %v4291_v62 = vmul.f32 -1.442695, %v1770_v2  ;;  %v3200_v15 = vshrl.u32 %v3168_v38, 15  ;;  %v8350_v43 = vmul.u32 2654435761, %v6669_v31 }
 0x382   : > { %v3041_v6 = vxor.u32 %v6510_v59, %v8475_v8  ;;  %8476 = vst [vmem:[#allocation49_spill] sm:$0xff] %v6676_v60  ;;  %v1964_v20 = vmul.f32 %v6621_v37, %v1963_v53  ;;  %v1970_v47 = vand.u32 2147483647, %v6549_v25  ;;  %v1972_v0 = vand.u32 2147483648, %v6549_v25 }
 0x383   : > { %v3262_v14 = vmul.u32 2221713035, %v3230_v3  ;;  %v4635_v26 = vpop.eup %4634  ;;  %v1994_v21 = vmul.f32 %v6633_v35, %v1993_v22  ;;  %v3263_v8 = vmul.u32 2221713035, %v3231_v55  ;;  %v3043_v42 = vxor.u32 %v6510_v59, %v8350_v43 }
 0x384   : > { %v3074_v2 = vadd.s32 %v6530_v54, %v3041_v6  ;;  %vm1967_vm9 = vweird.f32 %v6621_v37  ;;  %vm1996_vm10 = vweird.f32 %v6562_v10  ;;  %v1773_v53 = vadd.f32 %v1772_v39, %v1724_v34 }
 0x385   : > { %v3201_v40 = vshrl.u32 %v3169_v18, 15  ;;  %vm1997_vm11 = vweird.f32 %v6633_v35  ;;  %v2002_v3 = vand.u32 2147483648, %v6562_v10  ;;  %4636 = vpow2.f32 %v4291_v62  ;;  %vm6698_vm12 = vmor %vm1966_vm8, %vm1967_vm9 }
 0x386   : > { %v3232_v32 = vxor.u32 %v3200_v15, %v3168_v38  ;;  %v1965_v22 = vadd.f32 %v6621_v37, %v1964_v20  ;;  %v2000_v55 = vand.u32 2147483647, %v6562_v10  ;;  %v6694_v1 = vadd.f32 1.0, %v4635_v26  ;;  %vm6708_vm13 = vmor %vm1996_vm10, %vm1997_vm11 }
 0x387   : > { %v3294_v43 = vshrl.u32 %v3262_v14, 16  ;;  %v1995_v39 = vadd.f32 %v6633_v35, %v1994_v21  ;;  %v3295_v30 = vshrl.u32 %v3263_v8, 16  ;;  %v3076_v38 = vadd.s32 %v6530_v54, %v3043_v42  ;;  %v1725_v42 = vpop.f32.mrf.mxu3 }
 0x388   : > { %v3106_v62 = vshrl.u32 %v3074_v2, 16  ;;  %v4293_v25 = vmul.f32 -1.442695, %v1773_v53  ;;  %v3233_v20 = vxor.u32 %v3201_v40, %v3169_v18  ;;  %v2257_v26 = vand.u32 2147483648, %v6355_v49 }
 0x389   : > { %vm6714_vm14 = vcmp.eq.f32.partialorder %v1970_v47, 8.507059e+37  ;;  %v1973_v21 = vor.u32 1.1754944e-38, %v1972_v0  ;;  %v2003_v19 = vor.u32 1.1754944e-38, %v2002_v3  ;;  %v3264_v60 = vmul.u32 2221713035, %v3232_v32  ;;  %v1774_v3 = vpop.f32.mrf.mxu0 }
 0x38a   : > { %v1969_v10 = vsel %vm6698_vm12, %v6621_v37, %v1965_v22  ;;  %vm6722_vm15 = vcmp.eq.f32.partialorder %v2000_v55, 8.507059e+37  ;;  %v6726_v40 = vxor.u32 %v3294_v43, %v3262_v14  ;;  %v1999_v47 = vsel %vm6708_vm13, %v6633_v35, %v1995_v39 }
 0x38b   : > { %v4637_v18 = vpop.eup %4636  ;;  %v6731_v0 = vxor.u32 %v3295_v30, %v3263_v8  ;;  %v3108_v32 = vshrl.u32 %v3076_v38, 16  ;;  %v3138_v53 = vxor.u32 %v3106_v62, %v3074_v2  ;;  %v3265_v37 = vmul.u32 2221713035, %v3233_v20 }
 0x38c   : > { %v6702_v34 = vpop.xlane.xlu2 %2693  ;;  %v6735_v22 = vadd.f32 %v6436_v58, %v6544_v7  ;;  %v3296_v43 = vshrl.u32 %v3264_v60, 16  ;;  %v6739_v6 = vor.u32 1.1754944e-38, %v2257_v26  ;;  %v6743_v30 = vadd.f32 %v6452_v33, %v6547_v41 }
 0x38d   : > { %4638 = vrcp.f32 %v6702_v34  ;;  %v6747_v8 = vsel %vm6714_vm14, %v1973_v21, %v1969_v10  ;;  %v6751_v7 = vsel %vm6722_vm15, %v2003_v19, %v1999_v47  ;;  %v6753_v2 = vadd.f32 1.0, %v4637_v18 }
 0x38e   : > { %4640 = vrcp.f32 %v6694_v1  ;;  %8485 = vst [vmem:[#allocation50_spill] sm:$0xff] %v6735_v22  ;;  %v4317_v39 = vxor.u32 2147483648, %v6726_v40  ;;  %v4318_v41 = vxor.u32 2147483648, %v6731_v0  ;;  %v6760_v20 = vxor.u32 %v3108_v32, %v3076_v38 }
 0x38f   : > { %4642 = vpow2.f32 %v4293_v25  ;;  %8486 = vst [vmem:[#allocation51_spill] sm:$0xff] %v6739_v6  ;;  %v3170_v24 = vmul.u32 2146121005, %v3138_v53  ;;  %v3297_v21 = vshrl.u32 %v3265_v37, 16  ;;  %v2749_v40 = vand.u32 2147483647, %v6702_v34 }
 0x390   : > { %8487 = vst [vmem:[#allocation52_spill] sm:$0xff] %v6743_v30  ;;  %v1726_v18 = vadd.f32 %v1725_v42, %v6360_v52  ;;  %v3328_v47 = vxor.u32 %v3296_v43, %v3264_v60  ;;  %v2751_v38 = vand.u32 2147483648, %v6702_v34  ;;  %vm2745_vm1 = vweird.f32 %v6702_v34 }
 0x391   : > { %v3329_v60 = vxor.u32 %v3297_v21, %v3265_v37  ;;  %vm2750_vm3 = vcmp.eq.f32.partialorder %v2749_v40, 8.507059e+37  ;;  %v1777_v6 = vpop.f32.mrf.mxu0  ;;  %vm6790_vm4 = vcmp.ge.s32.totalorder %v4317_v39, 3006477107  ;;  %vm6798_vm5 = vcmp.ge.s32.totalorder %v4318_v41, 3006477107 }
 0x392   : > { %v4319_v55 = vxor.u32 2147483648, %v3328_v47  ;;  %vm2251_vm14 = vweird.f32 %v6355_v49  ;;  %vm2252_vm15 = vweird.f32 %v6436_v58 }
 0x393   : > { %v4639_v35 = vpop.eup %4638 }
 0x394   : > { %v2741_v62 = vmul.f32 %v4639_v35, %v6702_v34  ;;  %v2577_v15 = vpop.xlane.xlu2 %2576  ;;  %v6757_v25 = vpop.xlane.xlu0 %2696  ;;  %vm2746_vm0 = vweird.f32 %v4639_v35  ;;  %vm6811_vm9 = vcmp.ge.s32.totalorder %v4319_v55, 3006477107 }
 0x395   : > { %v6762_v26 = vpop.eup %4640  ;;  %v2614_v56 = vsub.f32 %v6103_v5, %v2577_v15  ;;  %v2615_v19 = vsub.f32 %v6095_v46, %v2577_v15  ;;  %4644 = vrcp.f32 %v6757_v25  ;;  %v1728_v5 = vpop.f32.mrf.mxu3  ;;  %v3172_v46 = vmul.u32 2146121005, %v6760_v20  ;;  %vm2747_vm2 = vmor %vm2745_vm1, %vm2746_vm0 }
 0x396   : > { %v2742_v10 = vsub.f32 1.0, %v2741_v62  ;;  %v4643_v14 = vpop.eup %4642  ;;  %4646 = vrcp.f32 %v6753_v2  ;;  %v3202_v15 = vshrl.u32 %v3170_v24, 15  ;;  %v6775_v62 = vmul.f32 %v6762_v26, %v6694_v1 }
 0x397   : > { %v2664_v0 = vmul.f32 1.442695, %v2614_v56  ;;  %v2666_v32 = vmul.f32 1.442695, %v2615_v19  ;;  %v6777_v43 = vadd.f32 1.0, %v4643_v14  ;;  %v1775_v56 = vadd.f32 %v1774_v3, %v1726_v18 }
 0x398   : > { %v2743_v53 = vmul.f32 %v4639_v35, %v2742_v10  ;;  %v2752_v10 = vor.u32 1.1754944e-38, %v2751_v38  ;;  %v1729_v20 = vadd.f32 %v1728_v5, %v6360_v52  ;;  %v3204_v37 = vshrl.u32 %v3172_v46, 15 }
 0x399   : > { %4648 = vpow2.f32 %v2664_v0  ;;  %v6783_v21 = vxor.u32 %v3202_v15, %v3170_v24  ;;  %v4295_v38 = vmul.f32 -1.442695, %v1775_v56  ;;  %v4320_v0 = vxor.u32 2147483648, %v3329_v60 }
 0x39a   : > { %v2744_v42 = vadd.f32 %v4639_v35, %v2743_v53  ;;  %4650 = vpow2.f32 %v2666_v32  ;;  %v2766_v32 = vand.u32 2147483648, %v6757_v25  ;;  %vm2760_vm8 = vweird.f32 %v6757_v25 }
 0x39b   : > { %v4645_v19 = vpop.eup %4644  ;;  %v3266_v56 = vmul.u32 2221713035, %v6783_v21  ;;  %vm6817_vm11 = vcmp.ge.s32.totalorder %v4320_v0, 3006477107 }
 0x39c   : > { %v2748_v34 = vsel %vm2747_vm2, %v4639_v35, %v2744_v42  ;;  %v2756_v48 = vmul.f32 %v4645_v19, %v6757_v25  ;;  %v2580_v17 = vpop.xlane.xlu2 %2579  ;;  %v6781_v30 = vpop.xlane.xlu0 %2699  ;;  %vm2761_vm6 = vweird.f32 %v4645_v19  ;;  %v6807_v42 = vxor.u32 %v3204_v37, %v3172_v46 }
 0x39d   : > { %v6785_v14 = vpop.eup %4646  ;;  %v2753_v3 = vsel %vm2750_vm3, %v2752_v10, %v2748_v34  ;;  %v2616_v18 = vsub.f32 %v6122_v16, %v2580_v17  ;;  %v2617_v40 = vsub.f32 %v6113_v9, %v2580_v17  ;;  %4652 = vrcp.f32 %v6781_v30  ;;  %vm2762_vm10 = vmor %vm2760_vm8, %vm2761_vm6 }
 0x39e   : > { %v2757_v35 = vsub.f32 1.0, %v2756_v48  ;;  %4654 = vrcp.f32 %v6777_v43  ;;  %v1778_v9 = vadd.f32 %v1777_v6, %v1729_v20  ;;  %v2754_v39 = vmul.f32 1.25, %v2753_v3 }
 0x39f   : > { %v6795_v24 = vpop.eup %4648  ;;  %v2668_v53 = vmul.f32 1.442695, %v2616_v18  ;;  %v2670_v5 = vmul.f32 1.442695, %v2617_v40  ;;  %v2764_v48 = vand.u32 2147483647, %v6757_v25  ;;  %vm2775_vm13 = vweird.f32 %v6781_v30 }
 0x3a0   : > { %8490 = vst [vmem:[#allocation53_spill] sm:$0xff] %v6795_v24  ;;  %v6802_v17 = vpop.eup %4650  ;;  %v2758_v15 = vmul.f32 %v4645_v19, %v2757_v35  ;;  %v2767_v20 = vor.u32 1.1754944e-38, %v2766_v32  ;;  %v4297_v46 = vmul.f32 -1.442695, %v1778_v9  ;;  %v3454_v25 = vmul.f32 %v2754_v39, %v6344_v13 }
 0x3a1   : > { %8493 = vst [vmem:[#allocation54_spill] sm:$0xff] %v6802_v17  ;;  %4656 = vpow2.f32 %v2668_v53  ;;  %v2719_v60 = vadd.f32 %v6802_v17, %v6795_v24  ;;  %vm2765_vm12 = vcmp.eq.f32.partialorder %v2764_v48, 8.507059e+37  ;;  %v3268_v35 = vmul.u32 2221713035, %v6807_v42 }
 0x3a2   : > { %v2759_v41 = vadd.f32 %v4645_v19, %v2758_v15  ;;  %4658 = vpow2.f32 %v2670_v5  ;;  %v3455_v0 = vmul.f32 %v2754_v39, %v6747_v8  ;;  %v2779_v5 = vand.u32 2147483647, %v6781_v30 }
 0x3a3   : > { %v6815_v10 = vpop.eup %4652  ;;  %2720 = vadd.xlane.f32.xlu1 %v2719_v60  ;;  %4660 = vpow2.f32 %v4295_v38  ;;  %v3298_v38 = vshrl.u32 %v3266_v56, 16  ;;  %v3486_v48 = vsel %vm6790_vm4, %v3454_v25, 0.0 }
 0x3a4   : > { %v6821_v37 = vpop.eup %4654  ;;  %v2763_v21 = vsel %vm2762_vm10, %v4645_v19, %v2759_v41  ;;  %v2771_v55 = vmul.f32 %v6815_v10, %v6781_v30  ;;  %v6826_v3 = vpop.xlane.xlu1 %2702  ;;  %vm2776_vm0 = vweird.f32 %v6815_v10  ;;  %vm2780_vm2 = vcmp.eq.f32.partialorder %v2779_v5, 8.507059e+37 }
 0x3a5   : > { %v2583_v18 = vpop.xlane.xlu0 %2582  ;;  %v2768_v40 = vsel %vm2765_vm12, %v2767_v20, %v2763_v21  ;;  %4662 = vrcp.f32 %v6826_v3  ;;  %v2781_v21 = vand.u32 2147483648, %v6781_v30  ;;  %vm6865_vm1 = vmor %vm2775_vm13, %vm2776_vm0  ;;  %vm2790_vm4 = vweird.f32 %v6826_v3 }
 0x3a6   : > { %v2769_v32 = vmul.f32 1.25, %v2768_v40  ;;  %v2772_v53 = vsub.f32 1.0, %v2771_v55  ;;  %v2618_v13 = vsub.f32 %v6142_v23, %v2583_v18  ;;  %v2619_v9 = vsub.f32 %v6133_v28, %v2583_v18  ;;  %v1730_v40 = vpop.f32.mrf.mxu3 }
 0x3a7   : > { %v6832_v19 = vpop.eup %4656  ;;  %4664 = vpow2.f32 %v4297_v46  ;;  %vm2026_vm10 = vweird.f32 %v6694_v1 }
 0x3a8   : > { %8498 = vst [vmem:[#allocation55_spill] sm:$0xff] %v6832_v19  ;;  %v6839_v15 = vpop.eup %4658  ;;  %v3456_v8 = vmul.f32 %v2769_v32, %v6432_v36  ;;  %v3457_v39 = vmul.f32 %v2769_v32, %v6751_v7  ;;  %v2773_v23 = vmul.f32 %v6815_v10, %v2772_v53  ;;  %v2672_v28 = vmul.f32 1.442695, %v2618_v13  ;;  %v8502_v13 = vld [vmem:[#allocation8_spill] sm:$0xff] }
 0x3a9   : > { %8499 = vst [vmem:[#allocation56_spill] sm:$0xff] %v6839_v15  ;;  %v4661_v60 = vpop.eup %4660  ;;  %v2674_v41 = vmul.f32 1.442695, %v2619_v9  ;;  %v2722_v20 = vadd.f32 %v6839_v15, %v6832_v19  ;;  %v3487_v7 = vsel %vm6798_vm5, %v3455_v0, 0.0  ;;  %v6874_v32 = vxor.u32 %v3298_v38, %v3266_v56  ;;  %vm6904_vm5 = vmor %vm2251_vm14, %vm2252_vm15 }
 0x3aa   : > { %v2774_v46 = vadd.f32 %v6815_v10, %v2773_v23  ;;  %v3488_v36 = vsel %vm6811_vm9, %v3456_v8, 0.0  ;;  %v3489_v47 = vsel %vm6817_vm11, %v3457_v39, 0.0  ;;  %4666 = vpow2.f32 %v2672_v28 }
 0x3ab   : > { %v6856_v25 = vpop.eup %4662  ;;  %2723 = vadd.xlane.f32.xlu2 %v2722_v20  ;;  %v3520_v55 = vmul.f32 %v6100_v61, %v3488_v36  ;;  %v3521_v18 = vmul.f32 %v6105_v27, %v3489_v47  ;;  %4668 = vpow2.f32 %v2674_v41  ;;  %v3518_v61 = vmul.f32 %v6089_v4, %v3486_v48 }
 0x3ac   : > { %v2786_v6 = vmul.f32 %v6856_v25, %v6826_v3  ;;  %v6871_v34 = vpop.xlane.xlu1 %2705  ;;  %v2778_v30 = vsel %vm6865_vm1, %v6815_v10, %v2774_v46  ;;  %v6879_v53 = vadd.f32 1.0, %v4661_v60  ;;  %v3519_v9 = vmul.f32 %v8502_v13, %v3487_v7  ;;  %v8510_v13 = vld [vmem:[#allocation15_spill] sm:$0xff] }
 0x3ad   : > { %v2586_v0 = vpop.xlane.xlu0 %2585  ;;  %v4665_v27 = vpop.eup %4664  ;;  %v3300_v8 = vshrl.u32 %v3268_v35, 16  ;;  %v3550_v4 = vpack.c.bf16 %v3520_v55, %v3518_v61  ;;  %v2782_v56 = vor.u32 1.1754944e-38, %v2781_v21  ;;  %v1731_v48 = vadd.f32 %v1730_v40, %v6360_v52 }
 0x3ae   : > { %v2787_v39 = vsub.f32 1.0, %v2786_v6  ;;  %v2620_v23 = vsub.f32 %v6164_v57, %v2586_v0  ;;  %v2621_v28 = vsub.f32 %v6153_v50, %v2586_v0  ;;  %v3551_v38 = vpack.c.bf16 %v3521_v18, %v3519_v9  ;;  %v1779_v18 = vpop.f32.mrf.mxu0 }
 0x3af   : > { %vm2791_vm3 = vweird.f32 %v6856_v25  ;;  %3574 = vmatmul.bf16.vlgmr.msra.gmra.mxu3 %v3550_v4  ;;  %v2796_v46 = vand.u32 2147483648, %v6826_v3  ;;  %4670 = vrcp.f32 %v6871_v34  ;;  %v6893_v50 = vadd.f32 1.0, %v4665_v27  ;;  %v8509_v27 = vld [vmem:[#allocation17_spill] sm:$0xff] }
 0x3b0   : > { %v2788_v10 = vmul.f32 %v6856_v25, %v2787_v39  ;;  %v2676_v60 = vmul.f32 1.442695, %v2620_v23  ;;  %v2678_v41 = vmul.f32 1.442695, %v2621_v28  ;;  %v6889_v20 = vpop.eup %4666  ;;  %3623 = vmatmul.bf16.vlgmr.msra.gmra.mxu0 %v3551_v38  ;;  %v2783_v57 = vsel %vm2780_vm2, %v2782_v56, %v2778_v30  ;;  %vm6911_vm6 = vmor %vm2790_vm4, %vm2791_vm3 }
 0x3b1   : > { %8503 = vst [vmem:[#allocation8_spill] sm:$0xff] %v6889_v20  ;;  %v6895_v5 = vpop.eup %4668  ;;  %v2794_v7 = vand.u32 2147483647, %v6826_v3  ;;  %v2023_v21 = vsub.f32 1.0, %v6775_v62  ;;  %v3332_v40 = vxor.u32 %v3300_v8, %v3268_v35  ;;  %v6923_v6 = vmul.f32 1.25, %v2783_v57 }
 0x3b2   : > { %8504 = vst [vmem:[#allocation57_spill] sm:$0xff] %v6895_v5  ;;  %v2789_v36 = vadd.f32 %v6856_v25, %v2788_v10  ;;  %4672 = vpow2.f32 %v2676_v60  ;;  %v2725_v3 = vadd.f32 %v6895_v5, %v6889_v20  ;;  %v4321_v0 = vxor.u32 2147483648, %v6874_v32 }
 0x3b3   : > { %4674 = vpow2.f32 %v2678_v41  ;;  %v2797_v61 = vor.u32 1.1754944e-38, %v2796_v46  ;;  %vm2795_vm8 = vcmp.eq.f32.partialorder %v2794_v7, 8.507059e+37  ;;  %v1780_v9 = vadd.f32 %v1779_v18, %v1731_v48  ;;  %v8514_v41 = vld [vmem:[#allocation31_spill] sm:$0xff] }
 0x3b4   : > { %v2793_v16 = vsel %vm6911_vm6, %v6856_v25, %v2789_v36  ;;  %4676 = vrcp.f32 %v6879_v53  ;;  %v2589_v62 = vpop.xlane.xlu1 %2588  ;;  %2726 = vadd.xlane.f32.xlu0 %v2725_v3  ;;  %v6929_v35 = vpop.xlane.xlu2 %2708  ;;  %v4323_v28 = vxor.u32 2147483648, %v3332_v40  ;;  %v8511_v4 = vand.u32 2147483648, %v6378_v29 }
 0x3b5   : > { %4678 = vrcp.f32 %v6893_v50  ;;  %v2622_v30 = vsub.f32 %v8509_v27, %v2589_v62  ;;  %v2623_v42 = vsub.f32 %v8510_v13, %v2589_v62  ;;  %v6936_v32 = vpop.eup %4670  ;;  %v2798_v23 = vsel %vm2795_vm8, %v2797_v61, %v2793_v16  ;;  %v8520_v62 = vld [vmem:[#allocation32_spill] sm:$0xff] }
 0x3b6   : > { %v6940_v56 = vor.u32 1.1754944e-38, %v8511_v4  ;;  %v2024_v48 = vmul.f32 %v6762_v26, %v2023_v21  ;;  %v6947_v10 = vmul.f32 %v6785_v14, %v6753_v2  ;;  %v3458_v46 = vmul.f32 %v6923_v6, %v8514_v41  ;;  %v8523_v4 = vld [vmem:[#allocation19_spill] sm:$0xff] }
 0x3b7   : > { %v2680_v39 = vmul.f32 1.442695, %v2622_v30  ;;  %v2682_v60 = vmul.f32 1.442695, %v2623_v42  ;;  %v2082_v36 = vmul.f32 %v6821_v37, %v6777_v43  ;;  %v6955_v7 = vmul.f32 1.25, %v2798_v23 }
 0x3b8   : > { %8512 = vst [vmem:[#allocation17_spill] sm:$0xff] %v6940_v56  ;;  %v6942_v38 = vpop.eup %4672  ;;  %vm6957_vm9 = vcmp.ge.s32.totalorder %v4321_v0, 3006477107  ;;  %4680 = vrcp.f32 %v6929_v35  ;;  %v4299_v3 = vmul.f32 -1.442695, %v1780_v9  ;;  %vm2027_vm11 = vweird.f32 %v6762_v26 }
 0x3b9   : > { %8513 = vst [vmem:[#allocation15_spill] sm:$0xff] %v6942_v38  ;;  %v6951_v57 = vpop.eup %4674  ;;  %4682 = vpow2.f32 %v2680_v39  ;;  %vm6970_vm12 = vcmp.ge.s32.totalorder %v4323_v28, 3006477107  ;;  %v3460_v0 = vmul.f32 %v6955_v7, %v8520_v62  ;;  %v8521_v61 = vmul.u32 2654435761, %v6624_v63  ;;  %v8522_v63 = vld [vmem:[#allocation21_spill] sm:$0xff]  ;;  %vm6996_vm13 = vmor %vm2026_vm10, %vm2027_vm11  ;;  %v1733_v62 = vpop.f32.mrf.mxu3 }
 0x3ba   : > { %8515 = vst [vmem:[#allocation31_spill] sm:$0xff] %v6951_v57  ;;  %v6962_v21 = vpop.eup %4676  ;;  %v2728_v18 = vadd.f32 %v6951_v57, %v6942_v38  ;;  %v2801_v30 = vmul.f32 %v6936_v32, %v6871_v34  ;;  %4684 = vpow2.f32 %v2682_v60  ;;  %v3490_v42 = vsel %vm6957_vm9, %v3458_v46, 0.0 }
 0x3bb   : > { %v6968_v40 = vpop.eup %4678  ;;  %v3042_v27 = vxor.u32 %v6512_v11, %v8521_v61  ;;  %v6984_v9 = vadd.f32 %v6762_v26, %v2024_v48  ;;  %v2083_v39 = vsub.f32 1.0, %v2082_v36  ;;  %v6988_v23 = vmul.f32 %v6962_v21, %v6879_v53  ;;  %v8526_v61 = vld [vmem:[#allocation9_spill] sm:$0xff] }
 0x3bc   : > { %2729 = vadd.xlane.f32.xlu1 %v2728_v18  ;;  %v2592_v13 = vpop.xlane.xlu1 %2591  ;;  %v2053_v48 = vsub.f32 1.0, %v6947_v10  ;;  %v2142_v46 = vmul.f32 %v6968_v40, %v6893_v50  ;;  %4686 = vpow2.f32 %v4299_v3  ;;  %v3492_v36 = vsel %vm6970_vm12, %v3460_v0, 0.0  ;;  %v7010_v10 = vpop.xlane.xlu2 %2711 }
 0x3bd   : > { %v2624_v28 = vsub.f32 %v8522_v63, %v2592_v13  ;;  %v2625_v41 = vsub.f32 %v8523_v4, %v2592_v13  ;;  %v3522_v13 = vmul.f32 %v8526_v61, %v3490_v42  ;;  %v8527_v63 = vld [vmem:[#allocation11_spill] sm:$0xff]  ;;  %v2802_v8 = vsub.f32 1.0, %v2801_v30 }
 0x3be   : > { %v3524_v4 = vmul.f32 %v8527_v63, %v3492_v36  ;;  %v7007_v25 = vpop.eup %4680  ;;  %v2811_v57 = vand.u32 2147483648, %v6871_v34  ;;  %v2029_v3 = vsel %vm6996_vm13, %v6762_v26, %v6984_v9  ;;  %v2030_v16 = vand.u32 2147483647, %v6694_v1 }
 0x3bf   : > { %v2684_v55 = vmul.f32 1.442695, %v2624_v28  ;;  %v2686_v18 = vmul.f32 1.442695, %v2625_v41  ;;  %v7017_v0 = vpop.eup %4682  ;;  %v7020_v42 = vmul.f32 %v6821_v37, %v2083_v39  ;;  %v2143_v36 = vsub.f32 1.0, %v2142_v46 }
 0x3c0   : > { %8528 = vst [vmem:[#allocation32_spill] sm:$0xff] %v7017_v0  ;;  %v3552_v30 = vpack.c.bf16 %v3524_v4, %v3522_v13  ;;  %v7023_v41 = vpop.eup %4684  ;;  %v7026_v61 = vadd.f32 %v1733_v62, %v6360_v52  ;;  %v2032_v26 = vand.u32 2147483648, %v6694_v1  ;;  %vm2805_vm14 = vweird.f32 %v6871_v34 }
 0x3c1   : > { %4688 = vpow2.f32 %v2684_v55  ;;  %8529 = vst [vmem:[#allocation21_spill] sm:$0xff] %v7023_v41  ;;  %v8530_v9 = vmul.u32 2654435761, %v6669_v31  ;;  %v3075_v60 = vadd.s32 %v6530_v54, %v3042_v27  ;;  %v2803_v46 = vmul.f32 %v6936_v32, %v2802_v8 }
 0x3c2   : > { %4690 = vpow2.f32 %v2686_v18  ;;  %3579 = vmatmul.bf16.gmra.mxu3 %v3552_v30  ;;  %v4687_v55 = vpop.eup %4686  ;;  %v2809_v18 = vand.u32 2147483647, %v6871_v34  ;;  %v7037_v62 = vor.u32 1.1754944e-38, %v2811_v57  ;;  %v2816_v1 = vmul.f32 %v7007_v25, %v6929_v35 }
 0x3c3   : > { %4692 = vrcp.f32 %v7010_v10  ;;  %v3044_v39 = vxor.u32 %v6512_v11, %v8530_v9  ;;  %vm7041_vm15 = vcmp.eq.f32.partialorder %v2030_v16, 8.507059e+37  ;;  %v3107_v63 = vshrl.u32 %v3075_v60, 16 }
 0x3c4   : > { %v2731_v27 = vadd.f32 %v7023_v41, %v7017_v0  ;;  %v7048_v4 = vpop.xlane.xlu0 %2714  ;;  %vm2806_vm0 = vweird.f32 %v6936_v32  ;;  %v7052_v8 = vmul.f32 %v6968_v40, %v2143_v36  ;;  %v2826_v57 = vand.u32 2147483648, %v6929_v35 }
 0x3c5   : > { %v3077_v31 = vadd.s32 %v6530_v54, %v3044_v39  ;;  %v2033_v30 = vor.u32 1.1754944e-38, %v2032_v26  ;;  %v7057_v9 = vadd.f32 1.0, %v4687_v55  ;;  %v2054_v39 = vmul.f32 %v6785_v14, %v2053_v48  ;;  %vm7082_vm4 = vmor %vm2805_vm14, %vm2806_vm0 }
 0x3c6   : > { %v3139_v38 = vxor.u32 %v3107_v63, %v3075_v60  ;;  %2732 = vadd.xlane.f32.xlu2 %v2731_v27  ;;  %v7063_v0 = vadd.f32 %v6936_v32, %v2803_v46  ;;  %v2817_v5 = vsub.f32 1.0, %v2816_v1  ;;  %v2824_v36 = vand.u32 2147483647, %v6929_v35 }
 0x3c7   : > { %v7055_v16 = vpop.eup %4688  ;;  %v3109_v28 = vshrl.u32 %v3077_v31, 16  ;;  %4694 = vrcp.f32 %v7048_v4  ;;  %vm2056_vm1 = vweird.f32 %v6753_v2  ;;  %vm2057_vm2 = vweird.f32 %v6785_v14 }
 0x3c8   : > { %8533 = vst [vmem:[#allocation19_spill] sm:$0xff] %v7055_v16  ;;  %v7060_v41 = vpop.eup %4690  ;;  %v3171_v55 = vmul.u32 2146121005, %v3139_v38  ;;  %vm2820_vm3 = vweird.f32 %v6929_v35  ;;  %v7072_v60 = vor.u32 1.1754944e-38, %v2826_v57  ;;  %v2060_v46 = vand.u32 2147483647, %v6753_v2  ;;  %v1782_v57 = vpop.f32.mrf.mxu0  ;;  %vm7098_vm6 = vmor %vm2056_vm1, %vm2057_vm2 }
 0x3c9   : > { %8534 = vst [vmem:[#allocation9_spill] sm:$0xff] %v7060_v41  ;;  %v7067_v26 = vpop.eup %4692  ;;  %v3141_v48 = vxor.u32 %v3109_v28, %v3077_v31  ;;  %v2062_v1 = vand.u32 2147483648, %v6753_v2  ;;  %v2734_v63 = vadd.f32 %v7060_v41, %v7055_v16  ;;  %4696 = vrcp.f32 %v7057_v9 }
 0x3ca   : > { %v2055_v38 = vadd.f32 %v6785_v14, %v2054_v39  ;;  %v3203_v31 = vshrl.u32 %v3171_v55, 15  ;;  %v2818_v15 = vmul.f32 %v7007_v25, %v2817_v5  ;;  %v2831_v41 = vmul.f32 %v7067_v26, %v7010_v10  ;;  %v2595_v39 = vpop.xlane.xlu2 %2594 }
 0x3cb   : > { %v3173_v28 = vmul.u32 2146121005, %v3141_v48  ;;  %v2841_v16 = vand.u32 2147483648, %v7010_v10  ;;  %v2034_v34 = vsel %vm7041_vm15, %v2033_v30, %v2029_v3  ;;  %2735 = vadd.xlane.f32.xlu0 %v2734_v63  ;;  %v2808_v5 = vsel %vm7082_vm4, %v6936_v32, %v7063_v0  ;;  %v8551_v32 = vld [vmem:[#allocation10_spill] sm:$0xff] }
 0x3cc   : > { %vm2821_vm8 = vweird.f32 %v7007_v25  ;;  %v3235_v13 = vxor.u32 %v3203_v31, %v3171_v55  ;;  %vm7109_vm9 = vcmp.eq.f32.partialorder %v2809_v18, 8.507059e+37  ;;  %vm7114_vm10 = vcmp.eq.f32.partialorder %v2060_v46, 8.507059e+37  ;;  %v8545_v31 = vld [vmem:[#allocation25_spill] sm:$0xff] }
 0x3cd   : > { %v3205_v48 = vshrl.u32 %v3173_v28, 15  ;;  %v7107_v3 = vpop.eup %4694  ;;  %v2063_v63 = vor.u32 1.1754944e-38, %v2062_v1  ;;  %v1783_v27 = vadd.f32 %v1782_v57, %v7026_v61  ;;  %vm7119_vm11 = vcmp.eq.f32.partialorder %v2824_v36, 8.507059e+37  ;;  %v8546_v1 = vld [vmem:[#allocation23_spill] sm:$0xff]  ;;  %vm7144_vm12 = vmor %vm2820_vm3, %vm2821_vm8 }
 0x3ce   : > { %v2059_v0 = vsel %vm7098_vm6, %v6785_v14, %v2055_v38  ;;  %v3267_v55 = vmul.u32 2221713035, %v3235_v13  ;;  %v2626_v17 = vsub.f32 %v8545_v31, %v2595_v39  ;;  %v2819_v46 = vadd.f32 %v7007_v25, %v2818_v15  ;;  %v8557_v31 = vld [vmem:[#allocation37_spill] sm:$0xff] }
 0x3cf   : > { %v3237_v18 = vxor.u32 %v3205_v48, %v3173_v28  ;;  %v2832_v2 = vsub.f32 1.0, %v2831_v41  ;;  %v7128_v24 = vor.u32 1.1754944e-38, %v2841_v16  ;;  %v2627_v56 = vsub.f32 %v8546_v1, %v2595_v39  ;;  %v7131_v61 = vpop.eup %4696 }
 0x3d0   : > { %v3299_v57 = vshrl.u32 %v3267_v55, 16  ;;  %v2846_v22 = vmul.f32 %v7107_v3, %v7048_v4  ;;  %v2987_v14 = vadd.s32 32, %v6484_v44  ;;  %v2064_v20 = vsel %vm7114_vm10, %v2063_v63, %v2059_v0 }
 0x3d1   : > { %v3269_v36 = vmul.u32 2221713035, %v3237_v18  ;;  %v3459_v38 = vmul.f32 %v6923_v6, %v2034_v34  ;;  %v4301_v15 = vmul.f32 -1.442695, %v1783_v27  ;;  %v2988_v41 = vadd.s32 40, %v6484_v44 }
 0x3d2   : > { %v3331_v39 = vxor.u32 %v3299_v57, %v3267_v55  ;;  %v2688_v48 = vmul.f32 1.442695, %v2626_v17  ;;  %v3004_v13 = vadd.s32 %v6496_v45, %v2987_v14  ;;  %v2823_v19 = vsel %vm7144_vm12, %v7007_v25, %v2819_v46  ;;  %v8552_v14 = vld [vmem:[#allocation12_spill] sm:$0xff] }
 0x3d3   : > { %v3301_v28 = vshrl.u32 %v3269_v36, 16  ;;  %v2833_v6 = vmul.f32 %v7067_v26, %v2832_v2  ;;  %vm2835_vm13 = vweird.f32 %v7010_v10  ;;  %v2690_v34 = vmul.f32 1.442695, %v2627_v56 }
 0x3d4   : > { %v3005_v35 = vadd.s32 %v6496_v45, %v2988_v41  ;;  %v4322_v27 = vxor.u32 2147483648, %v3331_v39  ;;  %v2847_v0 = vsub.f32 1.0, %v2846_v22  ;;  %v3023_v18 = vmul.u32 2654435761, %v3004_v13 }
 0x3d5   : > { %v3333_v63 = vxor.u32 %v3301_v28, %v3269_v36  ;;  %vm2836_vm14 = vweird.f32 %v7067_v26  ;;  %v3461_v17 = vmul.f32 %v6955_v7, %v2064_v20  ;;  %4698 = vpow2.f32 %v4301_v15 }
 0x3d6   : > { %v3024_v55 = vmul.u32 2654435761, %v3005_v35  ;;  %vm7157_vm15 = vcmp.ge.s32.totalorder %v4322_v27, 3006477107  ;;  %4700 = vpow2.f32 %v2688_v48  ;;  %vm2850_vm0 = vweird.f32 %v7048_v4  ;;  %vm7195_vm4 = vmor %vm2835_vm13, %vm2836_vm14 }
 0x3d7   : > { %v4324_v25 = vxor.u32 2147483648, %v3333_v63  ;;  %v2813_v56 = vsel %vm7109_vm9, %v7037_v62, %v2808_v5  ;;  %v3491_v22 = vsel %vm7157_vm15, %v3459_v38, 0.0  ;;  %v2828_v7 = vsel %vm7119_vm11, %v7072_v60, %v2823_v19 }
 0x3d8   : > { %v3045_v2 = vxor.u32 %v6510_v59, %v3023_v18  ;;  %v3047_v46 = vxor.u32 %v6510_v59, %v3024_v55  ;;  %v7173_v1 = vadd.f32 %v7067_v26, %v2833_v6  ;;  %4702 = vpow2.f32 %v2690_v34 }
 0x3d9   : > { %vm3381_vm1 = vcmp.ge.s32.totalorder %v4324_v25, 3006477107  ;;  %v2848_v36 = vmul.f32 %v7107_v3, %v2847_v0  ;;  %v2856_v62 = vand.u32 2147483648, %v7048_v4  ;;  %v3523_v60 = vmul.f32 %v8551_v32, %v3491_v22 }
 0x3da   : > { %v3493_v30 = vsel %vm3381_vm1, %v3461_v17, 0.0  ;;  %v3078_v5 = vadd.s32 %v6530_v54, %v3045_v2  ;;  %v3080_v57 = vadd.s32 %v6530_v54, %v3047_v46  ;;  %v7181_v38 = vmul.f32 1.25, %v2813_v56 }
 0x3db   : > { %v3525_v20 = vmul.f32 %v8552_v14, %v3493_v30  ;;  %v7183_v15 = vmul.f32 1.25, %v2828_v7  ;;  %v7185_v41 = vpop.eup %4698  ;;  %vm2086_vm2 = vweird.f32 %v6777_v43  ;;  %vm2087_vm3 = vweird.f32 %v6821_v37  ;;  %v7331_v7 = vpop.f32.mrf.mxu3 }
 0x3dc   : > { %v3110_v16 = vshrl.u32 %v3078_v5, 16  ;;  %v3112_v28 = vshrl.u32 %v3080_v57, 16  ;;  %v7189_v39 = vpop.eup %4700  ;;  %v7200_v19 = vadd.f32 %v7107_v3, %v2848_v36  ;;  %vm2851_vm6 = vweird.f32 %v7107_v3  ;;  %vm7224_vm8 = vmor %vm2086_vm2, %vm2087_vm3  ;;  %v8562_v36 = vld [vmem:[#allocation38_spill] sm:$0xff] }
 0x3dd   : > { %8553 = vst [vmem:[#allocation11_spill] sm:$0xff] %v7189_v39  ;;  %v3553_v13 = vpack.c.bf16 %v3525_v20, %v3523_v60  ;;  %v2854_v6 = vand.u32 2147483647, %v7048_v4  ;;  %v7210_v27 = vadd.f32 %v6821_v37, %v7020_v42  ;;  %v7214_v17 = vor.u32 1.1754944e-38, %v2856_v62  ;;  %vm7232_vm9 = vmor %vm2850_vm0, %vm2851_vm6 }
 0x3de   : > { %v3142_v35 = vxor.u32 %v3110_v16, %v3078_v5  ;;  %v3144_v63 = vxor.u32 %v3112_v28, %v3080_v57  ;;  %v7212_v0 = vpop.eup %4702  ;;  %v7218_v25 = vmul.f32 %v7181_v38, %v8557_v31  ;;  %v3046_v42 = vxor.u32 %v6512_v11, %v3023_v18 }
 0x3df   : > { %8556 = vst [vmem:[#allocation25_spill] sm:$0xff] %v7212_v0  ;;  %3628 = vmatmul.bf16.gmra.mxu0 %v3553_v13  ;;  %v3048_v22 = vxor.u32 %v6512_v11, %v3024_v55  ;;  %v7238_v30 = vmul.f32 %v7183_v15, %v8562_v36  ;;  %v2090_v62 = vand.u32 2147483647, %v6777_v43  ;;  %v8563_v55 = vsub.f32 1.0, %v6988_v23 }
 0x3e0   : > { %v3174_v2 = vmul.u32 2146121005, %v3142_v35  ;;  %v3176_v46 = vmul.u32 2146121005, %v3144_v63  ;;  %v3079_v5 = vadd.s32 %v6530_v54, %v3046_v42  ;;  %v2089_v14 = vsel %vm7224_vm8, %v6821_v37, %v7210_v27 }
 0x3e1   : > { %v2114_v4 = vmul.f32 %v6962_v21, %v8563_v55  ;;  %v3081_v57 = vadd.s32 %v6530_v54, %v3048_v22  ;;  %v2737_v20 = vadd.f32 %v7212_v0, %v7189_v39  ;;  %vm2116_vm10 = vweird.f32 %v6879_v53 }
 0x3e2   : > { %v3206_v32 = vshrl.u32 %v3174_v2, 15  ;;  %v3208_v60 = vshrl.u32 %v3176_v46, 15  ;;  %vm2117_vm11 = vweird.f32 %v6962_v21  ;;  %v3111_v23 = vshrl.u32 %v3079_v5, 16 }
 0x3e3   : > { %v3113_v16 = vshrl.u32 %v3081_v57, 16  ;;  %v8564_v28 = vand.u32 2147483647, %v7010_v10  ;;  %vm7264_vm13 = vcmp.eq.f32.partialorder %v2090_v62, 8.507059e+37  ;;  %v2092_v37 = vand.u32 2147483648, %v6777_v43  ;;  %2738 = vadd.xlane.f32.xlu1 %v2737_v20  ;;  %vm7275_vm14 = vmor %vm2116_vm10, %vm2117_vm11 }
 0x3e4   : > { %v3238_v35 = vxor.u32 %v3206_v32, %v3174_v2  ;;  %v3240_v63 = vxor.u32 %v3208_v60, %v3176_v46  ;;  %v2115_v27 = vadd.f32 %v6962_v21, %v2114_v4  ;;  %v3143_v56 = vxor.u32 %v3111_v23, %v3079_v5 }
 0x3e5   : > { %vm7260_vm12 = vcmp.eq.f32.partialorder %v8564_v28, 8.507059e+37  ;;  %v3145_v42 = vxor.u32 %v3113_v16, %v3081_v57  ;;  %v2989_v22 = vadd.s32 48, %v6484_v44  ;;  %v2122_v46 = vand.u32 2147483648, %v6879_v53 }
 0x3e6   : > { %v3270_v10 = vmul.u32 2221713035, %v3238_v35  ;;  %v3272_v36 = vmul.u32 2221713035, %v3240_v63  ;;  %v2990_v43 = vadd.s32 56, %v6484_v44  ;;  %vm7283_vm15 = vcmp.eq.f32.partialorder %v2854_v6, 8.507059e+37 }
 0x3e7   : > { %v2120_v62 = vand.u32 2147483647, %v6879_v53  ;;  %v3175_v55 = vmul.u32 2146121005, %v3143_v56  ;;  %v3177_v4 = vmul.u32 2146121005, %v3145_v42  ;;  %v3006_v5 = vadd.s32 %v6496_v45, %v2989_v22 }
 0x3e8   : > { %v3302_v32 = vshrl.u32 %v3270_v10, 16  ;;  %v3304_v60 = vshrl.u32 %v3272_v36, 16  ;;  %v2093_v20 = vor.u32 1.1754944e-38, %v2092_v37  ;;  %v7288_v23 = vadd.s32 %v6496_v45, %v2990_v43 }
 0x3e9   : > { %v2119_v16 = vsel %vm7275_vm14, %v6962_v21, %v2115_v27  ;;  %v3207_v28 = vshrl.u32 %v3175_v55, 15  ;;  %v3209_v53 = vshrl.u32 %v3177_v4, 15  ;;  %v3025_v35 = vmul.u32 2654435761, %v3006_v5 }
 0x3ea   : > { %v3334_v63 = vxor.u32 %v3302_v32, %v3270_v10  ;;  %v3336_v56 = vxor.u32 %v3304_v60, %v3272_v36  ;;  %v2123_v42 = vor.u32 1.1754944e-38, %v2122_v46  ;;  %v3026_v6 = vmul.u32 2654435761, %v7288_v23 }
 0x3eb   : > { %vm2121_vm0 = vcmp.eq.f32.partialorder %v2120_v62, 8.507059e+37  ;;  %v3239_v22 = vxor.u32 %v3207_v28, %v3175_v55  ;;  %v3241_v18 = vxor.u32 %v3209_v53, %v3177_v4  ;;  %v3049_v37 = vxor.u32 %v6510_v59, %v3025_v35  ;;  %v8574_v4 = vld [vmem:[#allocation13_spill] sm:$0xff] }
 0x3ec   : > { %v4325_v34 = vxor.u32 2147483648, %v3334_v63  ;;  %v4327_v43 = vxor.u32 2147483648, %v3336_v56  ;;  %v2094_v0 = vsel %vm7264_vm13, %v2093_v20, %v2089_v14  ;;  %v3051_v21 = vxor.u32 %v6510_v59, %v3026_v6 }
 0x3ed   : > { %v3271_v27 = vmul.u32 2221713035, %v3239_v22  ;;  %v3273_v2 = vmul.u32 2221713035, %v3241_v18  ;;  %v8573_v10 = vsel %vm7195_vm4, %v7067_v26, %v7173_v1  ;;  %v3082_v46 = vadd.s32 %v6530_v54, %v3049_v37  ;;  %v8575_v26 = vld [vmem:[#allocation16_spill] sm:$0xff] }
 0x3ee   : > { %v2843_v36 = vsel %vm7260_vm12, %v7128_v24, %v8573_v10  ;;  %vm3384_vm1 = vcmp.ge.s32.totalorder %v4325_v34, 3006477107  ;;  %vm3390_vm2 = vcmp.ge.s32.totalorder %v4327_v43, 3006477107  ;;  %v2124_v62 = vsel %vm2121_vm0, %v2123_v42, %v2119_v16  ;;  %v8578_v10 = vld [vmem:[#allocation18_spill] sm:$0xff] }
 0x3ef   : > { %v3084_v14 = vadd.s32 %v6530_v54, %v3051_v21  ;;  %v3494_v31 = vsel %vm3384_vm1, %v7218_v25, 0.0  ;;  %v3496_v18 = vsel %vm3390_vm2, %v7238_v30, 0.0  ;;  %v3303_v55 = vshrl.u32 %v3271_v27, 16 }
 0x3f0   : > { %v3305_v48 = vshrl.u32 %v3273_v2, 16  ;;  %v3526_v5 = vmul.f32 %v8574_v4, %v3494_v31  ;;  %v3528_v1 = vmul.f32 %v8575_v26, %v3496_v18  ;;  %v3114_v32 = vshrl.u32 %v3082_v46, 16  ;;  %v8581_v26 = vld [vmem:[#allocation43_spill] sm:$0xff] }
 0x3f1   : > { %v3116_v13 = vshrl.u32 %v3084_v14, 16  ;;  %v3335_v24 = vxor.u32 %v3303_v55, %v3271_v27  ;;  %v3463_v34 = vmul.f32 %v7181_v38, %v2094_v0  ;;  %v8576_v20 = vsel %vm7232_vm9, %v7107_v3, %v7200_v19  ;;  %v8577_v27 = vld [vmem:[#allocation14_spill] sm:$0xff] }
 0x3f2   : > { %v3337_v60 = vxor.u32 %v3305_v48, %v3273_v2  ;;  %v2858_v25 = vsel %vm7283_vm15, %v7214_v17, %v8576_v20  ;;  %v3554_v30 = vpack.c.bf16 %v3528_v1, %v3526_v5  ;;  %v3465_v23 = vmul.f32 %v7183_v15, %v2124_v62  ;;  %v7329_v17 = vpop.f32.mrf.mxu0  ;;  %v7333_v15 = vpop.xlane.xlu0 %2717 }
 0x3f3   : > { %v3146_v16 = vxor.u32 %v3114_v32, %v3082_v46  ;;  %v3148_v28 = vxor.u32 %v3116_v13, %v3084_v14  ;;  %v2172_v53 = vmul.f32 %v7131_v61, %v7057_v9  ;;  %v4326_v63 = vxor.u32 2147483648, %v3335_v24 }
 0x3f4   : > { %v4328_v56 = vxor.u32 2147483648, %v3337_v60  ;;  %v7324_v38 = vmul.f32 1.25, %v2843_v36  ;;  %3584 = vmatmul.bf16.gmra.mxu3 %v3554_v30  ;;  %v7326_v0 = vmul.f32 1.25, %v2858_v25  ;;  %vm2146_vm3 = vweird.f32 %v6893_v50  ;;  %v1738_v30 = vpop.f32.mrf.mxu3 }
 0x3f5   : > { %v3178_v3 = vmul.u32 2146121005, %v3146_v16  ;;  %v3180_v19 = vmul.u32 2146121005, %v3148_v28  ;;  %vm3387_vm4 = vcmp.ge.s32.totalorder %v4326_v63, 3006477107  ;;  %vm2147_vm8 = vweird.f32 %v6968_v40 }
 0x3f6   : > { %vm3393_vm6 = vcmp.ge.s32.totalorder %v4328_v56, 3006477107  ;;  %v3050_v57 = vxor.u32 %v6512_v11, %v3025_v35  ;;  %v3495_v42 = vsel %vm3387_vm4, %v3463_v34, 0.0  ;;  %v2173_v21 = vsub.f32 1.0, %v2172_v53  ;;  %vm7346_vm9 = vmor %vm2146_vm3, %vm2147_vm8 }
 0x3f7   : > { %v3497_v22 = vsel %vm3393_vm6, %v3465_v23, 0.0  ;;  %v3210_v37 = vshrl.u32 %v3178_v3, 15  ;;  %v3212_v43 = vshrl.u32 %v3180_v19, 15  ;;  %v3527_v2 = vmul.f32 %v8577_v27, %v3495_v42 }
 0x3f8   : > { %v3529_v36 = vmul.f32 %v8578_v10, %v3497_v22  ;;  %v7341_v46 = vadd.f32 %v6968_v40, %v7052_v8  ;;  %4704 = vrcp.f32 %v7333_v15  ;;  %v3052_v31 = vxor.u32 %v6512_v11, %v3026_v6 }
 0x3f9   : > { %v3242_v62 = vxor.u32 %v3210_v37, %v3178_v3  ;;  %v3244_v14 = vxor.u32 %v3212_v43, %v3180_v19  ;;  %v7352_v18 = vadd.f32 1.0, %v7185_v41  ;;  %v3466_v8 = vmul.f32 %v7324_v38, %v6613_v51 }
 0x3fa   : > { %v3555_v55 = vpack.c.bf16 %v3529_v36, %v3527_v2  ;;  %v3083_v48 = vadd.s32 %v6530_v54, %v3050_v57  ;;  %v3468_v1 = vmul.f32 %v7326_v0, %v8581_v26  ;;  %v3085_v32 = vadd.s32 %v6530_v54, %v3052_v31  ;;  %v1787_v25 = vpop.f32.mrf.mxu0 }
 0x3fb   : > { %v3274_v4 = vmul.u32 2221713035, %v3242_v62  ;;  %v3276_v5 = vmul.u32 2221713035, %v3244_v14  ;;  %v2149_v41 = vsel %vm7346_vm9, %v6968_v40, %v7341_v46  ;;  %v2150_v6 = vand.u32 2147483647, %v6893_v50 }
 0x3fc   : > { %3633 = vmatmul.bf16.gmra.mxu0 %v3555_v55  ;;  %v2152_v13 = vand.u32 2147483648, %v6893_v50  ;;  %v3115_v51 = vshrl.u32 %v3083_v48, 16  ;;  %v2174_v34 = vmul.f32 %v7131_v61, %v2173_v21  ;;  %v3117_v20 = vshrl.u32 %v3085_v32, 16  ;;  %v8621_v46 = vld [vmem:[#allocation46_spill] sm:$0xff] }
 0x3fd   : > { %v3306_v24 = vshrl.u32 %v3274_v4, 16  ;;  %v3308_v60 = vshrl.u32 %v3276_v5, 16  ;;  %vm2176_vm10 = vweird.f32 %v7057_v9  ;;  %v1739_v16 = vadd.f32 %v1738_v30, %v6360_v52 }
 0x3fe   : > { %v3147_v23 = vxor.u32 %v3115_v51, %v3083_v48  ;;  %v2991_v28 = vadd.s32 64, %v6484_v44  ;;  %v7370_v40 = vpop.eup %4704  ;;  %vm2177_vm11 = vweird.f32 %v7131_v61  ;;  %v3149_v50 = vxor.u32 %v3117_v20, %v3085_v32  ;;  %v8586_v48 = vld [vmem:[#allocation20_spill] sm:$0xff]  ;;  %v8588_v20 = vld [vmem:[#allocation29_spill] sm:$0xff] }
 0x3ff   : > { %v3338_v53 = vxor.u32 %v3306_v24, %v3274_v4  ;;  %v3340_v63 = vxor.u32 %v3308_v60, %v3276_v5  ;;  %v2182_v56 = vand.u32 2147483648, %v7057_v9  ;;  %v7374_v19 = vadd.f32 %v1787_v25, %v1739_v16  ;;  %vm7387_vm15 = vmor %vm2176_vm10, %vm2177_vm11  ;;  %v8587_v5 = vld [vmem:[#allocation24_spill] sm:$0xff]  ;;  %v8590_v16 = vld [vmem:[#allocation33_spill] sm:$0xff] }
 0x400   : > { %v3179_v3 = vmul.u32 2146121005, %v3147_v23  ;;  %v3008_v57 = vadd.s32 %v6496_v45, %v2991_v28  ;;  %vm7377_vm12 = vcmp.eq.f32.partialorder %v2150_v6, 8.507059e+37  ;;  %v3181_v43 = vmul.u32 2146121005, %v3149_v50 }
 0x401   : > { %v4329_v42 = vxor.u32 2147483648, %v3338_v53  ;;  %v4331_v22 = vxor.u32 2147483648, %v3340_v63  ;;  %v2175_v21 = vadd.f32 %v7131_v61, %v2174_v34  ;;  %v2180_v27 = vand.u32 2147483647, %v7057_v9  ;;  %v8591_v53 = vld [vmem:[#allocation7_spill] sm:$0xff] }
 0x402   : > { %v3211_v2 = vshrl.u32 %v3179_v3, 15  ;;  %v3027_v10 = vmul.u32 2654435761, %v3008_v57  ;;  %v2153_v36 = vor.u32 1.1754944e-38, %v2152_v13  ;;  %v3213_v62 = vshrl.u32 %v3181_v43, 15  ;;  %v1789_v6 = vpop.f32.mrf.mxu0  ;;  %v1740_v13 = vpop.f32.mrf.mxu3 }
 0x403   : > { %vm3396_vm13 = vcmp.ge.s32.totalorder %v4329_v42, 3006477107  ;;  %vm3402_vm14 = vcmp.ge.s32.totalorder %v4331_v22, 3006477107  ;;  %v2183_v31 = vor.u32 1.1754944e-38, %v2182_v56  ;;  %v2179_v9 = vsel %vm7387_vm15, %v7131_v61, %v2175_v21  ;;  %v8589_v61 = vld [vmem:[#allocation41_spill] sm:$0xff] }
 0x404   : > { %v3498_v14 = vsel %vm3396_vm13, %v3466_v8, 0.0  ;;  %v3500_v35 = vsel %vm3402_vm14, %v3468_v1, 0.0  ;;  %v3243_v55 = vxor.u32 %v3211_v2, %v3179_v3  ;;  %v3245_v32 = vxor.u32 %v3213_v62, %v3181_v43 }
 0x405   : > { %v3530_v4 = vmul.f32 %v8586_v48, %v3498_v14  ;;  %v3532_v26 = vmul.f32 %v8587_v5, %v3500_v35  ;;  %v3053_v51 = vxor.u32 %v6510_v59, %v3027_v10  ;;  %vm2181_vm0 = vcmp.eq.f32.partialorder %v2180_v27, 8.507059e+37 }
 0x406   : > { %v3275_v24 = vmul.u32 2221713035, %v3243_v55  ;;  %v1736_v8 = vadd.f32 %v7331_v7, %v6360_v52  ;;  %vm2281_vm1 = vweird.f32 %v6378_v29  ;;  %vm2282_vm2 = vweird.f32 %v6452_v33 }
 0x407   : > { %v3556_v1 = vpack.c.bf16 %v3532_v26, %v3530_v4  ;;  %v3277_v60 = vmul.u32 2221713035, %v3245_v32  ;;  %v3086_v34 = vadd.s32 %v6530_v54, %v3053_v51  ;;  %v2317_v25 = vand.u32 2147483648, %v8588_v20  ;;  %v8598_v51 = vld [vmem:[#allocation35_spill] sm:$0xff]  ;;  %vm7445_vm13 = vmor %vm2281_vm1, %vm2282_vm2 }
 0x408   : > { %v2154_v30 = vsel %vm7377_vm12, %v2153_v36, %v2149_v41  ;;  %v3307_v23 = vshrl.u32 %v3275_v24, 16  ;;  %v7407_v28 = vadd.f32 %v8590_v16, %v8589_v61  ;;  %v2347_v7 = vand.u32 2147483648, %v8591_v53 }
 0x409   : > { %3589 = vmatmul.bf16.gmra.mxu3 %v3556_v1  ;;  %v2184_v63 = vsel %vm2181_vm0, %v2183_v31, %v2179_v9  ;;  %v3309_v50 = vshrl.u32 %v3277_v60, 16  ;;  %v3118_v56 = vshrl.u32 %v3086_v34, 16  ;;  %v3054_v3 = vxor.u32 %v6512_v11, %v3027_v10  ;;  %v8599_v9 = vld [vmem:[#allocation22_spill] sm:$0xff] }
 0x40a   : > { %4706 = vrcp.f32 %v7352_v18  ;;  %v3339_v57 = vxor.u32 %v3307_v23, %v3275_v24  ;;  %v1785_v42 = vadd.f32 %v7329_v17, %v1736_v8  ;;  %v1741_v41 = vadd.f32 %v1740_v13, %v6360_v52  ;;  %v1743_v14 = vpop.f32.mrf.mxu3  ;;  %v8600_v8 = vld [vmem:[#allocation26_spill] sm:$0xff] }
 0x40b   : > { %v3341_v22 = vxor.u32 %v3309_v50, %v3277_v60  ;;  %v3467_v37 = vmul.f32 %v7324_v38, %v2154_v30  ;;  %v3087_v43 = vadd.s32 %v6530_v54, %v3054_v3  ;;  %vm2311_vm3 = vweird.f32 %v8588_v20  ;;  %v8605_v23 = vld [vmem:[#allocation42_spill] sm:$0xff] }
 0x40c   : > { %v4330_v21 = vxor.u32 2147483648, %v3339_v57  ;;  %v3469_v27 = vmul.f32 %v7326_v0, %v2184_v63  ;;  %v8592_v2 = vand.u32 2147483647, %v6299_v12  ;;  %v3150_v36 = vxor.u32 %v3118_v56, %v3086_v34  ;;  %v1792_v0 = vpop.f32.mrf.mxu0 }
 0x40d   : > { %v8595_v17 = vand.u32 2147483647, %v6355_v49  ;;  %vm2312_vm8 = vweird.f32 %v8590_v16  ;;  %v2861_v38 = vmul.f32 %v7370_v40, %v7333_v15  ;;  %v4332_v62 = vxor.u32 2147483648, %v3341_v22 }
 0x40e   : > { %vm7420_vm4 = vcmp.eq.f32.partialorder %v8592_v2, 8.507059e+37  ;;  %v3119_v12 = vshrl.u32 %v3087_v43, 16  ;;  %vm2341_vm9 = vweird.f32 %v8591_v53  ;;  %vm3399_vm10 = vcmp.ge.s32.totalorder %v4330_v21, 3006477107  ;;  %vm7454_vm14 = vmor %vm2311_vm3, %vm2312_vm8 }
 0x40f   : > { %vm7426_vm6 = vcmp.eq.f32.partialorder %v8595_v17, 8.507059e+37  ;;  %v4303_v35 = vmul.f32 -1.442695, %v1785_v42  ;;  %v1790_v31 = vadd.f32 %v1789_v6, %v1741_v41  ;;  %v1744_v49 = vadd.f32 %v1743_v14, %v6360_v52  ;;  %v8608_v42 = vld [vmem:[#allocation52_spill] sm:$0xff]  ;;  %v8623_v6 = vld [vmem:[#allocation34_spill] sm:$0xff] }
 0x410   : > { %vm3405_vm11 = vcmp.ge.s32.totalorder %v4332_v62, 3006477107  ;;  %v3499_v55 = vsel %vm3399_vm10, %v3467_v37, 0.0  ;;  %v4305_v48 = vmul.f32 -1.442695, %v7374_v19  ;;  %v3151_v4 = vxor.u32 %v3119_v12, %v3087_v43  ;;  %v7436_v5 = vpop.eup %4706  ;;  %v8617_v12 = vld [vmem:[#allocation50_spill] sm:$0xff] }
 0x411   : > { %v3501_v26 = vsel %vm3405_vm11, %v3469_v27, 0.0  ;;  %v1793_v32 = vadd.f32 %v1792_v0, %v1744_v49  ;;  %v3182_v13 = vmul.u32 2146121005, %v3150_v36  ;;  %vm2342_vm12 = vweird.f32 %v8598_v51 }
 0x412   : > { %v3531_v24 = vmul.f32 %v8599_v9, %v3499_v55  ;;  %v3533_v1 = vmul.f32 %v8600_v8, %v3501_v26  ;;  %v3183_v60 = vmul.u32 2146121005, %v3151_v4  ;;  %v2315_v19 = vand.u32 2147483647, %v8588_v20  ;;  %vm7467_vm15 = vmor %vm2341_vm9, %vm2342_vm12  ;;  %v1745_v27 = vpop.f32.mrf.mxu3  ;;  %v8620_v4 = vld [vmem:[#allocation17_spill] sm:$0xff]  ;;  %v8622_v8 = vld [vmem:[#allocation39_spill] sm:$0xff] }
 0x413   : > { %4708 = vpow2.f32 %v4303_v35  ;;  %v4307_v34 = vmul.f32 -1.442695, %v1790_v31  ;;  %v2340_v61 = vadd.f32 %v8598_v51, %v8605_v23  ;;  %v2345_v63 = vand.u32 2147483647, %v8591_v53  ;;  %v8616_v53 = vld [vmem:[#allocation49_spill] sm:$0xff]  ;;  %v8619_v31 = vld [vmem:[#allocation51_spill] sm:$0xff] }
 0x414   : > { %v2202_v50 = vmul.f32 %v7436_v5, %v7352_v18  ;;  %v2862_v56 = vsub.f32 1.0, %v2861_v38  ;;  %v3557_v3 = vpack.c.bf16 %v3533_v1, %v3531_v24  ;;  %4710 = vpow2.f32 %v4305_v48  ;;  %v1794_v21 = vpop.f32.mrf.mxu0 }
 0x415   : > { %v3214_v57 = vshrl.u32 %v3182_v13, 15  ;;  %v2284_v41 = vsel %vm7445_vm13, %v6452_v33, %v8608_v42  ;;  %v8609_v22 = vand.u32 2147483647, %v6378_v29  ;;  %v2318_v43 = vor.u32 1.1754944e-38, %v2317_v25 }
 0x416   : > { %3638 = vmatmul.bf16.gmra.mxu0 %v3557_v3  ;;  %v3215_v2 = vshrl.u32 %v3183_v60, 15  ;;  %v2314_v36 = vsel %vm7454_vm14, %v8590_v16, %v7407_v28  ;;  %vm2316_vm1 = vcmp.eq.f32.partialorder %v2315_v19, 8.507059e+37  ;;  %v2348_v33 = vor.u32 1.1754944e-38, %v2347_v7  ;;  %v7492_v62 = vpop.xlane.xlu1 %2720  ;;  %v8613_v16 = vld [vmem:[#allocation30_spill] sm:$0xff]  ;;  %v8614_v28 = vld [vmem:[#allocation44_spill] sm:$0xff] }
 0x417   : > { %vm7477_vm0 = vcmp.eq.f32.partialorder %v8609_v22, 8.507059e+37  ;;  %4712 = vpow2.f32 %v4307_v34  ;;  %v1746_v29 = vadd.f32 %v1745_v27, %v6360_v52  ;;  %v2344_v25 = vsel %vm7467_vm15, %v8598_v51, %v2340_v61  ;;  %v8624_v19 = vld [vmem:[#allocation36_spill] sm:$0xff] }
 0x418   : > { %vm2346_vm2 = vcmp.eq.f32.partialorder %v2345_v63, 8.507059e+37  ;;  %v2203_v17 = vsub.f32 1.0, %v2202_v50  ;;  %v2863_v38 = vmul.f32 %v7370_v40, %v2862_v56  ;;  %v8615_v14 = vsel %vm6650_vm7, %v8613_v16, %v8614_v28  ;;  %v8629_v16 = vld [vmem:[#allocation47_spill] sm:$0xff]  ;;  %v8630_v28 = vld [vmem:[#allocation40_spill] sm:$0xff] }
 0x419   : > { %v7502_v7 = vsel %vm7420_vm4, %v8616_v53, %v8615_v14  ;;  %v8618_v35 = vsel %vm6904_vm5, %v6436_v58, %v8617_v12  ;;  %v4709_v55 = vpop.eup %4708  ;;  %4714 = vrcp.f32 %v7492_v62  ;;  %v3246_v48 = vxor.u32 %v3214_v57, %v3182_v13 }
 0x41a   : > { %v7512_v49 = vsel %vm7426_vm6, %v8619_v31, %v8618_v35  ;;  %v7518_v10 = vsel %vm7477_vm0, %v8620_v4, %v2284_v41  ;;  %v7520_v26 = vsel %vm2316_vm1, %v2318_v43, %v2314_v36  ;;  %v4711_v47 = vpop.eup %4710  ;;  %v4309_v51 = vmul.f32 -1.442695, %v1793_v32  ;;  %v1748_v20 = vpop.f32.mrf.mxu3 }
 0x41b   : > { %v1795_v9 = vadd.f32 %v1794_v21, %v1746_v29  ;;  %v3247_v58 = vxor.u32 %v3215_v2, %v3183_v60  ;;  %v7522_v24 = vsel %vm2346_vm2, %v2348_v33, %v2344_v25  ;;  %v7526_v1 = vadd.f32 %v8622_v8, %v8621_v46 }
 0x41c   : > { %vm2371_vm7 = vweird.f32 %v8623_v6  ;;  %v2377_v13 = vand.u32 2147483648, %v8623_v6  ;;  %v2407_v34 = vand.u32 2147483648, %v8624_v19  ;;  %v2204_v30 = vmul.f32 %v7436_v5, %v2203_v17  ;;  %v1797_v3 = vpop.f32.mrf.mxu0 }
 0x41d   : > { %v2864_v23 = vadd.f32 %v7370_v40, %v2863_v38  ;;  %vm2866_vm5 = vweird.f32 %v7370_v40  ;;  %v7534_v32 = vadd.f32 1.0, %v4709_v55  ;;  %v4713_v60 = vpop.eup %4712  ;;  %v7536_v61 = vadd.f32 1.0, %v4711_v47 }
 0x41e   : > { %v3278_v63 = vmul.u32 2221713035, %v3246_v48  ;;  %vm2372_vm3 = vweird.f32 %v8622_v8  ;;  %vm2865_vm4 = vweird.f32 %v7333_v15  ;;  %v2869_v56 = vand.u32 2147483647, %v7333_v15  ;;  %v7577_v12 = vpop.xlane.xlu2 %2723 }
 0x41f   : > { %4716 = vpow2.f32 %v4309_v51  ;;  %v3279_v57 = vmul.u32 2221713035, %v3247_v58  ;;  %v7542_v42 = vpop.eup %4714  ;;  %vm7544_vm6 = vmor %vm2865_vm4, %vm2866_vm5  ;;  %v2871_v22 = vand.u32 2147483648, %v7333_v15  ;;  %v1749_v37 = vadd.f32 %v1748_v20, %v6360_v52 }
 0x420   : > { %vm2206_vm8 = vweird.f32 %v7352_v18  ;;  %vm2207_vm9 = vweird.f32 %v7436_v5  ;;  %v2868_v43 = vsel %vm7544_vm6, %v7370_v40, %v2864_v23  ;;  %4718 = vrcp.f32 %v7534_v32  ;;  %vm7586_vm14 = vmor %vm2371_vm7, %vm2372_vm3 }
 0x421   : > { %v7556_v21 = vadd.f32 1.0, %v4713_v60  ;;  %v2205_v27 = vadd.f32 %v7436_v5, %v2204_v30  ;;  %4720 = vrcp.f32 %v7536_v61  ;;  %v3310_v2 = vshrl.u32 %v3278_v63, 16  ;;  %vm7565_vm10 = vmor %vm2206_vm8, %vm2207_vm9 }
 0x422   : > { %v2210_v15 = vand.u32 2147483647, %v7352_v18  ;;  %v2212_v36 = vand.u32 2147483648, %v7352_v18  ;;  %v2876_v33 = vmul.f32 %v7542_v42, %v7492_v62  ;;  %v1798_v29 = vadd.f32 %v1797_v3, %v1749_v37 }
 0x423   : > { %v2992_v25 = vadd.s32 72, %v6484_v44  ;;  %v3311_v17 = vshrl.u32 %v3279_v57, 16  ;;  %v2872_v38 = vor.u32 1.1754944e-38, %v2871_v22  ;;  %v4311_v0 = vmul.f32 -1.442695, %v1795_v9  ;;  %v1750_v9 = vpop.f32.mrf.mxu3 }
 0x424   : > { %v7571_v14 = vadd.f32 %v8630_v28, %v8629_v16  ;;  %vm2401_vm11 = vweird.f32 %v8624_v19  ;;  %vm2870_vm12 = vcmp.eq.f32.partialorder %v2869_v56, 8.507059e+37  ;;  %4722 = vrcp.f32 %v7556_v21  ;;  %v1799_v3 = vpop.f32.mrf.mxu0  ;;  %v8640_v16 = vld [vmem:[#allocation48_spill] sm:$0xff] }
 0x425   : > { %v4717_v18 = vpop.eup %4716  ;;  %v3009_v53 = vadd.s32 %v6496_v45, %v2992_v25  ;;  %vm2402_vm13 = vweird.f32 %v8630_v28  ;;  %v2873_v35 = vsel %vm2870_vm12, %v2872_v38, %v2868_v43  ;;  %v3342_v31 = vxor.u32 %v3310_v2, %v3278_v63 }
 0x426   : > { %8631 = vst [vmem:[#allocation23_spill] sm:$0xff] %v7571_v14  ;;  %v2209_v55 = vsel %vm7565_vm10, %v7436_v5, %v2205_v27  ;;  %v2213_v48 = vor.u32 1.1754944e-38, %v2212_v36  ;;  %v7590_v47 = vpop.eup %4718  ;;  %v2877_v51 = vsub.f32 1.0, %v2876_v33  ;;  %vm7592_vm15 = vcmp.eq.f32.partialorder %v2210_v15, 8.507059e+37  ;;  %vm7607_vm0 = vmor %vm2401_vm11, %vm2402_vm13 }
 0x427   : > { %v3028_v58 = vmul.u32 2654435761, %v3009_v53  ;;  %v3343_v30 = vxor.u32 %v3311_v17, %v3279_v57  ;;  %v7596_v5 = vpop.eup %4720  ;;  %v7598_v23 = vadd.f32 1.0, %v4717_v18  ;;  %4724 = vpow2.f32 %v4311_v0  ;;  %v7638_v17 = vpop.xlane.xlu0 %2726 }
 0x428   : > { %v1751_v60 = vadd.f32 %v1750_v9, %v6360_v52  ;;  %v7601_v63 = vor.u32 1.1754944e-38, %v2377_v13  ;;  %v8636_v56 = vmov 0  ;;  %4726 = vrcp.f32 %v7577_v12 }
 0x429   : > { %v8637_v56 = vsel %vm7607_vm0, 4294967295, %v8636_v56  ;;  %v2874_v20 = vmul.f32 1.25, %v2873_v35  ;;  %v3055_v41 = vxor.u32 %v6510_v59, %v3028_v58  ;;  %v4333_v22 = vxor.u32 2147483648, %v3342_v31 }
 0x42a   : > { %8638 = vst [vmem:[#allocation10_spill] sm:$0xff] %v8637_v56  ;;  %v1800_v13 = vadd.f32 %v1799_v3, %v1751_v60  ;;  %v2214_v37 = vsel %vm7592_vm15, %v2213_v48, %v2209_v55  ;;  %v7620_v43 = vpop.eup %4722  ;;  %v2878_v27 = vmul.f32 %v7542_v42, %v2877_v51  ;;  %v4334_v2 = vxor.u32 2147483648, %v3343_v30 }
 0x42b   : > { %v7629_v36 = vor.u32 1.1754944e-38, %v2407_v34  ;;  %v2232_v33 = vmul.f32 %v7590_v47, %v7534_v32  ;;  %v7635_v25 = vmul.f32 %v7596_v5, %v7536_v61  ;;  %4728 = vrcp.f32 %v7598_v23 }
 0x42c   : > { %v4313_v40 = vmul.f32 -1.442695, %v1798_v29  ;;  %v2884_v38 = vand.u32 2147483647, %v7492_v62  ;;  %v3088_v0 = vadd.s32 %v6530_v54, %v3055_v41  ;;  %v3470_v18 = vmul.f32 %v2874_v20, %v8640_v16 }
 0x42d   : > { %8639 = vst [vmem:[#allocation12_spill] sm:$0xff] %v7629_v36  ;;  %v3471_v34 = vmul.f32 %v2874_v20, %v2214_v37  ;;  %v4725_v53 = vpop.eup %4724  ;;  %v7645_v35 = vmul.f32 %v7620_v43, %v7556_v21  ;;  %vm2881_vm1 = vweird.f32 %v7542_v42  ;;  %v2886_v31 = vand.u32 2147483648, %v7492_v62  ;;  %v8650_v37 = vld [vmem:[#allocation28_spill] sm:$0xff] }
 0x42e   : > { %vm7649_vm2 = vcmp.ge.s32.totalorder %v4333_v22, 3006477107  ;;  %v7653_v55 = vpop.eup %4726  ;;  %v2879_v48 = vadd.f32 %v7542_v42, %v2878_v27  ;;  %4730 = vrcp.f32 %v7638_v17  ;;  %v3120_v51 = vshrl.u32 %v3088_v0, 16 }
 0x42f   : > { %vm7657_vm7 = vcmp.ge.s32.totalorder %v4334_v2, 3006477107  ;;  %v2233_v46 = vsub.f32 1.0, %v2232_v33  ;;  %4732 = vpow2.f32 %v4313_v40  ;;  %v3056_v60 = vxor.u32 %v6512_v11, %v3028_v58  ;;  %v7696_v29 = vpop.xlane.xlu1 %2729 }
 0x430   : > { %vm2880_vm5 = vweird.f32 %v7492_v62  ;;  %v2901_v3 = vand.u32 2147483648, %v7577_v12  ;;  %v3152_v20 = vxor.u32 %v3120_v51, %v3088_v0  ;;  %v3502_v41 = vsel %vm7649_vm2, %v3470_v18, 0.0  ;;  %v8649_v51 = vld [vmem:[#allocation27_spill] sm:$0xff] }
 0x431   : > { %v7668_v22 = vpop.eup %4728  ;;  %vm7672_vm3 = vmor %vm2880_vm5, %vm2881_vm1  ;;  %v7676_v27 = vadd.f32 1.0, %v4725_v53  ;;  %v2891_v58 = vmul.f32 %v7653_v55, %v7577_v12  ;;  %v3089_v62 = vadd.s32 %v6530_v54, %v3056_v60  ;;  %v3503_v2 = vsel %vm7657_vm7, %v3471_v34, 0.0 }
 0x432   : > { %v2883_v40 = vsel %vm7672_vm3, %v7542_v42, %v2879_v48  ;;  %vm7687_vm4 = vcmp.eq.f32.partialorder %v2884_v38, 8.507059e+37  ;;  %v2887_v16 = vor.u32 1.1754944e-38, %v2886_v31  ;;  %v4315_v53 = vmul.f32 -1.442695, %v1800_v13  ;;  %v3624_v31 = vpop.f32.mrf.mxu0  ;;  %v3575_v57 = vpop.f32.mrf.mxu3 }
 0x433   : > { %v3184_v34 = vmul.u32 2146121005, %v3152_v20  ;;  %v7699_v9 = vmul.f32 %v8649_v51, %v3502_v41  ;;  %v7705_v42 = vmul.f32 %v7668_v22, %v7598_v23  ;;  %v7707_v38 = vor.u32 1.1754944e-38, %v2901_v3 }
 0x434   : > { %v7701_v60 = vpop.eup %4730  ;;  %v3121_v48 = vshrl.u32 %v3089_v62, 16  ;;  %v7710_v15 = vmul.f32 %v8650_v37, %v3503_v2  ;;  %4734 = vrcp.f32 %v7676_v27  ;;  %v2892_v20 = vsub.f32 1.0, %v2891_v58 }
 0x435   : > { %v4733_v13 = vpop.eup %4732  ;;  %v2888_v41 = vsel %vm7687_vm4, %v2887_v16, %v2883_v40  ;;  %v3216_v51 = vshrl.u32 %v3184_v34, 15  ;;  %4736 = vrcp.f32 %v7696_v29  ;;  %v2234_v3 = vmul.f32 %v7590_v47, %v2233_v46 }
 0x436   : > { %v3153_v52 = vxor.u32 %v3121_v48, %v3089_v62  ;;  %v3625_v50 = vadd.f32 %v3624_v31, %v3575_v57  ;;  %vm2895_vm6 = vweird.f32 %v7577_v12  ;;  %v2906_v2 = vmul.f32 %v7701_v60, %v7638_v17 }
 0x437   : > { %4738 = vpow2.f32 %v4315_v53  ;;  %v3248_v37 = vxor.u32 %v3216_v51, %v3184_v34  ;;  %vm2236_vm8 = vweird.f32 %v7534_v32  ;;  %v7721_v58 = vadd.f32 1.0, %v4733_v13 }
 0x438   : > { %v7723_v40 = vmul.f32 1.25, %v2888_v41  ;;  %vm2237_vm9 = vweird.f32 %v7590_v47  ;;  %v3185_v0 = vmul.u32 2146121005, %v3153_v52  ;;  %3664 = vst [vmem:[%s7727_s1] sm:$0xff] %v3625_v50  ;;  %v2893_v46 = vmul.f32 %v7653_v55, %v2892_v20 }
 0x439   : > { %8651 = vst [vmem:[#allocation37_spill] sm:$0xff] %v7721_v58  ;;  %v3280_v62 = vmul.u32 2221713035, %v3248_v37  ;;  %v2993_v16 = vadd.s32 80, %v6484_v44  ;;  %v2235_v53 = vadd.f32 %v7590_v47, %v2234_v3  ;;  %v2240_v34 = vand.u32 2147483647, %v7534_v32  ;;  %vm7744_vm11 = vmor %vm2236_vm8, %vm2237_vm9  ;;  %v7754_v57 = vpop.xlane.xlu2 %2732 }
 0x43a   : > { %v2242_v31 = vand.u32 2147483648, %v7534_v32  ;;  %v3217_v48 = vshrl.u32 %v3185_v0, 15  ;;  %v7736_v13 = vpop.eup %4734  ;;  %vm2896_vm10 = vweird.f32 %v7653_v55  ;;  %v2907_v52 = vsub.f32 1.0, %v2906_v2  ;;  %v3577_v18 = vpop.f32.mrf.mxu3 }
 0x43b   : > { %v2914_v50 = vand.u32 2147483647, %v7638_v17  ;;  %v3312_v41 = vshrl.u32 %v3280_v62, 16  ;;  %v7748_v51 = vpop.eup %4736  ;;  %4740 = vrcp.f32 %v7721_v58  ;;  %v2916_v3 = vand.u32 2147483648, %v7638_v17  ;;  %v3626_v36 = vpop.f32.mrf.mxu0  ;;  %vm7782_vm15 = vmor %vm2895_vm6, %vm2896_vm10 }
 0x43c   : > { %v3472_v2 = vmul.f32 %v7723_v40, %v7502_v7  ;;  %v3249_v37 = vxor.u32 %v3217_v48, %v3185_v0  ;;  %v7757_v30 = vadd.f32 %v7653_v55, %v2893_v46  ;;  %vm2910_vm12 = vweird.f32 %v7638_v17 }
 0x43d   : > { %v4739_v33 = vpop.eup %4738  ;;  %v3344_v32 = vxor.u32 %v3312_v41, %v3280_v62  ;;  %4742 = vrcp.f32 %v7754_v57  ;;  %v7762_v39 = vadd.s32 %v6496_v45, %v2993_v16  ;;  %v2239_v7 = vsel %vm7744_vm11, %v7590_v47, %v2235_v53 }
 0x43e   : > { %vm7767_vm13 = vcmp.eq.f32.partialorder %v2240_v34, 8.507059e+37  ;;  %v2243_v48 = vor.u32 1.1754944e-38, %v2242_v31  ;;  %v3281_v46 = vmul.u32 2221713035, %v3249_v37  ;;  %v2908_v62 = vmul.f32 %v7701_v60, %v2907_v52 }
 0x43f   : > { %v2921_v41 = vmul.f32 %v7748_v51, %v7696_v29  ;;  %v4335_v14 = vxor.u32 2147483648, %v3344_v32  ;;  %v3627_v16 = vadd.f32 %v3626_v36, %v3577_v18  ;;  %v7776_v28 = vmul.f32 %v7736_v13, %v7676_v27 }
 0x440   : > { %v8658_v53 = vand.u32 2147483647, %v7577_v12  ;;  %v2917_v31 = vor.u32 1.1754944e-38, %v2916_v3  ;;  %v7792_v36 = vadd.f32 1.0, %v4739_v33  ;;  %v3313_v18 = vshrl.u32 %v3281_v46, 16 }
 0x441   : > { %v2898_v52 = vsel %vm7782_vm15, %v7653_v55, %v7757_v30  ;;  %vm2911_vm2 = vweird.f32 %v7701_v60  ;;  %vm7799_vm7 = vcmp.eq.f32.partialorder %v2914_v50, 8.507059e+37  ;;  %vm3414_vm5 = vcmp.ge.s32.totalorder %v4335_v14, 3006477107  ;;  %3665 = vst [vmem:[%s7727_s1 + $0x8] sm:$0xff] %v3627_v16  ;;  %v7805_v37 = vpop.eup %4740  ;;  %v7810_v55 = vpop.xlane.xlu0 %2735  ;;  %v8664_v14 = vld [vmem:[#allocation53_spill] sm:$0xff] }
 0x442   : > { %vm7788_vm1 = vcmp.eq.f32.partialorder %v8658_v53, 8.507059e+37  ;;  %8661 = vst [vmem:[#allocation38_spill] sm:$0xff] %v7792_v36  ;;  %v2931_v33 = vand.u32 2147483648, %v7696_v29  ;;  %v3504_v3 = vsel %vm3414_vm5, %v3472_v2, 0.0  ;;  %v2244_v32 = vsel %vm7767_vm13, %v2243_v48, %v2239_v7  ;;  %vm7835_vm3 = vmor %vm2910_vm12, %vm2911_vm2 }
 0x443   : > { %v3345_v47 = vxor.u32 %v3313_v18, %v3281_v46  ;;  %v7812_v30 = vpop.eup %4742  ;;  %v2909_v50 = vadd.f32 %v7701_v60, %v2908_v62  ;;  %v2922_v53 = vsub.f32 1.0, %v2921_v41  ;;  %v3536_v16 = vmul.f32 %v8664_v14, %v3504_v3  ;;  %v8668_v14 = vld [vmem:[#allocation54_spill] sm:$0xff] }
 0x444   : > { %v3473_v12 = vmul.f32 %v7723_v40, %v2244_v32  ;;  %4744 = vrcp.f32 %v7792_v36  ;;  %v2936_v2 = vmul.f32 %v7812_v30, %v7754_v57  ;;  %v2994_v7 = vadd.s32 88, %v6484_v44 }
 0x445   : > { %v4336_v56 = vxor.u32 2147483648, %v3345_v47  ;;  %v7823_v0 = vmul.f32 %v7805_v37, %v7721_v58  ;;  %v3558_v48 = vpack.c.bf16 %v3536_v16, %v7699_v9  ;;  %4746 = vrcp.f32 %v7810_v55 }
 0x446   : > { %v8665_v46 = vmul.u32 2654435761, %v7762_v39  ;;  %vm2925_vm4 = vweird.f32 %v7696_v29  ;;  %v3011_v9 = vadd.s32 %v6496_v45, %v2994_v7  ;;  %v2913_v18 = vsel %vm7835_vm3, %v7701_v60, %v2909_v50 }
 0x447   : > { %vm3417_vm6 = vcmp.ge.s32.totalorder %v4336_v56, 3006477107  ;;  %v2923_v3 = vmul.f32 %v7748_v51, %v2922_v53  ;;  %3594 = vmatmul.bf16.gmra.mxu3 %v3558_v48  ;;  %v7849_v58 = vor.u32 1.1754944e-38, %v2931_v33  ;;  %v2903_v60 = vsel %vm7788_vm1, %v7707_v38, %v2898_v52 }
 0x448   : > { %v3057_v40 = vxor.u32 %v6510_v59, %v8665_v46  ;;  %v3505_v32 = vsel %vm3417_vm6, %v3473_v12, 0.0  ;;  %v2937_v46 = vsub.f32 1.0, %v2936_v2  ;;  %v3030_v62 = vmul.u32 2654435761, %v3011_v9 }
 0x449   : > { %v3537_v16 = vmul.f32 %v8668_v14, %v3505_v32  ;;  %v2946_v7 = vand.u32 2147483648, %v7754_v57  ;;  %v2918_v48 = vsel %vm7799_vm7, %v2917_v31, %v2913_v18  ;;  %v7864_v33 = vadd.f32 %v7748_v51, %v2923_v3 }
 0x44a   : > { %v3090_v47 = vadd.s32 %v6530_v54, %v3057_v40  ;;  %v7854_v53 = vpop.eup %4744  ;;  %v3059_v2 = vxor.u32 %v6510_v59, %v3030_v62  ;;  %vm2926_vm8 = vweird.f32 %v7748_v51  ;;  %v2944_v38 = vand.u32 2147483647, %v7754_v57 }
 0x44b   : > { %8669 = vst [vmem:[#allocation13_spill] sm:$0xff] %v7854_v53  ;;  %v3559_v12 = vpack.c.bf16 %v3537_v16, %v7710_v15  ;;  %v7861_v40 = vpop.eup %4746  ;;  %v2938_v15 = vmul.f32 %v7812_v30, %v2937_v46  ;;  %v2961_v52 = vand.u32 2147483648, %v7810_v55  ;;  %v7870_v41 = vmul.f32 1.25, %v2903_v60  ;;  %vm7882_vm10 = vmor %vm2925_vm4, %vm2926_vm8 }
 0x44c   : > { %v3122_v50 = vshrl.u32 %v3090_v47, 16  ;;  %v3092_v31 = vadd.s32 %v6530_v54, %v3059_v2  ;;  %v7875_v20 = vmul.f32 %v7854_v53, %v7792_v36  ;;  %vm2940_vm9 = vweird.f32 %v7754_v57 }
 0x44d   : > { %3643 = vmatmul.bf16.gmra.mxu0 %v3559_v12  ;;  %v7878_v9 = vmul.f32 1.25, %v2918_v48  ;;  %v2947_v32 = vor.u32 1.1754944e-38, %v2946_v7  ;;  %v8672_v16 = vsub.f32 1.0, %v7635_v25  ;;  %vm2941_vm11 = vweird.f32 %v7812_v30 }
 0x44e   : > { %v3154_v34 = vxor.u32 %v3122_v50, %v3090_v47  ;;  %v2951_v47 = vmul.f32 %v7861_v40, %v7810_v55  ;;  %v3124_v14 = vshrl.u32 %v3092_v31, 16  ;;  %vm7896_vm12 = vcmp.eq.f32.partialorder %v2944_v38, 8.507059e+37  ;;  %vm7924_vm1 = vmor %vm2940_vm9, %vm2941_vm11  ;;  %v3580_v50 = vpop.f32.mrf.mxu3 }
 0x44f   : > { %v2264_v46 = vmul.f32 %v7596_v5, %v8672_v16  ;;  %v2939_v48 = vadd.f32 %v7812_v30, %v2938_v15  ;;  %v7902_v2 = vor.u32 1.1754944e-38, %v2961_v52  ;;  %v7910_v56 = vmul.f32 %v7878_v9, %v7518_v10 }
 0x450   : > { %v3186_v18 = vmul.u32 2146121005, %v3154_v34  ;;  %v3156_v25 = vxor.u32 %v3124_v14, %v3092_v31  ;;  %v7906_v34 = vmul.f32 %v7870_v41, %v7512_v49  ;;  %vm2266_vm13 = vweird.f32 %v7536_v61 }
 0x451   : > { %v8675_v38 = vmul.u32 2654435761, %v7762_v39  ;;  %v2952_v60 = vsub.f32 1.0, %v2951_v47  ;;  %v7917_v52 = vadd.f32 %v7596_v5, %v2264_v46  ;;  %vm2267_vm15 = vweird.f32 %v7596_v5 }
 0x452   : > { %v3218_v7 = vshrl.u32 %v3186_v18, 15  ;;  %v3188_v15 = vmul.u32 2146121005, %v3156_v25  ;;  %v2270_v39 = vand.u32 2147483647, %v7536_v61  ;;  %v3060_v31 = vxor.u32 %v6512_v11, %v3030_v62  ;;  %vm7938_vm2 = vmor %vm2266_vm13, %vm2267_vm15 }
 0x453   : > { %v3058_v12 = vxor.u32 %v6512_v11, %v8675_v38  ;;  %v2943_v47 = vsel %vm7924_vm1, %v7812_v30, %v2939_v48  ;;  %v2272_v46 = vand.u32 2147483648, %v7536_v61  ;;  %v2995_v57 = vadd.s32 96, %v6484_v44 }
 0x454   : > { %v3250_v16 = vxor.u32 %v3218_v7, %v3186_v18  ;;  %v3220_v14 = vshrl.u32 %v3188_v15, 15  ;;  %v8680_v62 = vsub.f32 1.0, %v7645_v35  ;;  %vm2296_vm7 = vweird.f32 %v7556_v21 }
 0x455   : > { %v3091_v18 = vadd.s32 %v6530_v54, %v3058_v12  ;;  %v2996_v48 = vadd.s32 104, %v6484_v44  ;;  %v7949_v49 = vadd.s32 %v6496_v45, %v2995_v57  ;;  %vm2297_vm5 = vweird.f32 %v7620_v43 }
 0x456   : > { %v3282_v10 = vmul.u32 2221713035, %v3250_v16  ;;  %v2294_v12 = vmul.f32 %v7620_v43, %v8680_v62  ;;  %v3093_v16 = vadd.s32 %v6530_v54, %v3060_v31  ;;  %v3252_v30 = vxor.u32 %v3220_v14, %v3188_v15  ;;  %vm7963_vm4 = vmor %vm2296_vm7, %vm2297_vm5 }
 0x457   : > { %v3123_v38 = vshrl.u32 %v3091_v18, 16  ;;  %v2948_v35 = vsel %vm7896_vm12, %v2947_v32, %v2943_v47  ;;  %v2953_v62 = vmul.f32 %v7861_v40, %v2952_v60  ;;  %v2269_v15 = vsel %vm7938_vm2, %v7596_v5, %v7917_v52 }
 0x458   : > { %v3314_v7 = vshrl.u32 %v3282_v10, 16  ;;  %v3125_v17 = vshrl.u32 %v3093_v16, 16  ;;  %v3284_v31 = vmul.u32 2221713035, %v3252_v30  ;;  %vm2956_vm3 = vweird.f32 %v7861_v40 }
 0x459   : > { %v3155_v36 = vxor.u32 %v3123_v38, %v3091_v18  ;;  %v2302_v60 = vand.u32 2147483648, %v7556_v21  ;;  %v7968_v18 = vpop.xlane.xlu1 %2738  ;;  %v7971_v5 = vadd.s32 %v6496_v45, %v2996_v48  ;;  %v8380_v52 = vmul.u32 2654435761, %v7949_v49 }
 0x45a   : > { %v3346_v61 = vxor.u32 %v3314_v7, %v3282_v10  ;;  %v2295_v10 = vadd.f32 %v7620_v43, %v2294_v12  ;;  %v3157_v57 = vxor.u32 %v3125_v17, %v3093_v16  ;;  %v3316_v53 = vshrl.u32 %v3284_v31, 16  ;;  %v8691_v16 = vld [vmem:[#allocation8_spill] sm:$0xff] }
 0x45b   : > { %v3187_v7 = vmul.u32 2146121005, %v3155_v36  ;;  %v7974_v47 = vmul.f32 1.25, %v2948_v35  ;;  %vm2955_vm6 = vweird.f32 %v7810_v55  ;;  %vm7977_vm8 = vcmp.eq.f32.partialorder %v2270_v39, 8.507059e+37 }
 0x45c   : > { %v4337_v14 = vxor.u32 2147483648, %v3346_v61  ;;  %v3189_v17 = vmul.u32 2146121005, %v3157_v57  ;;  %v3348_v12 = vxor.u32 %v3316_v53, %v3284_v31  ;;  %v2273_v38 = vor.u32 1.1754944e-38, %v2272_v46  ;;  %v3629_v53 = vpop.f32.mrf.mxu0  ;;  %vm8023_vm15 = vmor %vm2955_vm6, %vm2956_vm3 }
 0x45d   : > { %v3219_v25 = vshrl.u32 %v3187_v7, 15  ;;  %v2300_v30 = vand.u32 2147483647, %v7556_v21  ;;  %v8687_v48 = vand.u32 2147483647, %v7696_v29  ;;  %v2299_v39 = vsel %vm7963_vm4, %v7620_v43, %v2295_v10 }
 0x45e   : > { %vm7981_vm9 = vcmp.ge.s32.totalorder %v4337_v14, 3006477107  ;;  %v3221_v35 = vshrl.u32 %v3189_v17, 15  ;;  %4748 = vrcp.f32 %v7968_v18  ;;  %v4339_v31 = vxor.u32 2147483648, %v3348_v12 }
 0x45f   : > { %vm7988_vm11 = vcmp.eq.f32.partialorder %v8687_v48, 8.507059e+37  ;;  %v3251_v57 = vxor.u32 %v3219_v25, %v3187_v7  ;;  %v2303_v46 = vor.u32 1.1754944e-38, %v2302_v60  ;;  %v3032_v21 = vmul.u32 2654435761, %v7971_v5 }
 0x460   : > { %v3061_v29 = vxor.u32 %v6510_v59, %v8380_v52  ;;  %v3506_v14 = vsel %vm7981_vm9, %v7906_v34, 0.0  ;;  %v3253_v32 = vxor.u32 %v3221_v35, %v3189_v17  ;;  %v3630_v10 = vadd.f32 %v3629_v53, %v3580_v50  ;;  %v8690_v34 = vld [vmem:[#allocation55_spill] sm:$0xff] }
 0x461   : > { %v3283_v43 = vmul.u32 2221713035, %v3251_v57  ;;  %vm3426_vm12 = vcmp.ge.s32.totalorder %v4339_v31, 3006477107  ;;  %vm2301_vm13 = vcmp.eq.f32.partialorder %v2300_v30, 8.507059e+37  ;;  %v3063_v7 = vxor.u32 %v6510_v59, %v3032_v21 }
 0x462   : > { %v3094_v60 = vadd.s32 %v6530_v54, %v3061_v29  ;;  %v8008_v25 = vadd.f32 %v7861_v40, %v2953_v62  ;;  %v3508_v12 = vsel %vm3426_vm12, %v7910_v56, 0.0  ;;  %v3285_v48 = vmul.u32 2221713035, %v3253_v32  ;;  %3666 = vst [vmem:[%s7727_s1 + $0x10] sm:$0xff] %v3630_v10  ;;  %v3582_v10 = vpop.f32.mrf.mxu3 }
 0x463   : > { %v3315_v52 = vshrl.u32 %v3283_v43, 16  ;;  %v3538_v17 = vmul.f32 %v8690_v34, %v3506_v14  ;;  %v3540_v50 = vmul.f32 %v8691_v16, %v3508_v12  ;;  %v3096_v30 = vadd.s32 %v6530_v54, %v3063_v7 }
 0x464   : > { %v3126_v35 = vshrl.u32 %v3094_v60, 16  ;;  %v8015_v57 = vpop.eup %4748  ;;  %v2274_v53 = vsel %vm7977_vm8, %v2273_v38, %v2269_v15  ;;  %v2304_v31 = vsel %vm2301_vm13, %v2303_v46, %v2299_v39  ;;  %v3317_v62 = vshrl.u32 %v3285_v48, 16  ;;  %v3631_v39 = vpop.f32.mrf.mxu0 }
 0x465   : > { %v3347_v29 = vxor.u32 %v3315_v52, %v3283_v43  ;;  %v3560_v14 = vpack.c.bf16 %v3540_v50, %v3538_v17  ;;  %v3475_v32 = vmul.f32 %v7870_v41, %v2274_v53  ;;  %v3128_v7 = vshrl.u32 %v3096_v30, 16 }
 0x466   : > { %v3158_v12 = vxor.u32 %v3126_v35, %v3094_v60  ;;  %v2958_v15 = vsel %vm8023_vm15, %v7861_v40, %v8008_v25  ;;  %v3349_v52 = vxor.u32 %v3317_v62, %v3285_v48  ;;  %v3477_v38 = vmul.f32 %v7878_v9, %v2304_v31  ;;  %v8698_v31 = vld [vmem:[#allocation56_spill] sm:$0xff] }
 0x467   : > { %v4338_v36 = vxor.u32 2147483648, %v3347_v29  ;;  %3599 = vmatmul.bf16.gmra.mxu3 %v3560_v14  ;;  %v2966_v46 = vmul.f32 %v8015_v57, %v7968_v18  ;;  %v8694_v41 = vsel %vm7882_vm10, %v7748_v51, %v7864_v33  ;;  %v3160_v60 = vxor.u32 %v3128_v7, %v3096_v30  ;;  %v8699_v29 = vld [vmem:[#allocation57_spill] sm:$0xff] }
 0x468   : > { %v2933_v43 = vsel %vm7988_vm11, %v7849_v58, %v8694_v41  ;;  %v3190_v48 = vmul.u32 2146121005, %v3158_v12  ;;  %v4340_v9 = vxor.u32 2147483648, %v3349_v52  ;;  %v3632_v17 = vadd.f32 %v3631_v39, %v3582_v10 }
 0x469   : > { %vm8043_vm1 = vcmp.ge.s32.totalorder %v4338_v36, 3006477107  ;;  %v8697_v16 = vsub.f32 1.0, %v7705_v42  ;;  %v2976_v51 = vand.u32 2147483648, %v7968_v18  ;;  %v3192_v33 = vmul.u32 2146121005, %v3160_v60 }
 0x46a   : > { %v3507_v3 = vsel %vm8043_vm1, %v3475_v32, 0.0  ;;  %v3222_v61 = vshrl.u32 %v3190_v48, 15  ;;  %vm3429_vm10 = vcmp.ge.s32.totalorder %v4340_v9, 3006477107  ;;  %3667 = vst [vmem:[%s7727_s1 + $0x18] sm:$0xff] %v3632_v17  ;;  %v8054_v58 = vmul.f32 1.25, %v2933_v43 }
 0x46b   : > { %v2324_v50 = vmul.f32 %v7668_v22, %v8697_v16  ;;  %vm2326_vm2 = vweird.f32 %v7598_v23  ;;  %vm2327_vm7 = vweird.f32 %v7668_v22  ;;  %v3509_v30 = vsel %vm3429_vm10, %v3477_v38, 0.0 }
 0x46c   : > { %v2967_v35 = vsub.f32 1.0, %v2966_v46  ;;  %v3224_v42 = vshrl.u32 %v3192_v33, 15  ;;  %v3254_v53 = vxor.u32 %v3222_v61, %v3190_v48  ;;  %v3539_v62 = vmul.f32 %v8698_v31, %v3507_v3  ;;  %vm8068_vm5 = vmor %vm2326_vm2, %vm2327_vm7 }
 0x46d   : > { %v3541_v14 = vmul.f32 %v8699_v29, %v3509_v30  ;;  %v2974_v32 = vand.u32 2147483647, %v7968_v18  ;;  %v8062_v10 = vadd.f32 %v7668_v22, %v2324_v50  ;;  %v8064_v7 = vor.u32 1.1754944e-38, %v2976_v51 }
 0x46e   : > { %v3256_v12 = vxor.u32 %v3224_v42, %v3192_v33  ;;  %v3286_v52 = vmul.u32 2221713035, %v3254_v53  ;;  %v3480_v36 = vmul.f32 %v7974_v47, %v7522_v24  ;;  %v3478_v46 = vmul.f32 %v8054_v58, %v7520_v26 }
 0x46f   : > { %v3561_v39 = vpack.c.bf16 %v3541_v14, %v3539_v62  ;;  %v8702_v41 = vmul.u32 2654435761, %v7949_v49  ;;  %v3064_v60 = vxor.u32 %v6512_v11, %v3032_v21  ;;  %v2968_v48 = vmul.f32 %v8015_v57, %v2967_v35 }
 0x470   : > { %vm2971_vm3 = vweird.f32 %v8015_v57  ;;  %v3288_v24 = vmul.u32 2221713035, %v3256_v12  ;;  %v3318_v34 = vshrl.u32 %v3286_v52, 16  ;;  %vm2970_vm4 = vweird.f32 %v7968_v18 }
 0x471   : > { %v3062_v43 = vxor.u32 %v6512_v11, %v8702_v41  ;;  %3648 = vmatmul.bf16.gmra.mxu0 %v3561_v39  ;;  %v2329_v26 = vsel %vm8068_vm5, %v7668_v22, %v8062_v10  ;;  %v8703_v49 = vsub.f32 1.0, %v7776_v28  ;;  %v3097_v9 = vadd.s32 %v6530_v54, %v3064_v60  ;;  %vm8127_vm13 = vmor %vm2970_vm4, %vm2971_vm3 }
 0x472   : > { %v3320_v17 = vshrl.u32 %v3288_v24, 16  ;;  %v3350_v16 = vxor.u32 %v3318_v34, %v3286_v52  ;;  %v2997_v50 = vadd.s32 112, %v6484_v44  ;;  %v2998_v3 = vadd.s32 120, %v6484_v44 }
 0x473   : > { %v2354_v5 = vmul.f32 %v7736_v13, %v8703_v49  ;;  %v3095_v21 = vadd.s32 %v6530_v54, %v3062_v43  ;;  %v2330_v51 = vand.u32 2147483647, %v7598_v23  ;;  %v2332_v33 = vand.u32 2147483648, %v7598_v23 }
 0x474   : > { %v3129_v30 = vshrl.u32 %v3097_v9, 16  ;;  %v2969_v28 = vadd.f32 %v8015_v57, %v2968_v48  ;;  %v3352_v35 = vxor.u32 %v3320_v17, %v3288_v24  ;;  %v4341_v42 = vxor.u32 2147483648, %v3350_v16  ;;  %v8712_v17 = vld [vmem:[#allocation32_spill] sm:$0xff] }
 0x475   : > { %v3127_v61 = vshrl.u32 %v3095_v21, 16  ;;  %v8098_v53 = vadd.s32 %v6496_v45, %v2997_v50  ;;  %v2355_v31 = vadd.f32 %v7736_v13, %v2354_v5  ;;  %v8102_v14 = vadd.s32 %v6496_v45, %v2998_v3  ;;  %v8724_v3 = vld [vmem:[#allocation31_spill] sm:$0xff] }
 0x476   : > { %v3161_v29 = vxor.u32 %v3129_v30, %v3097_v9  ;;  %v8704_v44 = vand.u32 2147483647, %v7810_v55  ;;  %vm8110_vm8 = vcmp.ge.s32.totalorder %v4341_v42, 3006477107  ;;  %v4343_v52 = vxor.u32 2147483648, %v3352_v35  ;;  %v8725_v30 = vld [vmem:[#allocation21_spill] sm:$0xff] }
 0x477   : > { %v3159_v62 = vxor.u32 %v3127_v61, %v3095_v21  ;;  %vm2356_vm9 = vweird.f32 %v7676_v27  ;;  %v3033_v39 = vmul.u32 2654435761, %v8098_v53  ;;  %v3510_v41 = vsel %vm8110_vm8, %v3478_v46, 0.0  ;;  %v8711_v21 = vld [vmem:[#allocation15_spill] sm:$0xff]  ;;  %v3585_v53 = vpop.f32.mrf.mxu3 }
 0x478   : > { %vm8106_vm6 = vcmp.eq.f32.partialorder %v8704_v44, 8.507059e+37  ;;  %vm2357_vm11 = vweird.f32 %v7736_v13  ;;  %v3193_v55 = vmul.u32 2146121005, %v3161_v29  ;;  %vm3438_vm12 = vcmp.ge.s32.totalorder %v4343_v52, 3006477107 }
 0x479   : > { %v3191_v45 = vmul.u32 2146121005, %v3159_v62  ;;  %v2360_v43 = vand.u32 2147483647, %v7676_v27  ;;  %v3034_v60 = vmul.u32 2654435761, %v8102_v14  ;;  %v3065_v48 = vxor.u32 %v6510_v59, %v3033_v39  ;;  %vm8143_vm10 = vmor %vm2356_vm9, %vm2357_vm11 }
 0x47a   : > { %v3512_v24 = vsel %vm3438_vm12, %v3480_v36, 0.0  ;;  %v2362_v34 = vand.u32 2147483648, %v7676_v27  ;;  %v3225_v5 = vshrl.u32 %v3193_v55, 15  ;;  %v3542_v9 = vmul.f32 %v8711_v21, %v3510_v41  ;;  %v8732_v41 = vld [vmem:[#allocation37_spill] sm:$0xff] }
 0x47b   : > { %v3223_v49 = vshrl.u32 %v3191_v45, 15  ;;  %v3544_v16 = vmul.f32 %v8712_v17, %v3512_v24  ;;  %v3067_v50 = vxor.u32 %v6510_v59, %v3034_v60  ;;  %v3098_v36 = vadd.s32 %v6530_v54, %v3065_v48 }
 0x47c   : > { %vm8135_vm1 = vcmp.eq.f32.partialorder %v2330_v51, 8.507059e+37  ;;  %v2333_v61 = vor.u32 1.1754944e-38, %v2332_v33  ;;  %v3257_v42 = vxor.u32 %v3225_v5, %v3193_v55  ;;  %v2973_v59 = vsel %vm8127_vm13, %v8015_v57, %v2969_v28  ;;  %v3634_v51 = vpop.f32.mrf.mxu0 }
 0x47d   : > { %v3255_v35 = vxor.u32 %v3223_v49, %v3191_v45  ;;  %v3562_v62 = vpack.c.bf16 %v3544_v16, %v3542_v9  ;;  %v3100_v29 = vadd.s32 %v6530_v54, %v3067_v50  ;;  %v3130_v33 = vshrl.u32 %v3098_v36, 16  ;;  %v8733_v45 = vld [vmem:[#allocation13_spill] sm:$0xff] }
 0x47e   : > { %v2363_v14 = vor.u32 1.1754944e-38, %v2362_v34  ;;  %v3289_v27 = vmul.u32 2221713035, %v3257_v42  ;;  %v3635_v12 = vadd.f32 %v3634_v51, %v3585_v53  ;;  %v8717_v52 = vand.u32 2147483647, %v8623_v6 }
 0x47f   : > { %v3287_v44 = vmul.u32 2221713035, %v3255_v35  ;;  %3604 = vmatmul.bf16.gmra.mxu3 %v3562_v62  ;;  %v2359_v57 = vsel %vm8143_vm10, %v7736_v13, %v2355_v31  ;;  %vm2361_vm7 = vcmp.eq.f32.partialorder %v2360_v43, 8.507059e+37  ;;  %v8720_v28 = vand.u32 2147483647, %v8624_v19 }
 0x480   : > { %vm8153_vm2 = vcmp.eq.f32.partialorder %v8717_v52, 8.507059e+37  ;;  %v3132_v55 = vshrl.u32 %v3100_v29, 16  ;;  %v3162_v48 = vxor.u32 %v3130_v33, %v3098_v36  ;;  %v2963_v6 = vsel %vm8106_vm6, %v7902_v2, %v2958_v15  ;;  %3668 = vst [vmem:[%s7727_s1 + $0x20] sm:$0xff] %v3635_v12  ;;  %v8728_v33 = vld [vmem:[#allocation40_spill] sm:$0xff] }
 0x481   : > { %vm8162_vm3 = vcmp.eq.f32.partialorder %v8720_v28, 8.507059e+37  ;;  %vm2975_vm4 = vcmp.eq.f32.partialorder %v2974_v32, 8.507059e+37  ;;  %v3319_v13 = vshrl.u32 %v3287_v44, 16  ;;  %v3321_v19 = vshrl.u32 %v3289_v27, 16 }
 0x482   : > { %v2978_v31 = vsel %vm2975_vm4, %v8064_v7, %v2973_v59  ;;  %v2334_v40 = vsel %vm8135_vm1, %v2333_v61, %v2329_v26  ;;  %v3164_v25 = vxor.u32 %v3132_v55, %v3100_v29  ;;  %v3194_v56 = vmul.u32 2146121005, %v3162_v48  ;;  %v3587_v26 = vpop.f32.mrf.mxu3 }
 0x483   : > { %v2364_v23 = vsel %vm2361_vm7, %v2363_v14, %v2359_v57  ;;  %v3351_v2 = vxor.u32 %v3319_v13, %v3287_v44  ;;  %v3353_v15 = vxor.u32 %v3321_v19, %v3289_v27  ;;  %v3479_v18 = vmul.f32 %v8054_v58, %v2334_v40  ;;  %v8729_v14 = vld [vmem:[#allocation23_spill] sm:$0xff]  ;;  %v8731_v44 = vld [vmem:[#allocation12_spill] sm:$0xff] }
 0x484   : > { %v3481_v32 = vmul.f32 %v7974_v47, %v2364_v23  ;;  %v3196_v43 = vmul.u32 2146121005, %v3164_v25  ;;  %v3226_v24 = vshrl.u32 %v3194_v56, 15  ;;  %v3066_v7 = vxor.u32 %v6512_v11, %v3033_v39  ;;  %v3636_v49 = vpop.f32.mrf.mxu0  ;;  %v8736_v23 = vld [vmem:[#allocation38_spill] sm:$0xff] }
 0x485   : > { %v8188_v38 = vmul.f32 1.25, %v2963_v6  ;;  %v8190_v34 = vmul.f32 1.25, %v2978_v31  ;;  %v4342_v22 = vxor.u32 2147483648, %v3351_v2  ;;  %v4344_v10 = vxor.u32 2147483648, %v3353_v15 }
 0x486   : > { %v3228_v5 = vshrl.u32 %v3196_v43, 15  ;;  %v3258_v46 = vxor.u32 %v3226_v24, %v3194_v56  ;;  %v3068_v21 = vxor.u32 %v6512_v11, %v3034_v60  ;;  %v3099_v58 = vadd.s32 %v6530_v54, %v3066_v7 }
 0x487   : > { %vm3435_vm15 = vcmp.ge.s32.totalorder %v4342_v22, 3006477107  ;;  %vm3441_vm5 = vcmp.ge.s32.totalorder %v4344_v10, 3006477107  ;;  %v3637_v47 = vadd.f32 %v3636_v49, %v3587_v26  ;;  %v8723_v39 = vsub.f32 1.0, %v7823_v0 }
 0x488   : > { %v3511_v17 = vsel %vm3435_vm15, %v3479_v18, 0.0  ;;  %v3513_v16 = vsel %vm3441_vm5, %v3481_v32, 0.0  ;;  %v3260_v50 = vxor.u32 %v3228_v5, %v3196_v43  ;;  %v3290_v36 = vmul.u32 2221713035, %v3258_v46 }
 0x489   : > { %v2384_v9 = vmul.f32 %v7805_v37, %v8723_v39  ;;  %v3543_v61 = vmul.f32 %v8724_v3, %v3511_v17  ;;  %v3545_v35 = vmul.f32 %v8725_v30, %v3513_v16  ;;  %3669 = vst [vmem:[%s7727_s1 + $0x28] sm:$0xff] %v3637_v47  ;;  %v3101_v11 = vadd.s32 %v6530_v54, %v3068_v21  ;;  %v8741_v21 = vld [vmem:[#allocation19_spill] sm:$0xff] }
 0x48a   : > { %v3131_v60 = vshrl.u32 %v3099_v58, 16  ;;  %v2413_v42 = vsub.f32 1.0, %v7875_v20  ;;  %v8726_v0 = vsel %vm7586_vm14, %v8622_v8, %v7526_v1  ;;  %v3292_v59 = vmul.u32 2221713035, %v3260_v50  ;;  %v8742_v47 = vld [vmem:[#allocation11_spill] sm:$0xff] }
 0x48b   : > { %v2379_v53 = vsel %vm8153_vm2, %v7601_v63, %v8726_v0  ;;  %v3322_v51 = vshrl.u32 %v3290_v36, 16  ;;  %v3563_v62 = vpack.c.bf16 %v3545_v35, %v3543_v61  ;;  %v8730_v54 = vsel %vm7607_vm0, %v8728_v33, %v8729_v14  ;;  %v8743_v14 = vld [vmem:[#allocation9_spill] sm:$0xff] }
 0x48c   : > { %v2409_v20 = vsel %vm8162_vm3, %v8731_v44, %v8730_v54  ;;  %v3133_v4 = vshrl.u32 %v3101_v11, 16  ;;  %v3163_v27 = vxor.u32 %v3131_v60, %v3099_v58  ;;  %v3324_v12 = vshrl.u32 %v3292_v59, 16  ;;  %v3590_v46 = vpop.f32.mrf.mxu3  ;;  %v8744_v44 = vld [vmem:[#allocation25_spill] sm:$0xff] }
 0x48d   : > { %v3354_v8 = vxor.u32 %v3322_v51, %v3290_v36  ;;  %v3482_v1 = vmul.f32 %v8188_v38, %v2379_v53  ;;  %v3484_v63 = vmul.f32 %v8190_v34, %v2409_v20  ;;  %3653 = vmatmul.bf16.gmra.mxu0 %v3563_v62  ;;  %v2385_v52 = vadd.f32 %v7805_v37, %v2384_v9 }
 0x48e   : > { %vm2386_vm14 = vweird.f32 %v8732_v41  ;;  %v3165_v57 = vxor.u32 %v3133_v4, %v3101_v11  ;;  %v3195_v28 = vmul.u32 2146121005, %v3163_v27  ;;  %v3356_v55 = vxor.u32 %v3324_v12, %v3292_v59 }
 0x48f   : > { %v4345_v48 = vxor.u32 2147483648, %v3354_v8  ;;  %vm2387_vm0 = vweird.f32 %v7805_v37  ;;  %v2414_v6 = vmul.f32 %v8733_v45, %v2413_v42  ;;  %v2390_v13 = vand.u32 2147483647, %v8732_v41 }
 0x490   : > { %v2392_v19 = vand.u32 2147483648, %v8732_v41  ;;  %v3197_v31 = vmul.u32 2146121005, %v3165_v57  ;;  %v3227_v40 = vshrl.u32 %v3195_v28, 15  ;;  %v4347_v56 = vxor.u32 2147483648, %v3356_v55  ;;  %vm8236_vm11 = vmor %vm2386_vm14, %vm2387_vm0 }
 0x491   : > { %vm8226_vm6 = vcmp.ge.s32.totalorder %v4345_v48, 3006477107  ;;  %vm2416_vm8 = vweird.f32 %v8736_v23  ;;  %vm2417_vm9 = vweird.f32 %v8733_v45  ;;  %v2422_v18 = vand.u32 2147483648, %v8736_v23 }
 0x492   : > { %v3514_v2 = vsel %vm8226_vm6, %v3482_v1, 0.0  ;;  %v3229_v32 = vshrl.u32 %v3197_v31, 15  ;;  %v3259_v43 = vxor.u32 %v3227_v40, %v3195_v28  ;;  %vm3450_vm12 = vcmp.ge.s32.totalorder %v4347_v56, 3006477107  ;;  %vm8243_vm13 = vmor %vm2416_vm8, %vm2417_vm9 }
 0x493   : > { %v2415_v24 = vadd.f32 %v8733_v45, %v2414_v6  ;;  %v2420_v7 = vand.u32 2147483647, %v8736_v23  ;;  %v3516_v22 = vsel %vm3450_vm12, %v3484_v63, 0.0  ;;  %v2393_v10 = vor.u32 1.1754944e-38, %v2392_v19  ;;  %v3639_v61 = vpop.f32.mrf.mxu0 }
 0x494   : > { %v3261_v49 = vxor.u32 %v3229_v32, %v3197_v31  ;;  %v3291_v5 = vmul.u32 2221713035, %v3259_v43  ;;  %v3546_v58 = vmul.f32 %v8741_v21, %v3514_v2  ;;  %v3548_v39 = vmul.f32 %v8742_v47, %v3516_v22  ;;  %v3592_v29 = vpop.f32.mrf.mxu3 }
 0x495   : > { %v2389_v9 = vsel %vm8236_vm11, %v7805_v37, %v2385_v52  ;;  %vm2391_vm1 = vcmp.eq.f32.partialorder %v2390_v13, 8.507059e+37  ;;  %v2423_v17 = vor.u32 1.1754944e-38, %v2422_v18  ;;  %v2419_v3 = vsel %vm8243_vm13, %v8733_v45, %v2415_v24 }
 0x496   : > { %v3293_v16 = vmul.u32 2221713035, %v3261_v49  ;;  %v3323_v50 = vshrl.u32 %v3291_v5, 16  ;;  %v3564_v36 = vpack.c.bf16 %v3548_v39, %v3546_v58  ;;  %vm2421_vm10 = vcmp.eq.f32.partialorder %v2420_v7, 8.507059e+37 }
 0x497   : > { %v2394_v30 = vsel %vm2391_vm1, %v2393_v10, %v2389_v9  ;;  %v3640_v42 = vadd.f32 %v3639_v61, %v3590_v46  ;;  %v2424_v37 = vsel %vm2421_vm10, %v2423_v17, %v2419_v3 }
 0x498   : > { %v3325_v35 = vshrl.u32 %v3293_v16, 16  ;;  %v3355_v11 = vxor.u32 %v3323_v50, %v3291_v5  ;;  %3609 = vmatmul.bf16.gmra.mxu3 %v3564_v36  ;;  %v3483_v60 = vmul.f32 %v8188_v38, %v2394_v30  ;;  %v3485_v59 = vmul.f32 %v8190_v34, %v2424_v37 }
 0x499   : > { %3670 = vst [vmem:[%s7727_s1 + $0x30] sm:$0xff] %v3640_v42 }
 0x49a   : > { %v3357_v0 = vxor.u32 %v3325_v35, %v3293_v16  ;;  %v4346_v53 = vxor.u32 2147483648, %v3355_v11 }
 0x49b   : > { %v3641_v20 = vpop.f32.mrf.mxu0 }
 0x49c   : > { %vm3447_vm2 = vcmp.ge.s32.totalorder %v4346_v53, 3006477107  ;;  %v4348_v51 = vxor.u32 2147483648, %v3357_v0  ;;  %v3642_v4 = vadd.f32 %v3641_v20, %v3592_v29 }
 0x49d   : > { %v3515_v62 = vsel %vm3447_vm2, %v3483_v60, 0.0 }
 0x49e   : > { %vm3453_vm7 = vcmp.ge.s32.totalorder %v4348_v51, 3006477107  ;;  %v3547_v54 = vmul.f32 %v8743_v14, %v3515_v62  ;;  %3671 = vst [vmem:[%s7727_s1 + $0x38] sm:$0xff] %v3642_v4 }
 0x49f   : > { %v3517_v33 = vsel %vm3453_vm7, %v3485_v59, 0.0 }
 0x4a0   : > { %v3549_v38 = vmul.f32 %v8744_v44, %v3517_v33 }
 0x4a2   : > { %v3565_v27 = vpack.c.bf16 %v3549_v38, %v3547_v54 }
 0x4a4   : > { %3658 = vmatmul.bf16.gmra.mxu0 %v3565_v27 }
 0x4ca   : > { %v3644_v34 = vpop.f32.mrf.mxu0  ;;  %v3595_v12 = vpop.f32.mrf.mxu3 }
 0x4cb   : > { %v3645_v8 = vadd.f32 %v3644_v34, %v3595_v12 }
 0x4cd   : > { %3672 = vst [vmem:[%s7727_s1 + $0x40] sm:$0xff] %v3645_v8 }
 0x4d2   : > { %v3646_v1 = vpop.f32.mrf.mxu0  ;;  %v3597_v63 = vpop.f32.mrf.mxu3 }
 0x4d3   : > { %v3647_v52 = vadd.f32 %v3646_v1, %v3597_v63 }
 0x4d5   : > { %3673 = vst [vmem:[%s7727_s1 + $0x48] sm:$0xff] %v3647_v52 }
 0x4ea   : > { %v3600_v41 = vpop.f32.mrf.mxu3 }
 0x4ee   : > { %v3649_v57 = vpop.f32.mrf.mxu0 }
 0x4ef   : > { %v3650_v28 = vadd.f32 %v3649_v57, %v3600_v41 }
 0x4f1   : > { %3674 = vst [vmem:[%s7727_s1 + $0x50] sm:$0xff] %v3650_v28 }
 0x4f2   : > { %v3602_v55 = vpop.f32.mrf.mxu3 }
 0x4f6   : > { %v3651_v48 = vpop.f32.mrf.mxu0 }
 0x4f7   : > { %v3652_v45 = vadd.f32 %v3651_v48, %v3602_v55 }
 0x4f9   : > { %3675 = vst [vmem:[%s7727_s1 + $0x58] sm:$0xff] %v3652_v45 }
 0x502   : > { %v3605_v6 = vpop.f32.mrf.mxu3 }
 0x50a   : > { %v3654_v13 = vpop.f32.mrf.mxu0  ;;  %v3607_v31 = vpop.f32.mrf.mxu3 }
 0x50b   : > { %v3655_v19 = vadd.f32 %v3654_v13, %v3605_v6 }
 0x50d   : > { %3676 = vst [vmem:[%s7727_s1 + $0x60] sm:$0xff] %v3655_v19 }
 0x512   : > { %v3656_v40 = vpop.f32.mrf.mxu0 }
 0x513   : > { %v3657_v25 = vadd.f32 %v3656_v40, %v3607_v31 }
 0x515   : > { %3677 = vst [vmem:[%s7727_s1 + $0x68] sm:$0xff] %v3657_v25 }
 0x51b   : > { %v3610_v56 = vpop.f32.mrf.mxu3 }
 0x521   : > { %v3659_v23 = vpop.f32.mrf.mxu0 }
 0x522   : > { %v3660_v2 = vadd.f32 %v3659_v23, %v3610_v56 }
 0x523   : > { %v3612_v15 = vpop.f32.mrf.mxu3 }
 0x524   : > { %3678 = vst [vmem:[%s7727_s1 + $0x70] sm:$0xff] %v3660_v2 }
 0x529   : > { %v3661_v18 = vpop.f32.mrf.mxu0 }
 0x52a   : > { %v3662_v32 = vadd.f32 %v3661_v18, %v3612_v15 }
 0x52c   : > { %3679 = vst [vmem:[%s7727_s1 + $0x78] sm:$0xff] %v3662_v32 }
 0x52d   : > { %4779 = shalt.err (!%p4776_p3)
}
 0x52e   : > { %s4816_s22 = smov 128   ;;  %s4817_s1 = smov 8  }
 0x52f   : > { %4484 = dma.vmem_to_hbm [thread:$0]  (%p4914_p5), %s3694_s12, 2048, %s3696_s30, %s3681_s14, %s4816_s22, %s4816_s22, %s4817_s1  }
 0x530 PF: > { %p4490_p4 = scmp.ge.s32.totalorder %s4814_s18, 2  ;;  %s3710_s27 = sand.u32 1, %s4802_s15  }
 0x531   : > { %s3711_s29 = scalar_lea.sflag [#allocation5], %s3710_s27 }
 0x532   : > { %p4487_p7 = pnand %p4490_p4, %p4918_p6 }
 0x534   : > { %p4488_p8 = pneg %p4487_p7 }
 0x536   : > { %4797 = dma.done.wait (%p4488_p8), %s3711_s29, 2048  }
 0x537   : > { %4799 = vsyncadd (%p4488_p8), %s3711_s29, 4294965248  ;;  %p21_p9 = scmp.ge.s32.totalorder %s4901_s20, 4   ;;  %s8745_s15 = smov %s4806_s16 }
 0x538   : > { %s8746_s16 = smov %s4810_s17  ;;  %s8747_s17 = smov %s4912_s23 }
 0x539   : > { %s8748_s18 = smov %s4901_s20  ;;  %23 = sbr.rel (!%p21_p9) target bundleno = 6 (0x6), region = 94 }
 0x53e   :  { %3717 = vsyncpa [#allocation5], 1 }
 0x53f   :  { %3719 = vsyncpa [#allocation5 + $0x1], 1 }

</bundles_post_ra>
